<compile_context>
chip_gen: v6e
topology: v6e:2x2x1
jax: 0.10.0
libtpu: 0.0.40
codegen_flags: <defaults>
</compile_context>

<pallas_src>
import functools

import jax
import jax.numpy as jnp
from jax import lax
from jax.experimental import pallas as pl
from jax.experimental.pallas import tpu as pltpu

BETA = 0.9
THRESH = 1.0
BN_EPS = 1e-5
TM_MAX = 512   # M-tile: big enough for ~85% of HBM roofline, fits scoped VMEM


# ----------------------------------------------------------------------------
# Fused conv-as-matmul (+folded BN bias) (+Leaky / downsample / residual / ReLU)
# ----------------------------------------------------------------------------

def _leaky_update(z, mem_prev):
    reset = (mem_prev > THRESH).astype(jnp.float32)
    mem = BETA * mem_prev + z - reset * THRESH
    spk = (mem > THRESH).astype(jnp.float32)
    return spk, mem


def _fused_conv_kernel(*refs, mode):
    """Modes:
       "leaky"            : spk, mem = Leaky(a @ w + b, mem)
       "leaky_residual"   : spk, mem = Leaky(a @ w + b, mem)
                            out = relu(identity + spk)
       "leaky_ds_residual": idn = a2 @ w2 + b2   (downsample conv + BN)
                            spk, mem = Leaky(a @ w + b, mem)
                            out = relu(idn + spk)
    """
    if mode == "leaky":
        a_ref, w_ref, b_ref, mem_ref, out_ref, memo_ref = refs
    elif mode == "leaky_residual":
        a_ref, w_ref, b_ref, mem_ref, id_ref, out_ref, memo_ref = refs
    else:  # "leaky_ds_residual"
        (a_ref, w_ref, b_ref, a2_ref, w2_ref, b2_ref, mem_ref,
         out_ref, memo_ref) = refs

    z = jnp.dot(a_ref[...], w_ref[...],
                preferred_element_type=jnp.float32) + b_ref[...]
    spk, mem = _leaky_update(z, mem_ref[...])
    memo_ref[...] = mem

    if mode == "leaky":
        out_ref[...] = spk
    elif mode == "leaky_residual":
        out_ref[...] = jnp.maximum(id_ref[...] + spk, 0.0)
    else:
        idn = jnp.dot(a2_ref[...], w2_ref[...],
                      preferred_element_type=jnp.float32) + b2_ref[...]
        out_ref[...] = jnp.maximum(idn + spk, 0.0)


def fused_conv_block(a, w, b, mem, *, identity=None, a2=None, w2=None,
                     b2=None, mode="leaky"):
    """out/mem = epilogue(a @ w + b, ...).  a:(M,K) w:(K,N) b:(N,) mem:(M,N).

    MXU operands are bf16, epilogue is f32.  Grid tiles M only (weights stay
    resident: K<=1152, N<=256 here).  The mem buffer is aliased to its output.
    """
    M, K = a.shape
    N = w.shape[1]
    a = a.astype(jnp.bfloat16)
    b_row = b.reshape(1, N).astype(jnp.float32)

    tm = M if M <= TM_MAX else TM_MAX
    grid = (pl.cdiv(M, tm),)

    row_spec = pl.BlockSpec((tm, N), lambda i: (i, 0))

    def full2d(shape):
        return pl.BlockSpec(shape, lambda i: (0, 0))

    in_specs = [pl.BlockSpec((tm, K), lambda i: (i, 0)),
                full2d(w.shape), full2d(b_row.shape)]
    args = [a, w, b_row]

    if mode == "leaky_ds_residual":
        K2 = a2.shape[1]
        b2_row = b2.reshape(1, N).astype(jnp.float32)
        in_specs += [pl.BlockSpec((tm, K2), lambda i: (i, 0)),
                     full2d(w2.shape), full2d(b2_row.shape)]
        args += [a2.astype(jnp.bfloat16), w2, b2_row]

    in_specs.append(row_spec)                      # membrane state (f32)
    args.append(mem.astype(jnp.float32))
    mem_idx = len(args) - 1                        # alias: mem buffer -> new mem

    if mode == "leaky_residual":
        in_specs.append(row_spec)                  # identity (f32)
        args.append(identity.astype(jnp.float32))

    out_shape = (jax.ShapeDtypeStruct((M, N), jnp.float32),
                 jax.ShapeDtypeStruct((M, N), jnp.float32))

    return pl.pallas_call(
        functools.partial(_fused_conv_kernel, mode=mode),
        out_shape=out_shape,
        grid=grid,
        in_specs=in_specs,
        out_specs=(row_spec, row_spec),
        input_output_aliases={mem_idx: 1},
        compiler_params=pltpu.CompilerParams(
            dimension_semantics=("parallel",)),
    )(*args)


# ----------------------------------------------------------------------------
# Fused head: global avg-pool -> fc1 + ReLU -> fc2 -> snn.Leaky
# ----------------------------------------------------------------------------

def _head_kernel(x_ref, w1_ref, b1_ref, w2_ref, b2_ref, mem_ref,
                 spk_ref, memo_ref):
    pooled = jnp.mean(x_ref[...].astype(jnp.float32), axis=1)        # (B, C)
    h = jnp.dot(pooled.astype(jnp.bfloat16), w1_ref[...],
                preferred_element_type=jnp.float32) + b1_ref[...]
    h = jnp.maximum(h, 0.0)
    # TODO(synk): nn.Dropout(p=0.5) is stochastic in train mode; treated as
    # eval-mode identity for a deterministic kernel.
    z = jnp.dot(h.astype(jnp.bfloat16), w2_ref[...],
                preferred_element_type=jnp.float32) + b2_ref[...]
    spk, mem = _leaky_update(z, mem_ref[...])
    memo_ref[...] = mem
    spk_ref[...] = spk


def fused_head(x_bhwc, w1, b1, w2, b2, mem):
    B, H, W, C = x_bhwc.shape
    x3 = x_bhwc.reshape(B, H * W, C).astype(jnp.float32)
    HD = w2.shape[1]
    b1_row = b1.reshape(1, -1).astype(jnp.float32)
    b2_row = b2.reshape(1, -1).astype(jnp.float32)

    def full(shape):
        return pl.BlockSpec(shape, lambda i: (0,) * len(shape))

    return pl.pallas_call(
        _head_kernel,
        out_shape=(jax.ShapeDtypeStruct((B, HD), jnp.float32),
                   jax.ShapeDtypeStruct((B, HD), jnp.float32)),
        grid=(1,),
        in_specs=[full(x3.shape), full(w1.shape), full(b1_row.shape),
                  full(w2.shape), full(b2_row.shape), full(mem.shape)],
        out_specs=(full((B, HD)), full((B, HD))),
        input_output_aliases={5: 1},
    )(x3, w1, b1_row, w2, b2_row, mem.astype(jnp.float32))


# ----------------------------------------------------------------------------
# Glue: im2col (bf16), folded BN, maxpool
# ----------------------------------------------------------------------------

def _conv_out(h, k, s, p):
    return (h + 2 * p - k) // s + 1


def im2col(x_nhwc, kh, kw, stride, padding):
    """Extract conv patches -> (B*Ho*Wo, kh*kw*Cin) in bf16 (MXU operand)."""
    # TODO(synk): internalize im2col into the Pallas conv kernel (read the
    # padded NHWC tensor directly with a per-offset accumulation) to remove
    # the patch-matrix HBM materialization, especially for conv1 (7x7).
    x_nhwc = x_nhwc.astype(jnp.bfloat16)
    B, H, W, C = x_nhwc.shape
    Ho = _conv_out(H, kh, stride, padding)
    Wo = _conv_out(W, kw, stride, padding)
    if kh == 1 and kw == 1 and padding == 0:
        return x_nhwc[:, ::stride, ::stride, :].reshape(B * Ho * Wo, C)
    xp = jnp.pad(x_nhwc, ((0, 0), (padding, padding), (padding, padding), (0, 0)))
    cols = []
    for i in range(kh):
        for j in range(kw):
            sl = lax.slice(
                xp, (0, i, j, 0),
                (B, i + (Ho - 1) * stride + 1, j + (Wo - 1) * stride + 1, C),
                (1, stride, stride, 1))
            cols.append(sl)
    patches = jnp.concatenate(cols, axis=-1)             # (B,Ho,Wo,kh*kw*C)
    return patches.reshape(B * Ho * Wo, kh * kw * C)


def _prep_conv(weight, bn):
    """Conv weight -> matmul form with eval-mode BN scale folded in (bf16)."""
    Cout, Cin, kh, kw = weight.shape
    w_mat = jnp.transpose(weight, (2, 3, 1, 0)).reshape(kh * kw * Cin, Cout)
    gamma, beta_b, mean, var = bn
    s = gamma * lax.rsqrt(var + BN_EPS)
    b = beta_b - mean * s
    return {"w": (w_mat * s[None, :]).astype(jnp.bfloat16),
            "b": b.astype(jnp.float32)}


def maxpool_3x3_s2_p1(x_nhwc):
    # XLA reduce_window: overlapping strided windows fuse, no 9x blowup.
    return lax.reduce_window(
        x_nhwc, -jnp.inf, lax.max,
        window_dimensions=(1, 3, 3, 1),
        window_strides=(1, 2, 2, 1),
        padding=[(0, 0), (1, 1), (1, 1), (0, 0)])


# ----------------------------------------------------------------------------
# Parameters (deterministic synthetic init) and forward pass
# ----------------------------------------------------------------------------

def init_params(key, num_classes, num_boxes, grid_size):
    head_dim = grid_size * grid_size * num_boxes * (5 + num_classes)
    ks = list(jax.random.split(key, 32))

    def conv_w(k, cout, cin, kk):
        fan_in = cin * kk * kk
        return (jax.random.normal(k, (cout, cin, kk, kk), jnp.float32)
                * jnp.sqrt(2.0 / fan_in))

    def bn_p(k, c):
        k1, k2, k3, k4 = jax.random.split(k, 4)
        gamma = 1.0 + 0.1 * jax.random.normal(k1, (c,), jnp.float32)
        beta_b = 0.1 * jax.random.normal(k2, (c,), jnp.float32)
        mean = 0.1 * jax.random.normal(k3, (c,), jnp.float32)
        var = jax.random.uniform(k4, (c,), jnp.float32, 0.5, 1.5)
        return (gamma, beta_b, mean, var)

    def lin(k, cout, cin):
        k1, k2 = jax.random.split(k)
        w = jax.random.normal(k1, (cout, cin), jnp.float32) * jnp.sqrt(1.0 / cin)
        b = 0.01 * jax.random.normal(k2, (cout,), jnp.float32)
        return w, b

    p = {
        "conv1_w": conv_w(ks[0], 64, 3, 7),     "bn1": bn_p(ks[1], 64),
        "conv2_w": conv_w(ks[2], 64, 64, 3),    "bn2": bn_p(ks[3], 64),
        "conv3_w": conv_w(ks[4], 128, 64, 3),   "bn3": bn_p(ks[5], 128),
        "ds3_w":   conv_w(ks[6], 128, 64, 1),   "ds3_bn": bn_p(ks[7], 128),
        "conv4_w": conv_w(ks[8], 256, 128, 3),  "bn4": bn_p(ks[9], 256),
        "ds4_w":   conv_w(ks[10], 256, 128, 1), "ds4_bn": bn_p(ks[11], 256),
    }
    p["fc1_w"], p["fc1_b"] = lin(ks[12], 512, 256)
    p["fc2_w"], p["fc2_b"] = lin(ks[13], head_dim, 512)
    return p


def snn_yolo_forward(x_nchw, params, *, num_steps, num_classes, num_boxes,
                     grid_size):
    """Returns (spk_rec, mem_rec), each (num_steps, B, G, G, nb, 5+nc)."""
    B, _, H, W = x_nchw.shape
    G, NB, C5 = grid_size, num_boxes, 5 + num_classes
    head_dim = G * G * NB * C5

    H1, W1 = _conv_out(H, 7, 2, 3), _conv_out(W, 7, 2, 3)      # conv1
    Hp, Wp = _conv_out(H1, 3, 2, 1), _conv_out(W1, 3, 2, 1)    # maxpool
    H3, W3 = _conv_out(Hp, 3, 2, 1), _conv_out(Wp, 3, 2, 1)    # conv3_1
    H4, W4 = _conv_out(H3, 3, 2, 1), _conv_out(W3, 3, 2, 1)    # conv4_1

    # Weight / BN preprocessing hoisted out of the time loop.
    c1 = _prep_conv(params["conv1_w"], params["bn1"])
    c2 = _prep_conv(params["conv2_w"], params["bn2"])
    c3 = _prep_conv(params["conv3_w"], params["bn3"])
    d3 = _prep_conv(params["ds3_w"], params["ds3_bn"])
    c4 = _prep_conv(params["conv4_w"], params["bn4"])
    d4 = _prep_conv(params["ds4_w"], params["ds4_bn"])
    fc1_w = params["fc1_w"].T.astype(jnp.bfloat16)             # (256, 512)
    fc2_w = params["fc2_w"].T.astype(jnp.bfloat16)             # (512, head_dim)

    mem1 = jnp.zeros((B * H1 * W1, 64), jnp.float32)
    mem2 = jnp.zeros((B * Hp * Wp, 64), jnp.float32)
    mem3 = jnp.zeros((B * H3 * W3, 128), jnp.float32)
    mem4 = jnp.zeros((B * H4 * W4, 256), jnp.float32)
    mem6 = jnp.zeros((B, head_dim), jnp.float32)

    spk_rec, mem_rec = [], []
    for step in range(num_steps):
        xs = x_nchw[:, step * 3:(step + 1) * 3, :, :]
        xs = jnp.transpose(xs, (0, 2, 3, 1)).astype(jnp.float32)   # NCHW->NHWC

        # conv1 + bn1 + snn1; relu(spk1) == spk1 since spk in {0,1}
        spk1, mem1 = fused_conv_block(im2col(xs, 7, 7, 2, 3),
                                      c1["w"], c1["b"], mem1, mode="leaky")
        h = maxpool_3x3_s2_p1(spk1.reshape(B, H1, W1, 64))
        identity = h.reshape(B * Hp * Wp, 64)

        # block 2: conv2_1 + bn + snn + residual add + relu (all fused)
        out2, mem2 = fused_conv_block(im2col(h, 3, 3, 1, 1),
                                      c2["w"], c2["b"], mem2,
                                      identity=identity,
                                      mode="leaky_residual")
        h = out2.reshape(B, Hp, Wp, 64)

        # block 3: 1x1 downsample + conv3_1 + bn + snn + add + relu, one kernel
        out3, mem3 = fused_conv_block(im2col(h, 3, 3, 2, 1),
                                      c3["w"], c3["b"], mem3,
                                      a2=im2col(h, 1, 1, 2, 0),
                                      w2=d3["w"], b2=d3["b"],
                                      mode="leaky_ds_residual")
        h = out3.reshape(B, H3, W3, 128)

        # block 4
        out4, mem4 = fused_conv_block(im2col(h, 3, 3, 2, 1),
                                      c4["w"], c4["b"], mem4,
                                      a2=im2col(h, 1, 1, 2, 0),
                                      w2=d4["w"], b2=d4["b"],
                                      mode="leaky_ds_residual")
        h = out4.reshape(B, H4, W4, 256)

        # head: avgpool -> fc1+relu -> (dropout: eval identity) -> fc2 -> snn6
        spk6, mem6 = fused_head(h, fc1_w, params["fc1_b"],
                                fc2_w, params["fc2_b"], mem6)

        spk_rec.append(spk6.reshape(B, G, G, NB, C5))
        mem_rec.append(mem6.reshape(B, G, G, NB, C5))

    return jnp.stack(spk_rec, axis=0), jnp.stack(mem_rec, axis=0)


if __name__ == "__main__":
    # Small but shape-consistent configuration.
    num_steps = 2
    num_classes, num_boxes, grid_size = 3, 2, 2
    B, H, W = 2, 32, 32

    key = jax.random.PRNGKey(0)
    k_param, k_x = jax.random.split(key)
    params = init_params(k_param, num_classes, num_boxes, grid_size)
    # Stacked image: channels = num_steps * 3 (NCHW, like the PyTorch module).
    x = jax.random.normal(k_x, (B, num_steps * 3, H, W), jnp.float32)

    fwd = jax.jit(functools.partial(
        snn_yolo_forward, num_steps=num_steps, num_classes=num_classes,
        num_boxes=num_boxes, grid_size=grid_size))
    spk_rec, mem_rec = fwd(x, params)
    jax.block_until_ready((spk_rec, mem_rec))

    expected = (num_steps, B, grid_size, grid_size, num_boxes, 5 + num_classes)
    assert spk_rec.shape == expected, spk_rec.shape
    assert mem_rec.shape == expected, mem_rec.shape
    print("KERNEL_OK")
</pallas_src>

<mosaic_0001>
module attributes {stable_mosaic.version = 11 : i64} {
  func.func @_fused_conv_kernel(%arg0: i32, %arg1: memref<512x147xbf16, #tpu.memory_space<vmem>>, %arg2: memref<147x64xbf16, #tpu.memory_space<vmem>>, %arg3: memref<1x64xf32, #tpu.memory_space<vmem>>, %arg4: memref<512x64xf32, #tpu.memory_space<vmem>>, %arg5: memref<512x64xf32, #tpu.memory_space<vmem>>, %arg6: memref<512x64xf32, #tpu.memory_space<vmem>>) attributes {dimension_semantics = [#tpu.dimension_semantics<parallel>], iteration_bounds = array<i64: 1>, scalar_prefetch = 0 : i64, scratch_operands = 0 : i64, tpu.core_type = #tpu.core_type<tc>, window_params = [{transform_indices = @transform_0, window_bounds = array<i64: 512, 147>}, {pipeline_mode = #tpu.pipeline_mode<synchronous>, transform_indices = @transform_1, window_bounds = array<i64: 147, 64>}, {pipeline_mode = #tpu.pipeline_mode<synchronous>, transform_indices = @transform_2, window_bounds = array<i64: 1, 64>}, {transform_indices = @transform_3, window_bounds = array<i64: 512, 64>}, {transform_indices = @transform_4, window_bounds = array<i64: 512, 64>}, {transform_indices = @transform_5, window_bounds = array<i64: 512, 64>}]} {
    %c0 = arith.constant 0 : index
    %c0_0 = arith.constant 0 : index
    %0 = vector.load %arg1[%c0, %c0_0] : memref<512x147xbf16, #tpu.memory_space<vmem>>, vector<512x147xbf16>
    %c0_1 = arith.constant 0 : index
    %c0_2 = arith.constant 0 : index
    %1 = vector.load %arg2[%c0_1, %c0_2] : memref<147x64xbf16, #tpu.memory_space<vmem>>, vector<147x64xbf16>
    %cst = arith.constant dense<0.000000e+00> : vector<512x64xf32>
    %2 = tpu.matmul %0, %1, %cst {dimension_numbers = #tpu.dot_dimension_numbers<[1], [0], [0], [1], [0, 0, 1, 1], [], []>} : vector<512x147xbf16>, vector<147x64xbf16>, vector<512x64xf32> -> vector<512x64xf32>
    %c0_3 = arith.constant 0 : index
    %c0_4 = arith.constant 0 : index
    %3 = vector.load %arg3[%c0_3, %c0_4] : memref<1x64xf32, #tpu.memory_space<vmem>>, vector<1x64xf32>
    %4 = vector.broadcast %3 : vector<1x64xf32> to vector<512x64xf32>
    %5 = arith.addf %2, %4 : vector<512x64xf32>
    %c0_5 = arith.constant 0 : index
    %c0_6 = arith.constant 0 : index
    %6 = vector.load %arg4[%c0_5, %c0_6] : memref<512x64xf32, #tpu.memory_space<vmem>>, vector<512x64xf32>
    %cst_7 = arith.constant 1.000000e+00 : f32
    %7 = vector.broadcast %cst_7 : f32 to vector<512x64xf32>
    %8 = arith.cmpf ogt, %6, %7 : vector<512x64xf32>
    %9 = arith.extui %8 : vector<512x64xi1> to vector<512x64xi32>
    %10 = arith.sitofp %9 : vector<512x64xi32> to vector<512x64xf32>
    %cst_8 = arith.constant 0.899999976 : f32
    %11 = vector.broadcast %cst_8 : f32 to vector<512x64xf32>
    %12 = arith.mulf %11, %6 : vector<512x64xf32>
    %13 = arith.addf %12, %5 : vector<512x64xf32>
    %cst_9 = arith.constant 1.000000e+00 : f32
    %14 = vector.broadcast %cst_9 : f32 to vector<512x64xf32>
    %15 = arith.mulf %10, %14 : vector<512x64xf32>
    %16 = arith.subf %13, %15 : vector<512x64xf32>
    %cst_10 = arith.constant 1.000000e+00 : f32
    %17 = vector.broadcast %cst_10 : f32 to vector<512x64xf32>
    %18 = arith.cmpf ogt, %16, %17 : vector<512x64xf32>
    %19 = arith.extui %18 : vector<512x64xi1> to vector<512x64xi32>
    %20 = arith.sitofp %19 : vector<512x64xi32> to vector<512x64xf32>
    %c0_11 = arith.constant 0 : index
    %c0_12 = arith.constant 0 : index
    %21 = vector.load %arg6[%c0_11, %c0_12] : memref<512x64xf32, #tpu.memory_space<vmem>>, vector<512x64xf32>
    tpu.vector_store %arg6[%c0_11, %c0_12], %16 {strides = array<i32>} : memref<512x64xf32, #tpu.memory_space<vmem>>, vector<512x64xf32>,
    %c0_13 = arith.constant 0 : index
    %c0_14 = arith.constant 0 : index
    %22 = vector.load %arg5[%c0_13, %c0_14] : memref<512x64xf32, #tpu.memory_space<vmem>>, vector<512x64xf32>
    tpu.vector_store %arg5[%c0_13, %c0_14], %20 {strides = array<i32>} : memref<512x64xf32, #tpu.memory_space<vmem>>, vector<512x64xf32>,
    return
  }
  func.func @transform_0(%arg0: i32) -> (i32, i32) {
    %c0_i32 = arith.constant 0 : i32
    %c0_i32_0 = arith.constant 0 : i32
    return %arg0, %c0_i32 : i32, i32
  }
  func.func @transform_1(%arg0: i32) -> (i32, i32) {
    %c0_i32 = arith.constant 0 : i32
    %c0_i32_0 = arith.constant 0 : i32
    %c0_i32_1 = arith.constant 0 : i32
    return %c0_i32, %c0_i32_0 : i32, i32
  }
  func.func @transform_2(%arg0: i32) -> (i32, i32) {
    %c0_i32 = arith.constant 0 : i32
    %c0_i32_0 = arith.constant 0 : i32
    %c0_i32_1 = arith.constant 0 : i32
    return %c0_i32, %c0_i32_0 : i32, i32
  }
  func.func @transform_3(%arg0: i32) -> (i32, i32) {
    %c0_i32 = arith.constant 0 : i32
    %c0_i32_0 = arith.constant 0 : i32
    return %arg0, %c0_i32 : i32, i32
  }
  func.func @transform_4(%arg0: i32) -> (i32, i32) {
    %c0_i32 = arith.constant 0 : i32
    %c0_i32_0 = arith.constant 0 : i32
    return %arg0, %c0_i32 : i32, i32
  }
  func.func @transform_5(%arg0: i32) -> (i32, i32) {
    %c0_i32 = arith.constant 0 : i32
    %c0_i32_0 = arith.constant 0 : i32
    return %arg0, %c0_i32 : i32, i32
  }
}

module attributes {stable_mosaic.version = 11 : i64} {
  func.func @_fused_conv_kernel(%arg0: i32, %arg1: memref<128x576xbf16, #tpu.memory_space<vmem>>, %arg2: memref<576x64xbf16, #tpu.memory_space<vmem>>, %arg3: memref<1x64xf32, #tpu.memory_space<vmem>>, %arg4: memref<128x64xf32, #tpu.memory_space<vmem>>, %arg5: memref<128x64xf32, #tpu.memory_space<vmem>>, %arg6: memref<128x64xf32, #tpu.memory_space<vmem>>, %arg7: memref<128x64xf32, #tpu.memory_space<vmem>>) attributes {dimension_semantics = [#tpu.dimension_semantics<parallel>], iteration_bounds = array<i64: 1>, scalar_prefetch = 0 : i64, scratch_operands = 0 : i64, tpu.core_type = #tpu.core_type<tc>, window_params = [{transform_indices = @transform_0, window_bounds = array<i64: 128, 576>}, {pipeline_mode = #tpu.pipeline_mode<synchronous>, transform_indices = @transform_1, window_bounds = array<i64: 576, 64>}, {pipeline_mode = #tpu.pipeline_mode<synchronous>, transform_indices = @transform_2, window_bounds = array<i64: 1, 64>}, {transform_indices = @transform_3, window_bounds = array<i64: 128, 64>}, {transform_indices = @transform_4, window_bounds = array<i64: 128, 64>}, {transform_indices = @transform_5, window_bounds = array<i64: 128, 64>}, {transform_indices = @transform_6, window_bounds = array<i64: 128, 64>}]} {
    %c0 = arith.constant 0 : index
    %c0_0 = arith.constant 0 : index
    %0 = vector.load %arg1[%c0, %c0_0] : memref<128x576xbf16, #tpu.memory_space<vmem>>, vector<128x576xbf16>
    %c0_1 = arith.constant 0 : index
    %c0_2 = arith.constant 0 : index
    %1 = vector.load %arg2[%c0_1, %c0_2] : memref<576x64xbf16, #tpu.memory_space<vmem>>, vector<576x64xbf16>
    %cst = arith.constant dense<0.000000e+00> : vector<128x64xf32>
    %2 = tpu.matmul %0, %1, %cst {dimension_numbers = #tpu.dot_dimension_numbers<[1], [0], [0], [1], [0, 0, 1, 1], [], []>} : vector<128x576xbf16>, vector<576x64xbf16>, vector<128x64xf32> -> vector<128x64xf32>
    %c0_3 = arith.constant 0 : index
    %c0_4 = arith.constant 0 : index
    %3 = vector.load %arg3[%c0_3, %c0_4] : memref<1x64xf32, #tpu.memory_space<vmem>>, vector<1x64xf32>
    %4 = vector.broadcast %3 : vector<1x64xf32> to vector<128x64xf32>
    %5 = arith.addf %2, %4 : vector<128x64xf32>
    %c0_5 = arith.constant 0 : index
    %c0_6 = arith.constant 0 : index
    %6 = vector.load %arg4[%c0_5, %c0_6] : memref<128x64xf32, #tpu.memory_space<vmem>>, vector<128x64xf32>
    %cst_7 = arith.constant 1.000000e+00 : f32
    %7 = vector.broadcast %cst_7 : f32 to vector<128x64xf32>
    %8 = arith.cmpf ogt, %6, %7 : vector<128x64xf32>
    %9 = arith.extui %8 : vector<128x64xi1> to vector<128x64xi32>
    %10 = arith.sitofp %9 : vector<128x64xi32> to vector<128x64xf32>
    %cst_8 = arith.constant 0.899999976 : f32
    %11 = vector.broadcast %cst_8 : f32 to vector<128x64xf32>
    %12 = arith.mulf %11, %6 : vector<128x64xf32>
    %13 = arith.addf %12, %5 : vector<128x64xf32>
    %cst_9 = arith.constant 1.000000e+00 : f32
    %14 = vector.broadcast %cst_9 : f32 to vector<128x64xf32>
    %15 = arith.mulf %10, %14 : vector<128x64xf32>
    %16 = arith.subf %13, %15 : vector<128x64xf32>
    %cst_10 = arith.constant 1.000000e+00 : f32
    %17 = vector.broadcast %cst_10 : f32 to vector<128x64xf32>
    %18 = arith.cmpf ogt, %16, %17 : vector<128x64xf32>
    %19 = arith.extui %18 : vector<128x64xi1> to vector<128x64xi32>
    %20 = arith.sitofp %19 : vector<128x64xi32> to vector<128x64xf32>
    %c0_11 = arith.constant 0 : index
    %c0_12 = arith.constant 0 : index
    %21 = vector.load %arg7[%c0_11, %c0_12] : memref<128x64xf32, #tpu.memory_space<vmem>>, vector<128x64xf32>
    tpu.vector_store %arg7[%c0_11, %c0_12], %16 {strides = array<i32>} : memref<128x64xf32, #tpu.memory_space<vmem>>, vector<128x64xf32>,
    %c0_13 = arith.constant 0 : index
    %c0_14 = arith.constant 0 : index
    %22 = vector.load %arg5[%c0_13, %c0_14] : memref<128x64xf32, #tpu.memory_space<vmem>>, vector<128x64xf32>
    %23 = arith.addf %22, %20 : vector<128x64xf32>
    %cst_15 = arith.constant 0.000000e+00 : f32
    %24 = vector.broadcast %cst_15 : f32 to vector<128x64xf32>
    %25 = arith.maximumf %23, %24 : vector<128x64xf32>
    %c0_16 = arith.constant 0 : index
    %c0_17 = arith.constant 0 : index
    %26 = vector.load %arg6[%c0_16, %c0_17] : memref<128x64xf32, #tpu.memory_space<vmem>>, vector<128x64xf32>
    tpu.vector_store %arg6[%c0_16, %c0_17], %25 {strides = array<i32>} : memref<128x64xf32, #tpu.memory_space<vmem>>, vector<128x64xf32>,
    return
  }
  func.func @transform_0(%arg0: i32) -> (i32, i32) {
    %c0_i32 = arith.constant 0 : i32
    %c0_i32_0 = arith.constant 0 : i32
    return %arg0, %c0_i32 : i32, i32
  }
  func.func @transform_1(%arg0: i32) -> (i32, i32) {
    %c0_i32 = arith.constant 0 : i32
    %c0_i32_0 = arith.constant 0 : i32
    %c0_i32_1 = arith.constant 0 : i32
    return %c0_i32, %c0_i32_0 : i32, i32
  }
  func.func @transform_2(%arg0: i32) -> (i32, i32) {
    %c0_i32 = arith.constant 0 : i32
    %c0_i32_0 = arith.constant 0 : i32
    %c0_i32_1 = arith.constant 0 : i32
    return %c0_i32, %c0_i32_0 : i32, i32
  }
  func.func @transform_3(%arg0: i32) -> (i32, i32) {
    %c0_i32 = arith.constant 0 : i32
    %c0_i32_0 = arith.constant 0 : i32
    return %arg0, %c0_i32 : i32, i32
  }
  func.func @transform_4(%arg0: i32) -> (i32, i32) {
    %c0_i32 = arith.constant 0 : i32
    %c0_i32_0 = arith.constant 0 : i32
    return %arg0, %c0_i32 : i32, i32
  }
  func.func @transform_5(%arg0: i32) -> (i32, i32) {
    %c0_i32 = arith.constant 0 : i32
    %c0_i32_0 = arith.constant 0 : i32
    return %arg0, %c0_i32 : i32, i32
  }
  func.func @transform_6(%arg0: i32) -> (i32, i32) {
    %c0_i32 = arith.constant 0 : i32
    %c0_i32_0 = arith.constant 0 : i32
    return %arg0, %c0_i32 : i32, i32
  }
}

module attributes {stable_mosaic.version = 11 : i64} {
  func.func @_fused_conv_kernel(%arg0: i32, %arg1: memref<32x576xbf16, #tpu.memory_space<vmem>>, %arg2: memref<576x128xbf16, #tpu.memory_space<vmem>>, %arg3: memref<1x128xf32, #tpu.memory_space<vmem>>, %arg4: memref<32x64xbf16, #tpu.memory_space<vmem>>, %arg5: memref<64x128xbf16, #tpu.memory_space<vmem>>, %arg6: memref<1x128xf32, #tpu.memory_space<vmem>>, %arg7: memref<32x128xf32, #tpu.memory_space<vmem>>, %arg8: memref<32x128xf32, #tpu.memory_space<vmem>>, %arg9: memref<32x128xf32, #tpu.memory_space<vmem>>) attributes {dimension_semantics = [#tpu.dimension_semantics<parallel>], iteration_bounds = array<i64: 1>, scalar_prefetch = 0 : i64, scratch_operands = 0 : i64, tpu.core_type = #tpu.core_type<tc>, window_params = [{transform_indices = @transform_0, window_bounds = array<i64: 32, 576>}, {pipeline_mode = #tpu.pipeline_mode<synchronous>, transform_indices = @transform_1, window_bounds = array<i64: 576, 128>}, {pipeline_mode = #tpu.pipeline_mode<synchronous>, transform_indices = @transform_2, window_bounds = array<i64: 1, 128>}, {transform_indices = @transform_3, window_bounds = array<i64: 32, 64>}, {pipeline_mode = #tpu.pipeline_mode<synchronous>, transform_indices = @transform_4, window_bounds = array<i64: 64, 128>}, {pipeline_mode = #tpu.pipeline_mode<synchronous>, transform_indices = @transform_5, window_bounds = array<i64: 1, 128>}, {transform_indices = @transform_6, window_bounds = array<i64: 32, 128>}, {transform_indices = @transform_7, window_bounds = array<i64: 32, 128>}, {transform_indices = @transform_8, window_bounds = array<i64: 32, 128>}]} {
    %c0 = arith.constant 0 : index
    %c0_0 = arith.constant 0 : index
    %0 = vector.load %arg1[%c0, %c0_0] : memref<32x576xbf16, #tpu.memory_space<vmem>>, vector<32x576xbf16>
    %c0_1 = arith.constant 0 : index
    %c0_2 = arith.constant 0 : index
    %1 = vector.load %arg2[%c0_1, %c0_2] : memref<576x128xbf16, #tpu.memory_space<vmem>>, vector<576x128xbf16>
    %cst = arith.constant dense<0.000000e+00> : vector<32x128xf32>
    %2 = tpu.matmul %0, %1, %cst {dimension_numbers = #tpu.dot_dimension_numbers<[1], [0], [0], [1], [0, 0, 1, 1], [], []>} : vector<32x576xbf16>, vector<576x128xbf16>, vector<32x128xf32> -> vector<32x128xf32>
    %c0_3 = arith.constant 0 : index
    %c0_4 = arith.constant 0 : index
    %3 = vector.load %arg3[%c0_3, %c0_4] : memref<1x128xf32, #tpu.memory_space<vmem>>, vector<1x128xf32>
    %4 = vector.broadcast %3 : vector<1x128xf32> to vector<32x128xf32>
    %5 = arith.addf %2, %4 : vector<32x128xf32>
    %c0_5 = arith.constant 0 : index
    %c0_6 = arith.constant 0 : index
    %6 = vector.load %arg7[%c0_5, %c0_6] : memref<32x128xf32, #tpu.memory_space<vmem>>, vector<32x128xf32>
    %cst_7 = arith.constant 1.000000e+00 : f32
    %7 = vector.broadcast %cst_7 : f32 to vector<32x128xf32>
    %8 = arith.cmpf ogt, %6, %7 : vector<32x128xf32>
    %9 = arith.extui %8 : vector<32x128xi1> to vector<32x128xi32>
    %10 = arith.sitofp %9 : vector<32x128xi32> to vector<32x128xf32>
    %cst_8 = arith.constant 0.899999976 : f32
    %11 = vector.broadcast %cst_8 : f32 to vector<32x128xf32>
    %12 = arith.mulf %11, %6 : vector<32x128xf32>
    %13 = arith.addf %12, %5 : vector<32x128xf32>
    %cst_9 = arith.constant 1.000000e+00 : f32
    %14 = vector.broadcast %cst_9 : f32 to vector<32x128xf32>
    %15 = arith.mulf %10, %14 : vector<32x128xf32>
    %16 = arith.subf %13, %15 : vector<32x128xf32>
    %cst_10 = arith.constant 1.000000e+00 : f32
    %17 = vector.broadcast %cst_10 : f32 to vector<32x128xf32>
    %18 = arith.cmpf ogt, %16, %17 : vector<32x128xf32>
    %19 = arith.extui %18 : vector<32x128xi1> to vector<32x128xi32>
    %20 = arith.sitofp %19 : vector<32x128xi32> to vector<32x128xf32>
    %c0_11 = arith.constant 0 : index
    %c0_12 = arith.constant 0 : index
    %21 = vector.load %arg9[%c0_11, %c0_12] : memref<32x128xf32, #tpu.memory_space<vmem>>, vector<32x128xf32>
    tpu.vector_store %arg9[%c0_11, %c0_12], %16 {strides = array<i32>} : memref<32x128xf32, #tpu.memory_space<vmem>>, vector<32x128xf32>,
    %c0_13 = arith.constant 0 : index
    %c0_14 = arith.constant 0 : index
    %22 = vector.load %arg4[%c0_13, %c0_14] : memref<32x64xbf16, #tpu.memory_space<vmem>>, vector<32x64xbf16>
    %c0_15 = arith.constant 0 : index
    %c0_16 = arith.constant 0 : index
    %23 = vector.load %arg5[%c0_15, %c0_16] : memref<64x128xbf16, #tpu.memory_space<vmem>>, vector<64x128xbf16>
    %cst_17 = arith.constant dense<0.000000e+00> : vector<32x128xf32>
    %24 = tpu.matmul %22, %23, %cst_17 {dimension_numbers = #tpu.dot_dimension_numbers<[1], [0], [0], [1], [0, 0, 1, 1], [], []>} : vector<32x64xbf16>, vector<64x128xbf16>, vector<32x128xf32> -> vector<32x128xf32>
    %c0_18 = arith.constant 0 : index
    %c0_19 = arith.constant 0 : index
    %25 = vector.load %arg6[%c0_18, %c0_19] : memref<1x128xf32, #tpu.memory_space<vmem>>, vector<1x128xf32>
    %26 = vector.broadcast %25 : vector<1x128xf32> to vector<32x128xf32>
    %27 = arith.addf %24, %26 : vector<32x128xf32>
    %28 = arith.addf %27, %20 : vector<32x128xf32>
    %cst_20 = arith.constant 0.000000e+00 : f32
    %29 = vector.broadcast %cst_20 : f32 to vector<32x128xf32>
    %30 = arith.maximumf %28, %29 : vector<32x128xf32>
    %c0_21 = arith.constant 0 : index
    %c0_22 = arith.constant 0 : index
    %31 = vector.load %arg8[%c0_21, %c0_22] : memref<32x128xf32, #tpu.memory_space<vmem>>, vector<32x128xf32>
    tpu.vector_store %arg8[%c0_21, %c0_22], %30 {strides = array<i32>} : memref<32x128xf32, #tpu.memory_space<vmem>>, vector<32x128xf32>,
    return
  }
  func.func @transform_0(%arg0: i32) -> (i32, i32) {
    %c0_i32 = arith.constant 0 : i32
    %c0_i32_0 = arith.constant 0 : i32
    return %arg0, %c0_i32 : i32, i32
  }
  func.func @transform_1(%arg0: i32) -> (i32, i32) {
    %c0_i32 = arith.constant 0 : i32
    %c0_i32_0 = arith.constant 0 : i32
    %c0_i32_1 = arith.constant 0 : i32
    return %c0_i32, %c0_i32_0 : i32, i32
  }
  func.func @transform_2(%arg0: i32) -> (i32, i32) {
    %c0_i32 = arith.constant 0 : i32
    %c0_i32_0 = arith.constant 0 : i32
    %c0_i32_1 = arith.constant 0 : i32
    return %c0_i32, %c0_i32_0 : i32, i32
  }
  func.func @transform_3(%arg0: i32) -> (i32, i32) {
    %c0_i32 = arith.constant 0 : i32
    %c0_i32_0 = arith.constant 0 : i32
    return %arg0, %c0_i32 : i32, i32
  }
  func.func @transform_4(%arg0: i32) -> (i32, i32) {
    %c0_i32 = arith.constant 0 : i32
    %c0_i32_0 = arith.constant 0 : i32
    %c0_i32_1 = arith.constant 0 : i32
    return %c0_i32, %c0_i32_0 : i32, i32
  }
  func.func @transform_5(%arg0: i32) -> (i32, i32) {
    %c0_i32 = arith.constant 0 : i32
    %c0_i32_0 = arith.constant 0 : i32
    %c0_i32_1 = arith.constant 0 : i32
    return %c0_i32, %c0_i32_0 : i32, i32
  }
  func.func @transform_6(%arg0: i32) -> (i32, i32) {
    %c0_i32 = arith.constant 0 : i32
    %c0_i32_0 = arith.constant 0 : i32
    return %arg0, %c0_i32 : i32, i32
  }
  func.func @transform_7(%arg0: i32) -> (i32, i32) {
    %c0_i32 = arith.constant 0 : i32
    %c0_i32_0 = arith.constant 0 : i32
    return %arg0, %c0_i32 : i32, i32
  }
  func.func @transform_8(%arg0: i32) -> (i32, i32) {
    %c0_i32 = arith.constant 0 : i32
    %c0_i32_0 = arith.constant 0 : i32
    return %arg0, %c0_i32 : i32, i32
  }
}

module attributes {stable_mosaic.version = 11 : i64} {
  func.func @_fused_conv_kernel(%arg0: i32, %arg1: memref<8x1152xbf16, #tpu.memory_space<vmem>>, %arg2: memref<1152x256xbf16, #tpu.memory_space<vmem>>, %arg3: memref<1x256xf32, #tpu.memory_space<vmem>>, %arg4: memref<8x128xbf16, #tpu.memory_space<vmem>>, %arg5: memref<128x256xbf16, #tpu.memory_space<vmem>>, %arg6: memref<1x256xf32, #tpu.memory_space<vmem>>, %arg7: memref<8x256xf32, #tpu.memory_space<vmem>>, %arg8: memref<8x256xf32, #tpu.memory_space<vmem>>, %arg9: memref<8x256xf32, #tpu.memory_space<vmem>>) attributes {dimension_semantics = [#tpu.dimension_semantics<parallel>], iteration_bounds = array<i64: 1>, scalar_prefetch = 0 : i64, scratch_operands = 0 : i64, tpu.core_type = #tpu.core_type<tc>, window_params = [{transform_indices = @transform_0, window_bounds = array<i64: 8, 1152>}, {pipeline_mode = #tpu.pipeline_mode<synchronous>, transform_indices = @transform_1, window_bounds = array<i64: 1152, 256>}, {pipeline_mode = #tpu.pipeline_mode<synchronous>, transform_indices = @transform_2, window_bounds = array<i64: 1, 256>}, {transform_indices = @transform_3, window_bounds = array<i64: 8, 128>}, {pipeline_mode = #tpu.pipeline_mode<synchronous>, transform_indices = @transform_4, window_bounds = array<i64: 128, 256>}, {pipeline_mode = #tpu.pipeline_mode<synchronous>, transform_indices = @transform_5, window_bounds = array<i64: 1, 256>}, {transform_indices = @transform_6, window_bounds = array<i64: 8, 256>}, {transform_indices = @transform_7, window_bounds = array<i64: 8, 256>}, {transform_indices = @transform_8, window_bounds = array<i64: 8, 256>}]} {
    %c0 = arith.constant 0 : index
    %c0_0 = arith.constant 0 : index
    %0 = vector.load %arg1[%c0, %c0_0] : memref<8x1152xbf16, #tpu.memory_space<vmem>>, vector<8x1152xbf16>
    %c0_1 = arith.constant 0 : index
    %c0_2 = arith.constant 0 : index
    %1 = vector.load %arg2[%c0_1, %c0_2] : memref<1152x256xbf16, #tpu.memory_space<vmem>>, vector<1152x256xbf16>
    %cst = arith.constant dense<0.000000e+00> : vector<8x256xf32>
    %2 = tpu.matmul %0, %1, %cst {dimension_numbers = #tpu.dot_dimension_numbers<[1], [0], [0], [1], [0, 0, 1, 1], [], []>} : vector<8x1152xbf16>, vector<1152x256xbf16>, vector<8x256xf32> -> vector<8x256xf32>
    %c0_3 = arith.constant 0 : index
    %c0_4 = arith.constant 0 : index
    %3 = vector.load %arg3[%c0_3, %c0_4] : memref<1x256xf32, #tpu.memory_space<vmem>>, vector<1x256xf32>
    %4 = vector.broadcast %3 : vector<1x256xf32> to vector<8x256xf32>
    %5 = arith.addf %2, %4 : vector<8x256xf32>
    %c0_5 = arith.constant 0 : index
    %c0_6 = arith.constant 0 : index
    %6 = vector.load %arg7[%c0_5, %c0_6] : memref<8x256xf32, #tpu.memory_space<vmem>>, vector<8x256xf32>
    %cst_7 = arith.constant 1.000000e+00 : f32
    %7 = vector.broadcast %cst_7 : f32 to vector<8x256xf32>
    %8 = arith.cmpf ogt, %6, %7 : vector<8x256xf32>
    %9 = arith.extui %8 : vector<8x256xi1> to vector<8x256xi32>
    %10 = arith.sitofp %9 : vector<8x256xi32> to vector<8x256xf32>
    %cst_8 = arith.constant 0.899999976 : f32
    %11 = vector.broadcast %cst_8 : f32 to vector<8x256xf32>
    %12 = arith.mulf %11, %6 : vector<8x256xf32>
    %13 = arith.addf %12, %5 : vector<8x256xf32>
    %cst_9 = arith.constant 1.000000e+00 : f32
    %14 = vector.broadcast %cst_9 : f32 to vector<8x256xf32>
    %15 = arith.mulf %10, %14 : vector<8x256xf32>
    %16 = arith.subf %13, %15 : vector<8x256xf32>
    %cst_10 = arith.constant 1.000000e+00 : f32
    %17 = vector.broadcast %cst_10 : f32 to vector<8x256xf32>
    %18 = arith.cmpf ogt, %16, %17 : vector<8x256xf32>
    %19 = arith.extui %18 : vector<8x256xi1> to vector<8x256xi32>
    %20 = arith.sitofp %19 : vector<8x256xi32> to vector<8x256xf32>
    %c0_11 = arith.constant 0 : index
    %c0_12 = arith.constant 0 : index
    %21 = vector.load %arg9[%c0_11, %c0_12] : memref<8x256xf32, #tpu.memory_space<vmem>>, vector<8x256xf32>
    tpu.vector_store %arg9[%c0_11, %c0_12], %16 {strides = array<i32>} : memref<8x256xf32, #tpu.memory_space<vmem>>, vector<8x256xf32>,
    %c0_13 = arith.constant 0 : index
    %c0_14 = arith.constant 0 : index
    %22 = vector.load %arg4[%c0_13, %c0_14] : memref<8x128xbf16, #tpu.memory_space<vmem>>, vector<8x128xbf16>
    %c0_15 = arith.constant 0 : index
    %c0_16 = arith.constant 0 : index
    %23 = vector.load %arg5[%c0_15, %c0_16] : memref<128x256xbf16, #tpu.memory_space<vmem>>, vector<128x256xbf16>
    %cst_17 = arith.constant dense<0.000000e+00> : vector<8x256xf32>
    %24 = tpu.matmul %22, %23, %cst_17 {dimension_numbers = #tpu.dot_dimension_numbers<[1], [0], [0], [1], [0, 0, 1, 1], [], []>} : vector<8x128xbf16>, vector<128x256xbf16>, vector<8x256xf32> -> vector<8x256xf32>
    %c0_18 = arith.constant 0 : index
    %c0_19 = arith.constant 0 : index
    %25 = vector.load %arg6[%c0_18, %c0_19] : memref<1x256xf32, #tpu.memory_space<vmem>>, vector<1x256xf32>
    %26 = vector.broadcast %25 : vector<1x256xf32> to vector<8x256xf32>
    %27 = arith.addf %24, %26 : vector<8x256xf32>
    %28 = arith.addf %27, %20 : vector<8x256xf32>
    %cst_20 = arith.constant 0.000000e+00 : f32
    %29 = vector.broadcast %cst_20 : f32 to vector<8x256xf32>
    %30 = arith.maximumf %28, %29 : vector<8x256xf32>
    %c0_21 = arith.constant 0 : index
    %c0_22 = arith.constant 0 : index
    %31 = vector.load %arg8[%c0_21, %c0_22] : memref<8x256xf32, #tpu.memory_space<vmem>>, vector<8x256xf32>
    tpu.vector_store %arg8[%c0_21, %c0_22], %30 {strides = array<i32>} : memref<8x256xf32, #tpu.memory_space<vmem>>, vector<8x256xf32>,
    return
  }
  func.func @transform_0(%arg0: i32) -> (i32, i32) {
    %c0_i32 = arith.constant 0 : i32
    %c0_i32_0 = arith.constant 0 : i32
    return %arg0, %c0_i32 : i32, i32
  }
  func.func @transform_1(%arg0: i32) -> (i32, i32) {
    %c0_i32 = arith.constant 0 : i32
    %c0_i32_0 = arith.constant 0 : i32
    %c0_i32_1 = arith.constant 0 : i32
    return %c0_i32, %c0_i32_0 : i32, i32
  }
  func.func @transform_2(%arg0: i32) -> (i32, i32) {
    %c0_i32 = arith.constant 0 : i32
    %c0_i32_0 = arith.constant 0 : i32
    %c0_i32_1 = arith.constant 0 : i32
    return %c0_i32, %c0_i32_0 : i32, i32
  }
  func.func @transform_3(%arg0: i32) -> (i32, i32) {
    %c0_i32 = arith.constant 0 : i32
    %c0_i32_0 = arith.constant 0 : i32
    return %arg0, %c0_i32 : i32, i32
  }
  func.func @transform_4(%arg0: i32) -> (i32, i32) {
    %c0_i32 = arith.constant 0 : i32
    %c0_i32_0 = arith.constant 0 : i32
    %c0_i32_1 = arith.constant 0 : i32
    return %c0_i32, %c0_i32_0 : i32, i32
  }
  func.func @transform_5(%arg0: i32) -> (i32, i32) {
    %c0_i32 = arith.constant 0 : i32
    %c0_i32_0 = arith.constant 0 : i32
    %c0_i32_1 = arith.constant 0 : i32
    return %c0_i32, %c0_i32_0 : i32, i32
  }
  func.func @transform_6(%arg0: i32) -> (i32, i32) {
    %c0_i32 = arith.constant 0 : i32
    %c0_i32_0 = arith.constant 0 : i32
    return %arg0, %c0_i32 : i32, i32
  }
  func.func @transform_7(%arg0: i32) -> (i32, i32) {
    %c0_i32 = arith.constant 0 : i32
    %c0_i32_0 = arith.constant 0 : i32
    return %arg0, %c0_i32 : i32, i32
  }
  func.func @transform_8(%arg0: i32) -> (i32, i32) {
    %c0_i32 = arith.constant 0 : i32
    %c0_i32_0 = arith.constant 0 : i32
    return %arg0, %c0_i32 : i32, i32
  }
}

module attributes {stable_mosaic.version = 11 : i64} {
  func.func @_head_kernel(%arg0: i32, %arg1: memref<2x4x256xf32, #tpu.memory_space<vmem>>, %arg2: memref<256x512xbf16, #tpu.memory_space<vmem>>, %arg3: memref<1x512xf32, #tpu.memory_space<vmem>>, %arg4: memref<512x64xbf16, #tpu.memory_space<vmem>>, %arg5: memref<1x64xf32, #tpu.memory_space<vmem>>, %arg6: memref<2x64xf32, #tpu.memory_space<vmem>>, %arg7: memref<2x64xf32, #tpu.memory_space<vmem>>, %arg8: memref<2x64xf32, #tpu.memory_space<vmem>>) attributes {dimension_semantics = [#tpu.dimension_semantics<arbitrary>], iteration_bounds = array<i64: 1>, scalar_prefetch = 0 : i64, scratch_operands = 0 : i64, tpu.core_type = #tpu.core_type<tc>, window_params = [{pipeline_mode = #tpu.pipeline_mode<synchronous>, transform_indices = @transform_0, window_bounds = array<i64: 2, 4, 256>}, {pipeline_mode = #tpu.pipeline_mode<synchronous>, transform_indices = @transform_1, window_bounds = array<i64: 256, 512>}, {pipeline_mode = #tpu.pipeline_mode<synchronous>, transform_indices = @transform_2, window_bounds = array<i64: 1, 512>}, {pipeline_mode = #tpu.pipeline_mode<synchronous>, transform_indices = @transform_3, window_bounds = array<i64: 512, 64>}, {pipeline_mode = #tpu.pipeline_mode<synchronous>, transform_indices = @transform_4, window_bounds = array<i64: 1, 64>}, {pipeline_mode = #tpu.pipeline_mode<synchronous>, transform_indices = @transform_5, window_bounds = array<i64: 2, 64>}, {pipeline_mode = #tpu.pipeline_mode<synchronous>, transform_indices = @transform_6, window_bounds = array<i64: 2, 64>}, {pipeline_mode = #tpu.pipeline_mode<synchronous>, transform_indices = @transform_7, window_bounds = array<i64: 2, 64>}]} {
    %c0 = arith.constant 0 : index
    %c0_0 = arith.constant 0 : index
    %c0_1 = arith.constant 0 : index
    %0 = vector.load %arg1[%c0, %c0_0, %c0_1] : memref<2x4x256xf32, #tpu.memory_space<vmem>>, vector<2x4x256xf32>
    %cst = arith.constant dense<0.000000e+00> : vector<2x256xf32>
    %1 = vector.multi_reduction <add>, %0, %cst [1] : vector<2x4x256xf32> to vector<2x256xf32>
    %cst_2 = arith.constant 4.000000e+00 : f32
    %2 = vector.broadcast %cst_2 : f32 to vector<2x256xf32>
    %3 = arith.divf %1, %2 : vector<2x256xf32>
    %4 = arith.truncf %3 : vector<2x256xf32> to vector<2x256xbf16>
    %c0_3 = arith.constant 0 : index
    %c0_4 = arith.constant 0 : index
    %5 = vector.load %arg2[%c0_3, %c0_4] : memref<256x512xbf16, #tpu.memory_space<vmem>>, vector<256x512xbf16>
    %cst_5 = arith.constant dense<0.000000e+00> : vector<2x512xf32>
    %6 = tpu.matmul %4, %5, %cst_5 {dimension_numbers = #tpu.dot_dimension_numbers<[1], [0], [0], [1], [0, 0, 1, 1], [], []>} : vector<2x256xbf16>, vector<256x512xbf16>, vector<2x512xf32> -> vector<2x512xf32>
    %c0_6 = arith.constant 0 : index
    %c0_7 = arith.constant 0 : index
    %7 = vector.load %arg3[%c0_6, %c0_7] : memref<1x512xf32, #tpu.memory_space<vmem>>, vector<1x512xf32>
    %8 = vector.broadcast %7 : vector<1x512xf32> to vector<2x512xf32>
    %9 = arith.addf %6, %8 : vector<2x512xf32>
    %cst_8 = arith.constant 0.000000e+00 : f32
    %10 = vector.broadcast %cst_8 : f32 to vector<2x512xf32>
    %11 = arith.maximumf %9, %10 : vector<2x512xf32>
    %12 = arith.truncf %11 : vector<2x512xf32> to vector<2x512xbf16>
    %c0_9 = arith.constant 0 : index
    %c0_10 = arith.constant 0 : index
    %13 = vector.load %arg4[%c0_9, %c0_10] : memref<512x64xbf16, #tpu.memory_space<vmem>>, vector<512x64xbf16>
    %cst_11 = arith.constant dense<0.000000e+00> : vector<2x64xf32>
    %14 = tpu.matmul %12, %13, %cst_11 {dimension_numbers = #tpu.dot_dimension_numbers<[1], [0], [0], [1], [0, 0, 1, 1], [], []>} : vector<2x512xbf16>, vector<512x64xbf16>, vector<2x64xf32> -> vector<2x64xf32>
    %c0_12 = arith.constant 0 : index
    %c0_13 = arith.constant 0 : index
    %15 = vector.load %arg5[%c0_12, %c0_13] : memref<1x64xf32, #tpu.memory_space<vmem>>, vector<1x64xf32>
    %16 = vector.broadcast %15 : vector<1x64xf32> to vector<2x64xf32>
    %17 = arith.addf %14, %16 : vector<2x64xf32>
    %c0_14 = arith.constant 0 : index
    %c0_15 = arith.constant 0 : index
    %18 = vector.load %arg6[%c0_14, %c0_15] : memref<2x64xf32, #tpu.memory_space<vmem>>, vector<2x64xf32>
    %cst_16 = arith.constant 1.000000e+00 : f32
    %19 = vector.broadcast %cst_16 : f32 to vector<2x64xf32>
    %20 = arith.cmpf ogt, %18, %19 : vector<2x64xf32>
    %21 = arith.extui %20 : vector<2x64xi1> to vector<2x64xi32>
    %22 = arith.sitofp %21 : vector<2x64xi32> to vector<2x64xf32>
    %cst_17 = arith.constant 0.899999976 : f32
    %23 = vector.broadcast %cst_17 : f32 to vector<2x64xf32>
    %24 = arith.mulf %23, %18 : vector<2x64xf32>
    %25 = arith.addf %24, %17 : vector<2x64xf32>
    %cst_18 = arith.constant 1.000000e+00 : f32
    %26 = vector.broadcast %cst_18 : f32 to vector<2x64xf32>
    %27 = arith.mulf %22, %26 : vector<2x64xf32>
    %28 = arith.subf %25, %27 : vector<2x64xf32>
    %cst_19 = arith.constant 1.000000e+00 : f32
    %29 = vector.broadcast %cst_19 : f32 to vector<2x64xf32>
    %30 = arith.cmpf ogt, %28, %29 : vector<2x64xf32>
    %31 = arith.extui %30 : vector<2x64xi1> to vector<2x64xi32>
    %32 = arith.sitofp %31 : vector<2x64xi32> to vector<2x64xf32>
    %c0_20 = arith.constant 0 : index
    %c0_21 = arith.constant 0 : index
    %33 = vector.load %arg8[%c0_20, %c0_21] : memref<2x64xf32, #tpu.memory_space<vmem>>, vector<2x64xf32>
    tpu.vector_store %arg8[%c0_20, %c0_21], %28 {strides = array<i32>} : memref<2x64xf32, #tpu.memory_space<vmem>>, vector<2x64xf32>,
    %c0_22 = arith.constant 0 : index
    %c0_23 = arith.constant 0 : index
    %34 = vector.load %arg7[%c0_22, %c0_23] : memref<2x64xf32, #tpu.memory_space<vmem>>, vector<2x64xf32>
    tpu.vector_store %arg7[%c0_22, %c0_23], %32 {strides = array<i32>} : memref<2x64xf32, #tpu.memory_space<vmem>>, vector<2x64xf32>,
    return
  }
  func.func @transform_0(%arg0: i32) -> (i32, i32, i32) {
    %c0_i32 = arith.constant 0 : i32
    %c0_i32_0 = arith.constant 0 : i32
    %c0_i32_1 = arith.constant 0 : i32
    %c0_i32_2 = arith.constant 0 : i32
    return %c0_i32, %c0_i32_0, %c0_i32_1 : i32, i32, i32
  }
  func.func @transform_1(%arg0: i32) -> (i32, i32) {
    %c0_i32 = arith.constant 0 : i32
    %c0_i32_0 = arith.constant 0 : i32
    %c0_i32_1 = arith.constant 0 : i32
    return %c0_i32, %c0_i32_0 : i32, i32
  }
  func.func @transform_2(%arg0: i32) -> (i32, i32) {
    %c0_i32 = arith.constant 0 : i32
    %c0_i32_0 = arith.constant 0 : i32
    %c0_i32_1 = arith.constant 0 : i32
    return %c0_i32, %c0_i32_0 : i32, i32
  }
  func.func @transform_3(%arg0: i32) -> (i32, i32) {
    %c0_i32 = arith.constant 0 : i32
    %c0_i32_0 = arith.constant 0 : i32
    %c0_i32_1 = arith.constant 0 : i32
    return %c0_i32, %c0_i32_0 : i32, i32
  }
  func.func @transform_4(%arg0: i32) -> (i32, i32) {
    %c0_i32 = arith.constant 0 : i32
    %c0_i32_0 = arith.constant 0 : i32
    %c0_i32_1 = arith.constant 0 : i32
    return %c0_i32, %c0_i32_0 : i32, i32
  }
  func.func @transform_5(%arg0: i32) -> (i32, i32) {
    %c0_i32 = arith.constant 0 : i32
    %c0_i32_0 = arith.constant 0 : i32
    %c0_i32_1 = arith.constant 0 : i32
    return %c0_i32, %c0_i32_0 : i32, i32
  }
  func.func @transform_6(%arg0: i32) -> (i32, i32) {
    %c0_i32 = arith.constant 0 : i32
    %c0_i32_0 = arith.constant 0 : i32
    %c0_i32_1 = arith.constant 0 : i32
    return %c0_i32, %c0_i32_0 : i32, i32
  }
  func.func @transform_7(%arg0: i32) -> (i32, i32) {
    %c0_i32 = arith.constant 0 : i32
    %c0_i32_0 = arith.constant 0 : i32
    %c0_i32_1 = arith.constant 0 : i32
    return %c0_i32, %c0_i32_0 : i32, i32
  }
}

</mosaic_0001>

<bundles_post_ra>
// kernel: snn_yolo_forward.11
= control target key start
LH: loop header
LB: loop body
LE: loop exit
PB: predicated region body
PF: predicated region fallthrough
CT: control target
= control target key end

     0   :  { %vm566_vm0 = vcmask 523264   ;;  %s2339_s1 = inlined_call_operand.vmem [shape: bf16[576,64], index: 1, kind: input, shape index: {}]   ;;  %s2340_s0 = inlined_call_operand.vmem [shape: bf16[128,576], index: 0, kind: input, shape index: {}]   ;;  %s2341_s2 = inlined_call_operand.vmem [shape: f32[1,64], index: 2, kind: input, shape index: {}]   ;;  %s2342_s3 = inlined_call_operand.vmem [shape: f32[128,64], index: 3, kind: input, shape index: {}, may-alias: {3,6}]   ;;  %s2343_s4 = inlined_call_operand.vmem [shape: f32[128,64], index: 4, kind: input, shape index: {}]   ;;  %s2344_s6 = inlined_call_operand.vmem [shape: f32[128,64], index: 6, kind: output, shape index: {1}, may-alias: {3,6}]   ;;  %s2345_s5 = inlined_call_operand.vmem [shape: f32[128,64], index: 5, kind: output, shape index: {0}]  }
   0x1   :  { %v1420_v0 = vld [vmem:[%s2339_s1 + $0x78] sm:$0xff]   ;;  %v1424_v4 = vld [vmem:[%s2339_s1 + $0x70] sm:$0xff]   ;;  %v1428_v8 = vld [vmem:[%s2339_s1 + $0x68] sm:$0xff]  }
   0x2   :  { %v1421_v1 = vld [vmem:[%s2339_s1 + $0xf8] sm:$0xff]   ;;  %1247 = vmatprep.subr.bf16.mxu0 %v1420_v0  ;;  %v1425_v5 = vld [vmem:[%s2339_s1 + $0xf0] sm:$0xff]   ;;  %v1429_v9 = vld [vmem:[%s2339_s1 + $0xe8] sm:$0xff]  }
   0x3   :  { %v1422_v2 = vld [vmem:[%s2339_s1 + $0x38] sm:$0xff]   ;;  %1311 = vmatprep.subr.bf16.mxu1 %v1421_v1  ;;  %v1426_v6 = vld [vmem:[%s2339_s1 + $0x30] sm:$0xff]   ;;  %v1430_v10 = vld [vmem:[%s2339_s1 + $0x28] sm:$0xff]  }
   0x4   :  { %v1423_v3 = vld [vmem:[%s2339_s1 + $0xb8] sm:$0xff]   ;;  %1248 = vmatpush3.bf16.msra.mxu0 %v1422_v2  ;;  %v1427_v7 = vld [vmem:[%s2339_s1 + $0xb0] sm:$0xff]   ;;  %v1431_v11 = vld [vmem:[%s2339_s1 + $0xa8] sm:$0xff]  }
   0x5   :  { %1312 = vmatpush3.bf16.msra.mxu1 %v1423_v3  ;;  %1249 = vmatprep.subr.bf16.mxu0 %v1424_v4  ;;  %v1432_v12 = vld [vmem:[%s2339_s1 + $0x60] sm:$0xff]   ;;  %v1436_v16 = vld [vmem:[%s2339_s1 + $0x58] sm:$0xff]   ;;  %v1440_v20 = vld [vmem:[%s2339_s1 + $0x50] sm:$0xff]  }
   0x6   :  { %1313 = vmatprep.subr.bf16.mxu1 %v1425_v5  ;;  %v1433_v13 = vld [vmem:[%s2339_s1 + $0xe0] sm:$0xff]   ;;  %v1437_v17 = vld [vmem:[%s2339_s1 + $0xd8] sm:$0xff]   ;;  %v1441_v21 = vld [vmem:[%s2339_s1 + $0xd0] sm:$0xff]  }
   0x7   :  { %v1434_v14 = vld [vmem:[%s2339_s1 + $0x20] sm:$0xff]   ;;  %v1438_v18 = vld [vmem:[%s2339_s1 + $0x18] sm:$0xff]   ;;  %v1442_v22 = vld [vmem:[%s2339_s1 + $0x10] sm:$0xff]  }
   0x8   :  { %1250 = vmatpush3.bf16.msra.mxu0 %v1426_v6  ;;  %v1435_v15 = vld [vmem:[%s2339_s1 + $0xa0] sm:$0xff]   ;;  %v1439_v19 = vld [vmem:[%s2339_s1 + $0x98] sm:$0xff]   ;;  %v1443_v23 = vld [vmem:[%s2339_s1 + $0x90] sm:$0xff]  }
   0x9   :  { %1314 = vmatpush3.bf16.msra.mxu1 %v1427_v7  ;;  %1251 = vmatprep.subr.bf16.mxu0 %v1428_v8  ;;  %v1444_v24 = vld [vmem:[%s2339_s1 + $0x48] sm:$0xff]   ;;  %v1448_v28 = vld [vmem:[%s2339_s1 + $0x40] sm:$0xff]   ;;  %v1458_v36 = vld [vmem:[%s2339_s1 + $0x118] sm:$0xff]  }
   0xa   :  { %1315 = vmatprep.subr.bf16.mxu1 %v1429_v9  ;;  %v1445_v25 = vld [vmem:[%s2339_s1 + $0xc8] sm:$0xff]   ;;  %v1449_v29 = vld [vmem:[%s2339_s1 + $0xc0] sm:$0xff]   ;;  %v1471_v42 = vld [vmem:[%s2339_s1 + $0x110] sm:$0xff]  }
   0xb   :  { %v1446_v26 = vld [vmem:[%s2339_s1 + $0x8] sm:$0xff]   ;;  %v1450_v30 = vld [vmem:[%s2339_s1] sm:$0xff]   ;;  %v1467_v43 = vld [vmem:[%s2340_s0 + $0x5c] ss:$20 sps:$4 sm:$0xff]  }
   0xc   :  { %1252 = vmatpush3.bf16.msra.mxu0 %v1430_v10  ;;  %v1447_v27 = vld [vmem:[%s2339_s1 + $0x88] sm:$0xff]   ;;  %v1451_v31 = vld [vmem:[%s2339_s1 + $0x80] sm:$0xff]   ;;  %v1472_v47 = vld [vmem:[%s2340_s0 + $0x7c] ss:$20 sps:$4 sm:$0xff]  }
   0xd   :  { %1316 = vmatpush3.bf16.msra.mxu1 %v1431_v11  ;;  %1253 = vmatprep.subr.bf16.mxu0 %v1432_v12  ;;  %v1452_v32 = vld [vmem:[%s2340_s0] ss:$20 sps:$4 sm:$0xff]   ;;  %v1454_v33 = vld [vmem:[%s2340_s0 + $0x4] ss:$20 sps:$4 sm:$0xff]   ;;  %v1455_v34 = vld [vmem:[%s2340_s0 + $0x8] ss:$20 sps:$4 sm:$0xff]  }
   0xe   :  { %1317 = vmatprep.subr.bf16.mxu1 %v1433_v13  ;;  %v1457_v35 = vld [vmem:[%s2340_s0 + $0xc] ss:$20 sps:$4 sm:$0xff]   ;;  %623 = vmatprep.mubr.bf16.mxu0 %v1454_v33  ;;  %v1461_v38 = vld [vmem:[%s2340_s0 + $0x34] ss:$20 sps:$4 sm:$0xff]   ;;  %v1464_v40 = vld [vmem:[%s2340_s0 + $0x30] ss:$20 sps:$4 sm:$0xff]  }
   0xf   :  { %720 = vmatprep.mubr.bf16.mxu1 %v1457_v35  ;;  %v1459_v37 = vld [vmem:[%s2340_s0 + $0x2c] ss:$20 sps:$4 sm:$0xff]   ;;  %v1463_v39 = vld [vmem:[%s2340_s0 + $0x28] ss:$20 sps:$4 sm:$0xff]   ;;  %v1469_v44 = vld [vmem:[%s2340_s0 + $0x50] ss:$20 sps:$4 sm:$0xff]  }
  0x10   :  { %1254 = vmatpush3.bf16.msra.mxu0 %v1434_v14  ;;  %v1465_v41 = vld [vmem:[%s2340_s0 + $0x54] ss:$20 sps:$4 sm:$0xff]   ;;  %v1470_v45 = vld [vmem:[%s2340_s0 + $0x58] ss:$20 sps:$4 sm:$0xff]   ;;  %v1497_v49 = vld [vmem:[%s2339_s1 + $0x100] sm:$0xff]  }
  0x11   :  { %1318 = vmatpush3.bf16.msra.mxu1 %v1435_v15  ;;  %1255 = vmatprep.subr.bf16.mxu0 %v1436_v16  ;;  %v1484_v46 = vld [vmem:[%s2339_s1 + $0x108] sm:$0xff]   ;;  %v1474_v48 = vld [vmem:[%s2340_s0 + $0x84] ss:$20 sps:$4 sm:$0xff]   ;;  %v1477_v51 = vld [vmem:[%s2340_s0 + $0x80] ss:$20 sps:$4 sm:$0xff]  }
  0x12   :  { %1319 = vmatprep.subr.bf16.mxu1 %v1437_v17  ;;  %v1476_v50 = vld [vmem:[%s2340_s0 + $0x78] ss:$20 sps:$4 sm:$0xff]   ;;  %v1482_v54 = vld [vmem:[%s2340_s0 + $0xa0] ss:$20 sps:$4 sm:$0xff]   ;;  %v1483_v55 = vld [vmem:[%s2340_s0 + $0xa8] ss:$20 sps:$4 sm:$0xff]  }
  0x13   :  { %v1478_v52 = vld [vmem:[%s2340_s0 + $0xa4] ss:$20 sps:$4 sm:$0xff]   ;;  %v1480_v53 = vld [vmem:[%s2340_s0 + $0xac] ss:$20 sps:$4 sm:$0xff]   ;;  %v1487_v57 = vld [vmem:[%s2340_s0 + $0xd4] ss:$20 sps:$4 sm:$0xff]  }
  0x14   :  { %1256 = vmatpush3.bf16.msra.mxu0 %v1438_v18  ;;  %v1485_v56 = vld [vmem:[%s2340_s0 + $0xcc] ss:$20 sps:$4 sm:$0xff]   ;;  %v1489_v58 = vld [vmem:[%s2340_s0 + $0xc8] ss:$20 sps:$4 sm:$0xff]   ;;  %v1490_v59 = vld [vmem:[%s2340_s0 + $0xd0] ss:$20 sps:$4 sm:$0xff]  }
  0x15   :  { %1320 = vmatpush3.bf16.msra.mxu1 %v1439_v19  ;;  %1257 = vmatprep.subr.bf16.mxu0 %v1440_v20  ;;  %v1491_v60 = vld [vmem:[%s2340_s0 + $0xf4] ss:$20 sps:$4 sm:$0xff]   ;;  %v1493_v61 = vld [vmem:[%s2340_s0 + $0xfc] ss:$20 sps:$4 sm:$0xff]   ;;  %v1496_v63 = vld [vmem:[%s2340_s0 + $0xf8] ss:$20 sps:$4 sm:$0xff]  }
  0x16   :  { %1321 = vmatprep.subr.bf16.mxu1 %v1441_v21  ;;  %v1495_v62 = vld [vmem:[%s2340_s0 + $0xf0] ss:$20 sps:$4 sm:$0xff]   ;;  %v1502_v2 = vld [vmem:[%s2340_s0 + $0x118] ss:$20 sps:$4 sm:$0xff]   ;;  %v1503_v3 = vld [vmem:[%s2340_s0 + $0x120] ss:$20 sps:$4 sm:$0xff]  }
  0x17   :  { %v1498_v0 = vld [vmem:[%s2340_s0 + $0x11c] ss:$20 sps:$4 sm:$0xff]   ;;  %v1500_v1 = vld [vmem:[%s2340_s0 + $0x124] ss:$20 sps:$4 sm:$0xff]   ;;  %v1508_v8 = vld [vmem:[%s2340_s0 + $0x60] ss:$20 sps:$4 sm:$0xff]  }
  0x18   :  { %1258 = vmatpush3.bf16.msra.mxu0 %v1442_v22  ;;  %v1504_v4 = vld [vmem:[%s2340_s0 + $0x10] ss:$20 sps:$4 sm:$0xff]   ;;  %v1506_v6 = vld [vmem:[%s2340_s0 + $0x38] ss:$20 sps:$4 sm:$0xff]   ;;  %v1509_v9 = vld [vmem:[%s2340_s0 + $0x100] ss:$20 sps:$4 sm:$0xff]  }
  0x19   :  { %1322 = vmatpush3.bf16.msra.mxu1 %v1443_v23  ;;  %1259 = vmatprep.subr.bf16.mxu0 %v1444_v24  ;;  %v1505_v5 = vld [vmem:[%s2340_s0 + $0xb0] ss:$20 sps:$4 sm:$0xff]   ;;  %v1507_v7 = vld [vmem:[%s2340_s0 + $0xd8] ss:$20 sps:$4 sm:$0xff]   ;;  %v1510_v10 = vld [vmem:[%s2340_s0 + $0x88] ss:$20 sps:$4 sm:$0xff]  }
  0x1a   :  { %1323 = vmatprep.subr.bf16.mxu1 %v1445_v25  ;;  %v1511_v11 = vld [vmem:[%s2340_s0 + $0x128] ss:$20 sps:$4 sm:$0xff]   ;;  %v1795_v21 = vld [vmem:[%s2341_s2] ss:$0 sm:$0xff] }
  0x1c   :  { %1260 = vmatpush3.bf16.msra.mxu0 %v1446_v26 }
  0x1d   :  { %1324 = vmatpush3.bf16.msra.mxu1 %v1447_v27  ;;  %1261 = vmatprep.subr.bf16.mxu0 %v1448_v28 }
  0x1e   :  { %1325 = vmatprep.subr.bf16.mxu1 %v1449_v29 }
  0x20   :  { %1262 = vmatpush3.bf16.msra.mxu0 %v1450_v30 }
  0x21   :  { %1326 = vmatpush3.bf16.msra.mxu1 %v1451_v31  ;;  %1387 = vmatprep.subr.bf16.mxu0 %v1458_v36 }
  0x22   :  { %1411 = vmatprep.subr.bf16.mxu1 %v1458_v36 }
  0x23   :  { %624 = vmatmul.mubr.bf16.vlgmr.msra.gmra.mxu0 %v1452_v32 }
  0x24   :  { %721 = vmatmul.mubr.bf16.vlgmr.msra.gmra.mxu1 %v1455_v34  ;;  %1388 = vmatpush3.bf16.msra.mxu0 %v1458_v36 }
  0x25   :  { %1415 = vmatpush3.bf16.msra.mxu1 %v1458_v36  ;;  %631 = vmatprep.mubr.bf16.mxu0 %v1459_v37 }
  0x26   :  { %728 = vmatprep.mubr.bf16.mxu1 %v1461_v38  ;;  %1389 = vmatprep.subr.bf16.mxu0 %v1471_v42 }
  0x27   :  { %1412 = vmatprep.subr.bf16.mxu1 %v1471_v42 }
  0x28   :  { %1390 = vmatpush3.bf16.msra.mxu0 %v1471_v42 }
  0x29   :  { %1416 = vmatpush3.bf16.msra.mxu1 %v1471_v42  ;;  %1391 = vmatprep.subr.bf16.mxu0 %v1484_v46 }
  0x2a   :  { %1413 = vmatprep.subr.bf16.mxu1 %v1484_v46 }
  0x2b   :  { %632 = vmatmul.mubr.bf16.gmra.mxu0 %v1463_v39 }
  0x2c   :  { %729 = vmatmul.mubr.bf16.gmra.mxu1 %v1464_v40  ;;  %639 = vmatprep.mubr.bf16.mxu0 %v1465_v41 }
  0x2d   :  { %736 = vmatprep.mubr.bf16.mxu1 %v1467_v43  ;;  %1392 = vmatpush3.bf16.msra.mxu0 %v1484_v46 }
  0x2e   :  { %1417 = vmatpush3.bf16.msra.mxu1 %v1484_v46  ;;  %1393 = vmatprep.subr.bf16.mxu0 %v1497_v49 }
  0x2f   :  { %1414 = vmatprep.subr.bf16.mxu1 %v1497_v49 }
  0x31   :  { %1394 = vmatpush3.bf16.msra.mxu0 %v1497_v49 }
  0x32   :  { %1418 = vmatpush3.bf16.msra.mxu1 %v1497_v49 }
  0x33   :  { %640 = vmatmul.mubr.bf16.gmra.mxu0 %v1469_v44 }
  0x34   :  { %737 = vmatmul.mubr.bf16.gmra.mxu1 %v1470_v45  ;;  %647 = vmatprep.mubr.bf16.mxu0 %v1472_v47 }
  0x35   :  { %744 = vmatprep.mubr.bf16.mxu1 %v1474_v48 }
  0x3b   :  { %648 = vmatmul.mubr.bf16.gmra.mxu0 %v1476_v50 }
  0x3c   :  { %745 = vmatmul.mubr.bf16.gmra.mxu1 %v1477_v51  ;;  %655 = vmatprep.mubr.bf16.mxu0 %v1478_v52 }
  0x3d   :  { %752 = vmatprep.mubr.bf16.mxu1 %v1480_v53 }
  0x43   :  { %656 = vmatmul.mubr.bf16.gmra.mxu0 %v1482_v54 }
  0x44   :  { %753 = vmatmul.mubr.bf16.gmra.mxu1 %v1483_v55  ;;  %663 = vmatprep.mubr.bf16.mxu0 %v1485_v56  ;;  %v884_v55 = vld [vmem:[%s2342_s3 + $0x10] sm:$0xff] }
  0x45   :  { %760 = vmatprep.mubr.bf16.mxu1 %v1487_v57  ;;  %v892_v57 = vld [vmem:[%s2342_s3 + $0x50] sm:$0xff]  ;;  %vm900_vm1 = vcmp.gt.f32.partialorder %v884_v55, 1.0 }
  0x46   :  { %vm908_vm2 = vcmp.gt.f32.partialorder %v892_v57, 1.0 }
  0x4b   :  { %664 = vmatmul.mubr.bf16.gmra.mxu0 %v1489_v58  ;;  %v882_v58 = vld [vmem:[%s2342_s3] sm:$0xff] }
  0x4c   :  { %761 = vmatmul.mubr.bf16.gmra.mxu1 %v1490_v59  ;;  %671 = vmatprep.mubr.bf16.mxu0 %v1491_v60  ;;  %v890_v60 = vld [vmem:[%s2342_s3 + $0x40] sm:$0xff]  ;;  %vm898_vm3 = vcmp.gt.f32.partialorder %v882_v58, 1.0 }
  0x4d   :  { %768 = vmatprep.mubr.bf16.mxu1 %v1493_v61  ;;  %vm906_vm4 = vcmp.gt.f32.partialorder %v890_v60, 1.0 }
  0x53   :  { %672 = vmatmul.mubr.bf16.gmra.mxu0 %v1495_v62  ;;  %v1878_v62 = vmul.f32 0.9, %v884_v55 }
  0x54   :  { %769 = vmatmul.mubr.bf16.gmra.mxu1 %v1496_v63  ;;  %679 = vmatprep.mubr.bf16.mxu0 %v1498_v0  ;;  %v885_v63 = vld [vmem:[%s2342_s3 + $0x18] sm:$0xff] }
  0x55   :  { %776 = vmatprep.mubr.bf16.mxu1 %v1500_v1  ;;  %v1885_v1 = vmul.f32 0.9, %v892_v57  ;;  %vm901_vm5 = vcmp.gt.f32.partialorder %v885_v63, 1.0 }
  0x5b   :  { %680 = vmatmul.mubr.bf16.gmra.mxu0 %v1502_v2  ;;  %v1887_v2 = vmul.f32 0.9, %v882_v58 }
  0x5c   :  { %777 = vmatmul.mubr.bf16.gmra.mxu1 %v1503_v3  ;;  %1395 = vmatprep.mubr.msk.bf16.mxu0 %vm566_vm0, %v1504_v4  ;;  %v893_v3 = vld [vmem:[%s2342_s3 + $0x58] sm:$0xff] }
  0x5d   :  { %1403 = vmatprep.mubr.msk.bf16.mxu1 %vm566_vm0, %v1505_v5  ;;  %v2346_v5 = vmov 0.0   ;;  %vm909_vm6 = vcmp.gt.f32.partialorder %v893_v3, 1.0 }
  0x5e   :  { %v1931_v55 = vsel %vm906_vm4, 1.0, %v2346_v5  ;;  %v1946_v58 = vsel %vm909_vm6, 1.0, %v2346_v5 }
  0x5f   :  { %2354 = vst [vmem:[#allocation8_spill] sm:$0xff] %v1931_v55  ;;  %2357 = vst [vmem:[#allocation11_spill] sm:$0xff] %v1946_v58 }
  0x63   :  { %1396 = vmatmul.mubr.msk.bf16.vlgmr.msra.gmra.mxu0 %vm566_vm0, %v1506_v6  ;;  %v1895_v6 = vsel %vm900_vm1, 1.0, %v2346_v5 }
  0x64   :  { %1404 = vmatmul.mubr.msk.bf16.vlgmr.msra.gmra.mxu1 %vm566_vm0, %v1507_v7  ;;  %1399 = vmatprep.mubr.msk.bf16.mxu0 %vm566_vm0, %v1508_v8  ;;  %v1897_v7 = vmul.f32 0.9, %v890_v60  ;;  %v883_v8 = vld [vmem:[%s2342_s3 + $0x8] sm:$0xff] }
  0x65   :  { %1407 = vmatprep.mubr.msk.bf16.mxu1 %vm566_vm0, %v1509_v9  ;;  %vm899_vm7 = vcmp.gt.f32.partialorder %v883_v8, 1.0  ;;  %v1933_v57 = vmul.f32 0.9, %v883_v8 }
  0x66   :  { %2349 = vst [vmem:[#allocation3_spill] sm:$0xff] %v1897_v7  ;;  %v1950_v60 = vsel %vm899_vm7, 1.0, %v2346_v5 }
  0x67   :  { %2355 = vst [vmem:[#allocation9_spill] sm:$0xff] %v1933_v57  ;;  %2358 = vst [vmem:[#allocation12_spill] sm:$0xff] %v1950_v60  ;;  %v887_v60 = vld [vmem:[%s2342_s3 + $0x28] sm:$0xff] }
  0x68   :  { %vm903_vm15 = vcmp.gt.f32.partialorder %v887_v60, 1.0 }
  0x6b   :  { %1400 = vmatmul.mubr.msk.bf16.gmra.mxu0 %vm566_vm0, %v1510_v10  ;;  %v1904_v10 = vmul.f32 0.9, %v885_v63 }
  0x6c   :  { %1408 = vmatmul.mubr.msk.bf16.gmra.mxu1 %vm566_vm0, %v1511_v11  ;;  %v891_v11 = vld [vmem:[%s2342_s3 + $0x48] sm:$0xff] }
  0x6d   :  { %2350 = vst [vmem:[#allocation4_spill] sm:$0xff] %v1904_v10  ;;  %vm907_vm8 = vcmp.gt.f32.partialorder %v891_v11, 1.0  ;;  %v1942_v10 = vsel %vm901_vm5, 1.0, %v2346_v5  ;;  %v1952_v57 = vmul.f32 0.9, %v891_v11 }
  0x6e   :  { %2356 = vst [vmem:[#allocation10_spill] sm:$0xff] %v1942_v10  ;;  %v2366_v10 = vmov 0.0  }
  0x6f   :  { %2359 = vst [vmem:[#allocation13_spill] sm:$0xff] %v1952_v57  ;;  %v889_v57 = vld [vmem:[%s2342_s3 + $0x38] sm:$0xff] }
  0x70   :  { %vm905_vm13 = vcmp.gt.f32.partialorder %v889_v57, 1.0 }
  0xe3   :  { %v1784_v12 = vpop.f32.mrf.mxu0 }
  0xe4   :  { %v1786_v13 = vpop.f32.mrf.mxu1 }
  0xe5   :  { %v1788_v14 = vpop.f32.mrf.mxu0 }
  0xe6   :  { %v1790_v15 = vpop.f32.mrf.mxu1 }
  0xe7   :  { %v1266_v16 = vpop.f32.mrf.mxu0 }
  0xe8   :  { %v1330_v17 = vpop.f32.mrf.mxu1 }
  0xe9   :  { %v1267_v18 = vpop.f32.mrf.mxu0 }
  0xea   :  { %v1268_v19 = vadd.f32 %v1267_v18, %v1266_v16  ;;  %v1331_v20 = vpop.f32.mrf.mxu1  ;;  %v1915_v18 = vmul.f32 0.9, %v893_v3  ;;  %v894_v3 = vld [vmem:[%s2342_s3 + $0x60] sm:$0xff] }
  0xeb   :  { %v1797_v22 = vpop.f32.mrf.mxu0  ;;  %v1332_v24 = vadd.f32 %v1331_v20, %v1330_v17  ;;  %v1913_v17 = vsel %vm908_vm2, 1.0, %v2346_v5  ;;  %v896_v20 = vld [vmem:[%s2342_s3 + $0x70] sm:$0xff]  ;;  %vm910_vm12 = vcmp.gt.f32.partialorder %v894_v3, 1.0 }
  0xec   :  { %v629_v23 = vadd.f32 %v1268_v19, %v1795_v21  ;;  %v1800_v25 = vpop.f32.mrf.mxu1  ;;  %2351 = vst [vmem:[#allocation5_spill] sm:$0xff] %v1913_v17  ;;  %2352 = vst [vmem:[#allocation6_spill] sm:$0xff] %v1915_v18  ;;  %v888_v19 = vld [vmem:[%s2342_s3 + $0x30] sm:$0xff]  ;;  %v886_v18 = vld [vmem:[%s2342_s3 + $0x20] sm:$0xff]  ;;  %v1961_v63 = vmul.f32 0.9, %v896_v20 }
  0xed   :  { %v1802_v26 = vpop.f32.mrf.mxu0  ;;  %vm904_vm9 = vcmp.gt.f32.partialorder %v888_v19, 1.0  ;;  %v1959_v7 = vmul.f32 0.9, %v888_v19  ;;  %vm912_vm10 = vcmp.gt.f32.partialorder %v896_v20, 1.0  ;;  %v1969_v11 = vmul.f32 0.9, %v886_v18 }
  0xee   :  { %v1804_v27 = vpop.f32.mrf.mxu1  ;;  %v1806_v28 = vadd.f32 %v1332_v24, %v629_v23  ;;  %v1927_v24 = vsel %vm898_vm3, 1.0, %v2346_v5  ;;  %2362 = vst [vmem:[#allocation16_spill] sm:$0xff] %v1961_v63  ;;  %v1967_v8 = vsel %vm904_vm9, 1.0, %v2346_v5  ;;  %v897_v19 = vld [vmem:[%s2342_s3 + $0x78] sm:$0xff]  ;;  %vm902_vm11 = vcmp.gt.f32.partialorder %v886_v18, 1.0 }
  0xef   :  { %v1808_v29 = vpop.f32.mrf.mxu0  ;;  %2353 = vst [vmem:[#allocation7_spill] sm:$0xff] %v1927_v24  ;;  %v1957_v24 = vsel %vm907_vm8, 1.0, %v2346_v5  ;;  %2361 = vst [vmem:[#allocation15_spill] sm:$0xff] %v1959_v7  ;;  %v1271_v5 = vadd.f32 %v1802_v26, %v1797_v22  ;;  %v1985_v7 = vmul.f32 0.9, %v894_v3  ;;  %vm913_vm14 = vcmp.gt.f32.partialorder %v897_v19, 1.0 }
  0xf0   :  { %2348 = vst [vmem:[#allocation2_spill] sm:$0xff] %v1806_v28  ;;  %v1810_v30 = vpop.f32.mrf.mxu1  ;;  %2360 = vst [vmem:[#allocation14_spill] sm:$0xff] %v1957_v24  ;;  %v1265_v24 = vadd.f32 %v1788_v14, %v1784_v12  ;;  %v1996_v17 = vsel %vm912_vm10, 1.0, %v2366_v10  ;;  %v1998_v22 = vmul.f32 0.9, %v889_v57  ;;  %v2026_v18 = vsel %vm913_vm14, 1.0, %v2366_v10 }
  0xf1   :  { %v1812_v31 = vpop.f32.mrf.mxu0  ;;  %2363 = vst [vmem:[#allocation17_spill] sm:$0xff] %v1967_v8  ;;  %2364 = vst [vmem:[#allocation18_spill] sm:$0xff] %v1969_v11  ;;  %v2000_v26 = vmul.f32 0.9, %v897_v19  ;;  %v634_v3 = vadd.f32 %v1271_v5, %v1795_v21  ;;  %v2043_v5 = vsel %vm903_vm15, 1.0, %v2366_v10 }
  0xf2   :  { %v1814_v32 = vpop.f32.mrf.mxu1  ;;  %v1274_v8 = vadd.f32 %v1812_v31, %v1808_v29  ;;  %2365 = vst [vmem:[#allocation19_spill] sm:$0xff] %v1985_v7  ;;  %2367 = vst [vmem:[#allocation20_spill] sm:$0xff] %v1998_v22  ;;  %v2005_v29 = vld [vmem:[%s2342_s3 + $0x68] sm:$0xff]  ;;  %v2009_v7 = vsel %vm902_vm11, 1.0, %v2366_v10  ;;  %v626_v20 = vadd.f32 %v1265_v24, %v1795_v21 }
  0xf3   :  { %v1816_v33 = vpop.f32.mrf.mxu0  ;;  %2368 = vst [vmem:[#allocation21_spill] sm:$0xff] %v2000_v26  ;;  %2369 = vst [vmem:[#allocation22_spill] sm:$0xff] %v2009_v7  ;;  %v2028_v7 = vmul.f32 0.9, %v887_v60  ;;  %v2035_v24 = vmul.f32 0.9, %v2005_v29 }
  0xf4   :  { %v1818_v34 = vpop.f32.mrf.mxu1  ;;  %v637_v57 = vadd.f32 %v1274_v8, %v1795_v21  ;;  %2372 = vst [vmem:[#allocation25_spill] sm:$0xff] %v2043_v5  ;;  %v1335_v8 = vadd.f32 %v1804_v27, %v1800_v25  ;;  %vm911_vm7 = vcmp.gt.f32.partialorder %v2005_v29, 1.0 }
  0xf5   :  { %v1820_v35 = vpop.f32.mrf.mxu0 }
  0xf6   :  { %v1822_v36 = vpop.f32.mrf.mxu1  ;;  %v1277_v12 = vadd.f32 %v1820_v35, %v1816_v33  ;;  %v2013_v33 = vsel %vm910_vm12, 1.0, %v2366_v10  ;;  %v2017_v35 = vsel %vm905_vm13, 1.0, %v2366_v10 }
  0xf7   :  { %v1824_v37 = vpop.f32.mrf.mxu0  ;;  %2370 = vst [vmem:[#allocation23_spill] sm:$0xff] %v2013_v33  ;;  %2371 = vst [vmem:[#allocation24_spill] sm:$0xff] %v2017_v35 }
  0xf8   :  { %v1826_v38 = vpop.f32.mrf.mxu1 }
  0xf9   :  { %v1828_v39 = vpop.f32.mrf.mxu0 }
  0xfa   :  { %v1830_v40 = vpop.f32.mrf.mxu1  ;;  %v1280_v26 = vadd.f32 %v1828_v39, %v1824_v37  ;;  %v1329_v37 = vadd.f32 %v1790_v15, %v1786_v13  ;;  %v642_v39 = vadd.f32 %v1277_v12, %v1795_v21 }
  0xfb   :  { %v1832_v41 = vpop.f32.mrf.mxu0 }
  0xfc   :  { %v1834_v42 = vpop.f32.mrf.mxu1  ;;  %v723_v25 = vadd.f32 %v1329_v37, %v626_v20 }
  0xfd   :  { %v1836_v43 = vpop.f32.mrf.mxu0 }
  0xfe   :  { %v1838_v44 = vpop.f32.mrf.mxu1  ;;  %v1283_v35 = vadd.f32 %v1836_v43, %v1832_v41  ;;  %v1338_v41 = vadd.f32 %v1814_v32, %v1810_v30 }
  0xff   :  { %v1840_v45 = vpop.f32.mrf.mxu0 }
 0x100   :  { %v1842_v46 = vpop.f32.mrf.mxu1  ;;  %v650_v27 = vadd.f32 %v1283_v35, %v1795_v21 }
 0x101   :  { %v1844_v47 = vpop.f32.mrf.mxu0 }
 0x102   :  { %v1846_v48 = vpop.f32.mrf.mxu1  ;;  %v1286_v60 = vadd.f32 %v1844_v47, %v1840_v45  ;;  %v1341_v45 = vadd.f32 %v1822_v36, %v1818_v34  ;;  %v645_v47 = vadd.f32 %v1280_v26, %v1795_v21 }
 0x103   :  { %v1848_v49 = vpop.f32.mrf.mxu0  ;;  %v1350_v20 = vadd.f32 %v1846_v48, %v1842_v46 }
 0x104   :  { %v1850_v50 = vpop.f32.mrf.mxu1  ;;  %v653_v34 = vadd.f32 %v1286_v60, %v1795_v21  ;;  %v2064_v26 = vadd.f32 %v1341_v45, %v642_v39 }
 0x105   :  { %v1852_v51 = vpop.f32.mrf.mxu0 }
 0x106   :  { %v1854_v52 = vpop.f32.mrf.mxu1  ;;  %v1289_v43 = vadd.f32 %v1852_v51, %v1848_v49  ;;  %v731_v49 = vadd.f32 %v1335_v8, %v634_v3  ;;  %v734_v51 = vadd.f32 %v1338_v41, %v637_v57  ;;  %v2085_v39 = vadd.f32 %v1350_v20, %v653_v34 }
 0x107   :  { %v1856_v53 = vpop.f32.mrf.mxu0 }
 0x108   :  { %v1858_v54 = vpop.f32.mrf.mxu1 }
 0x109   :  { %v1863_v56 = vpop.f32.mrf.mxu0 }
 0x10a   :  { %v1871_v59 = vpop.f32.mrf.mxu1  ;;  %v1292_v12 = vadd.f32 %v1863_v56, %v1856_v53  ;;  %v1347_v53 = vadd.f32 %v1838_v44, %v1834_v42  ;;  %v658_v56 = vadd.f32 %v1289_v43, %v1795_v21 }
 0x10b   :  { %v1876_v61 = vpop.f32.mrf.mxu0  ;;  %v1356_v46 = vadd.f32 %v1871_v59, %v1858_v54 }
 0x10c   :  { %v1883_v0 = vpop.f32.mrf.mxu1 }
 0x10d   :  { %v1892_v4 = vpop.f32.mrf.mxu0 }
 0x10e   :  { %v1902_v9 = vpop.f32.mrf.mxu1  ;;  %v1295_v13 = vadd.f32 %v1892_v4, %v1876_v61  ;;  %v1344_v61 = vadd.f32 %v1830_v40, %v1826_v38  ;;  %v661_v38 = vadd.f32 %v1292_v12, %v1795_v21 }
 0x10f   :  { %v1909_v16 = vpop.f32.mrf.mxu0  ;;  %v1359_v42 = vadd.f32 %v1902_v9, %v1883_v0 }
 0x110   :  { %v1923_v23 = vpop.f32.mrf.mxu1  ;;  %v666_v35 = vadd.f32 %v1295_v13, %v1795_v21  ;;  %v2093_v43 = vadd.f32 %v1356_v46, %v661_v38  ;;  %v2377_v38 = vld [vmem:[#allocation2_spill] sm:$0xff] }
 0x111   :  { %v1938_v28 = vpop.f32.mrf.mxu0  ;;  %v2379_v46 = vld [vmem:[#allocation6_spill] sm:$0xff] }
 0x112   :  { %v1954_v55 = vpop.f32.mrf.mxu1  ;;  %v1298_v30 = vadd.f32 %v1938_v28, %v1909_v16  ;;  %v763_v9 = vadd.f32 %v1359_v42, %v666_v35  ;;  %v1058_v42 = vld [vmem:[%s2343_s4] sm:$0xff] }
 0x113   :  { %v1299_v58 = vpop.f32.mrf.mxu0 }
 0x114   :  { %v1979_v63 = vpop.f32.mrf.mxu1  ;;  %v669_v44 = vadd.f32 %v1298_v30, %v1795_v21 }
 0x115   :  { %v1300_v11 = vpop.f32.mrf.mxu0 }
 0x116   :  { %v1992_v14 = vpop.f32.mrf.mxu1  ;;  %v1301_v36 = vadd.f32 %v1300_v11, %v1299_v58  ;;  %v2073_v58 = vadd.f32 %v1344_v61, %v645_v47  ;;  %v1353_v11 = vadd.f32 %v1854_v52, %v1850_v50  ;;  %v1362_v50 = vadd.f32 %v1954_v55, %v1923_v23 }
 0x117   :  { %v1302_v31 = vpop.f32.mrf.mxu0  ;;  %v1365_v8 = vadd.f32 %v1992_v14, %v1979_v63 }
 0x118   :  { %v2022_v22 = vpop.f32.mrf.mxu1  ;;  %v674_v48 = vadd.f32 %v1301_v36, %v1795_v21  ;;  %v755_v60 = vadd.f32 %v1353_v11, %v658_v56  ;;  %v766_v55 = vadd.f32 %v1362_v50, %v669_v44  ;;  %v2378_v44 = vld [vmem:[#allocation8_spill] sm:$0xff] }
 0x119   :  { %v1303_v33 = vpop.f32.mrf.mxu0 }
 0x11a   :  { %v1367_v19 = vpop.f32.mrf.mxu1  ;;  %v1304_v28 = vadd.f32 %v1303_v33, %v1302_v31  ;;  %v2080_v31 = vadd.f32 %v1347_v53, %v650_v27  ;;  %v2374_v53 = vld [vmem:[#allocation3_spill] sm:$0xff] }
 0x11b   :  { %v1305_v15 = vpop.f32.mrf.mxu0  ;;  %v1368_v13 = vadd.f32 %v1367_v19, %v2022_v22 }
 0x11c   :  { %v1369_v5 = vpop.f32.mrf.mxu1  ;;  %v677_v52 = vadd.f32 %v1304_v28, %v1795_v21 }
 0x11d   :  { %v1306_v32 = vpop.f32.mrf.mxu0 }
 0x11e   :  { %v1370_v4 = vpop.f32.mrf.mxu1  ;;  %v1307_v40 = vadd.f32 %v1306_v32, %v1305_v15  ;;  %v2098_v32 = vadd.f32 %v1365_v8, %v674_v48  ;;  %v2101_v34 = vadd.f32 %v1368_v13, %v677_v52  ;;  %v1066_v52 = vld [vmem:[%s2343_s4 + $0x40] sm:$0xff] }
 0x11f   :  { %v1308_v16 = vpop.f32.mrf.mxu0  ;;  %v1371_v47 = vadd.f32 %v1370_v4, %v1369_v5 }
 0x120   :  { %v1372_v3 = vpop.f32.mrf.mxu1  ;;  %v682_v41 = vadd.f32 %v1307_v40, %v1795_v21 }
 0x121   :  { %v1309_v57 = vpop.f32.mrf.mxu0 }
 0x122   :  { %v1310_v33 = vadd.f32 %v1309_v57, %v1308_v16  ;;  %v1373_v37 = vpop.f32.mrf.mxu1  ;;  %v779_v5 = vadd.f32 %v1371_v47, %v682_v41  ;;  %v2376_v16 = vld [vmem:[#allocation4_spill] sm:$0xff]  ;;  %v1069_v47 = vld [vmem:[%s2343_s4 + $0x58] sm:$0xff] }
 0x123   :  { %v1397_v0 = vpop.f32.mrf.mxu0  ;;  %v1374_v63 = vadd.f32 %v1373_v37, %v1372_v3 }
 0x124   :  { %v828_v54 = vadd.f32 %v1397_v0, %v731_v49  ;;  %v1405_v59 = vpop.f32.mrf.mxu1  ;;  %v685_v15 = vadd.f32 %v1310_v33, %v1795_v21  ;;  %v2380_v0 = vld [vmem:[#allocation10_spill] sm:$0xff] }
 0x125   :  { %v860_v45 = vadd.f32 %v1405_v59, %v763_v9  ;;  %v819_v23 = vpop.f32.mrf.mxu0  ;;  %v2381_v59 = vld [vmem:[#allocation11_spill] sm:$0xff] }
 0x126   :  { %v964_v12 = vadd.f32 %v1878_v62, %v828_v54  ;;  %v820_v27 = vadd.f32 %v819_v23, %v723_v25  ;;  %v851_v30 = vpop.f32.mrf.mxu1  ;;  %v1060_v62 = vld [vmem:[%s2343_s4 + $0x10] sm:$0xff]  ;;  %v2373_v25 = vld [vmem:[#allocation5_spill] sm:$0xff]  ;;  %v2110_v28 = vadd.f32 %v1374_v63, %v685_v15 }
 0x127   :  { %v972_v14 = vadd.f32 %v1885_v1, %v860_v45  ;;  %v852_v49 = vadd.f32 %v851_v30, %v755_v60  ;;  %v1398_v61 = vpop.f32.mrf.mxu0  ;;  %v1061_v54 = vld [vmem:[%s2343_s4 + $0x18] sm:$0xff] }
 0x128   :  { %v980_v22 = vsub.f32 %v964_v12, %v1895_v6  ;;  %v962_v21 = vadd.f32 %v1887_v2, %v820_v27  ;;  %v831_v19 = vadd.f32 %v1398_v61, %v734_v51  ;;  %v1406_v36 = vpop.f32.mrf.mxu1  ;;  %v1068_v2 = vld [vmem:[%s2343_s4 + $0x50] sm:$0xff]  ;;  %v2375_v6 = vld [vmem:[#allocation7_spill] sm:$0xff]  ;;  %v2382_v61 = vld [vmem:[#allocation9_spill] sm:$0xff] }
 0x129   :  { %v988_v4 = vsub.f32 %v972_v14, %v2373_v25  ;;  %v970_v56 = vadd.f32 %v2374_v53, %v852_v49  ;;  %v863_v1 = vadd.f32 %v1406_v36, %v766_v55  ;;  %v822_v35 = vpop.f32.mrf.mxu0 }
 0x12a   :  { %vm996_vm1 = vcmp.gt.f32.partialorder %v980_v22, 1.0  ;;  %1044 = vst.msk [vmem:[%s2344_s6 + $0x10] sm:$0xff] %vm566_vm0, %v980_v22  ;;  %v978_v51 = vsub.f32 %v962_v21, %v2375_v6  ;;  %v965_v20 = vadd.f32 %v2376_v16, %v831_v19  ;;  %v823_v40 = vadd.f32 %v822_v35, %v2377_v38  ;;  %v854_v3 = vpop.f32.mrf.mxu1  ;;  %v2384_v6 = vld [vmem:[#allocation13_spill] sm:$0xff]  ;;  %v2385_v16 = vld [vmem:[#allocation15_spill] sm:$0xff] }
 0x12b   :  { %v1233_v11 = vsel %vm996_vm1, 1.0, %v2366_v10  ;;  %vm1004_vm2 = vcmp.gt.f32.partialorder %v988_v4, 1.0  ;;  %1052 = vst.msk [vmem:[%s2344_s6 + $0x50] sm:$0xff] %vm566_vm0, %v988_v4  ;;  %v986_v57 = vsub.f32 %v970_v56, %v2378_v44  ;;  %v973_v48 = vadd.f32 %v2379_v46, %v863_v1  ;;  %v1401_v33 = vpop.f32.mrf.mxu0  ;;  %v2383_v56 = vld [vmem:[#allocation12_spill] sm:$0xff]  ;;  %v2388_v44 = vld [vmem:[#allocation14_spill] sm:$0xff]  ;;  %v2389_v46 = vld [vmem:[#allocation17_spill] sm:$0xff] }
 0x12c   :  { %v1076_v37 = vadd.f32 %v1233_v11, %v1060_v62  ;;  %v1241_v50 = vsel %vm1004_vm2, 1.0, %v2366_v10  ;;  %vm994_vm3 = vcmp.gt.f32.partialorder %v978_v51, 1.0  ;;  %1042 = vst.msk [vmem:[%s2344_s6] sm:$0xff] %vm566_vm0, %v978_v51  ;;  %v981_v9 = vsub.f32 %v965_v20, %v2380_v0  ;;  %v1409_v60 = vpop.f32.mrf.mxu1 }
 0x12d   :  { %v1084_v8 = vadd.f32 %v1241_v50, %v1068_v2  ;;  %v1231_v41 = vsel %vm994_vm3, 1.0, %v2366_v10  ;;  %vm1002_vm4 = vcmp.gt.f32.partialorder %v986_v57, 1.0  ;;  %1050 = vst.msk [vmem:[%s2344_s6 + $0x40] sm:$0xff] %vm566_vm0, %v986_v57  ;;  %v989_v13 = vsub.f32 %v973_v48, %v2381_v59  ;;  %v835_v15 = vpop.f32.mrf.mxu0 }
 0x12e   :  { %v1092_v45 = vmax.f32 %v1076_v37, 0.0  ;;  %v1074_v23 = vadd.f32 %v1231_v41, %v1058_v42  ;;  %v1239_v55 = vsel %vm1002_vm4, 1.0, %v2366_v10  ;;  %vm997_vm5 = vcmp.gt.f32.partialorder %v981_v9, 1.0  ;;  %1045 = vst.msk [vmem:[%s2344_s6 + $0x18] sm:$0xff] %vm566_vm0, %v981_v9  ;;  %v867_v21 = vpop.f32.mrf.mxu1  ;;  %v2391_v9 = vld [vmem:[#allocation22_spill] sm:$0xff] }
 0x12f   :  { %v1100_v12 = vmax.f32 %v1084_v8, 0.0  ;;  %v1082_v27 = vadd.f32 %v1239_v55, %v1066_v52  ;;  %v1234_v30 = vsel %vm997_vm5, 1.0, %v2366_v10  ;;  %vm1005_vm6 = vcmp.gt.f32.partialorder %v989_v13, 1.0  ;;  %1053 = vst.msk [vmem:[%s2344_s6 + $0x58] sm:$0xff] %vm566_vm0, %v989_v13  ;;  %v1402_v4 = vpop.f32.mrf.mxu0  ;;  %v1067_v52 = vld [vmem:[%s2343_s4 + $0x48] sm:$0xff]  ;;  %v2392_v8 = vld [vmem:[#allocation20_spill] sm:$0xff] }
 0x130   :  { %1108 = vst.msk [vmem:[%s2345_s5 + $0x10] sm:$0xff] %vm566_vm0, %v1092_v45  ;;  %v1090_v63 = vmax.f32 %v1074_v23, 0.0  ;;  %v1077_v14 = vadd.f32 %v1234_v30, %v1061_v54  ;;  %v1242_v49 = vsel %vm1005_vm6, 1.0, %v2366_v10  ;;  %v963_v22 = vadd.f32 %v2382_v61, %v823_v40  ;;  %v2387_v40 = vld [vmem:[#allocation18_spill] sm:$0xff]  ;;  %v2393_v54 = vld [vmem:[#allocation23_spill] sm:$0xff] }
 0x131   :  { %1116 = vst.msk [vmem:[%s2345_s5 + $0x50] sm:$0xff] %vm566_vm0, %v1100_v12  ;;  %v1098_v19 = vmax.f32 %v1082_v27, 0.0  ;;  %v1085_v36 = vadd.f32 %v1242_v49, %v1069_v47  ;;  %v855_v62 = vadd.f32 %v854_v3, %v2093_v43  ;;  %v844_v25 = vadd.f32 %v1401_v33, %v2080_v31  ;;  %v1059_v31 = vld [vmem:[%s2343_s4 + $0x8] sm:$0xff]  ;;  %v1070_v27 = vld [vmem:[%s2343_s4 + $0x60] sm:$0xff]  ;;  %v838_v61 = vpop.f32.mrf.mxu0 }
 0x132   :  { %1106 = vst.msk [vmem:[%s2345_s5] sm:$0xff] %vm566_vm0, %v1090_v63  ;;  %v1093_v53 = vmax.f32 %v1077_v14, 0.0  ;;  %v979_v1 = vsub.f32 %v963_v22, %v2383_v56  ;;  %v876_v35 = vadd.f32 %v1409_v60, %v779_v5  ;;  %v836_v2 = vadd.f32 %v835_v15, %v2064_v26  ;;  %v2386_v26 = vld [vmem:[#allocation16_spill] sm:$0xff]  ;;  %v2390_v33 = vld [vmem:[#allocation19_spill] sm:$0xff]  ;;  %v2395_v56 = vld [vmem:[#allocation21_spill] sm:$0xff] }
 0x133   :  { %1114 = vst.msk [vmem:[%s2345_s5 + $0x40] sm:$0xff] %vm566_vm0, %v1098_v19  ;;  %v1101_v43 = vmax.f32 %v1085_v36, 0.0  ;;  %v971_v51 = vadd.f32 %v2384_v6, %v855_v62  ;;  %v968_v20 = vadd.f32 %v2385_v16, %v844_v25  ;;  %v868_v38 = vadd.f32 %v867_v21, %v2098_v32  ;;  %v1410_v32 = vpop.f32.mrf.mxu1  ;;  %v2394_v14 = vld [vmem:[#allocation24_spill] sm:$0xff]  ;;  %v1065_v25 = vld [vmem:[%s2343_s4 + $0x38] sm:$0xff] }
 0x134   :  { %1109 = vst.msk [vmem:[%s2345_s5 + $0x18] sm:$0xff] %vm566_vm0, %v1093_v53  ;;  %vm995_vm8 = vcmp.gt.f32.partialorder %v979_v1, 1.0  ;;  %1043 = vst.msk [vmem:[%s2344_s6 + $0x8] sm:$0xff] %vm566_vm0, %v979_v1  ;;  %v976_v5 = vadd.f32 %v2386_v26, %v876_v35  ;;  %v966_v3 = vadd.f32 %v2387_v40, %v836_v2  ;;  %v847_v11 = vadd.f32 %v1402_v4, %v2085_v39  ;;  %v1064_v39 = vld [vmem:[%s2343_s4 + $0x30] sm:$0xff]  ;;  %v2396_v26 = vld [vmem:[#allocation25_spill] sm:$0xff] }
 0x135   :  { %1117 = vst.msk [vmem:[%s2345_s5 + $0x58] sm:$0xff] %vm566_vm0, %v1101_v43  ;;  %v1232_v42 = vsel %vm995_vm8, 1.0, %v2366_v10  ;;  %v987_v57 = vsub.f32 %v971_v51, %v2388_v44  ;;  %v984_v48 = vsub.f32 %v968_v20, %v2389_v46  ;;  %v974_v37 = vadd.f32 %v2390_v33, %v868_v38  ;;  %v870_v22 = vpop.f32.mrf.mxu1 }
 0x136   :  { %v1075_v50 = vadd.f32 %v1232_v42, %v1059_v31  ;;  %v992_v0 = vsub.f32 %v976_v5, %v1996_v17  ;;  %v982_v60 = vsub.f32 %v966_v3, %v2391_v9  ;;  %v969_v41 = vadd.f32 %v2392_v8, %v847_v11  ;;  %v1072_v17 = vld [vmem:[%s2343_s4 + $0x70] sm:$0xff]  ;;  %v1071_v3 = vld [vmem:[%s2343_s4 + $0x68] sm:$0xff] }
 0x137   :  { %vm1003_vm9 = vcmp.gt.f32.partialorder %v987_v57, 1.0  ;;  %1051 = vst.msk [vmem:[%s2344_s6 + $0x48] sm:$0xff] %vm566_vm0, %v987_v57  ;;  %vm1000_vm10 = vcmp.gt.f32.partialorder %v984_v48, 1.0  ;;  %1048 = vst.msk [vmem:[%s2344_s6 + $0x30] sm:$0xff] %vm566_vm0, %v984_v48  ;;  %v990_v59 = vsub.f32 %v974_v37, %v2393_v54  ;;  %v879_v13 = vadd.f32 %v1410_v32, %v2110_v28  ;;  %v1062_v28 = vld [vmem:[%s2343_s4 + $0x20] sm:$0xff] }
 0x138   :  { %v1091_v15 = vmax.f32 %v1075_v50, 0.0  ;;  %v1240_v45 = vsel %vm1003_vm9, 1.0, %v2366_v10  ;;  %v1237_v23 = vsel %vm1000_vm10, 1.0, %v2366_v10  ;;  %vm1008_vm11 = vcmp.gt.f32.partialorder %v992_v0, 1.0  ;;  %1056 = vst.msk [vmem:[%s2344_s6 + $0x70] sm:$0xff] %vm566_vm0, %v992_v0  ;;  %1046 = vst.msk [vmem:[%s2344_s6 + $0x20] sm:$0xff] %vm566_vm0, %v982_v60 }
 0x139   :  { %v1083_v55 = vadd.f32 %v1240_v45, %v1067_v52  ;;  %v1080_v47 = vadd.f32 %v1237_v23, %v1064_v39  ;;  %v1245_v12 = vsel %vm1008_vm11, 1.0, %v2366_v10  ;;  %vm998_vm12 = vcmp.gt.f32.partialorder %v982_v60, 1.0  ;;  %1054 = vst.msk [vmem:[%s2344_s6 + $0x60] sm:$0xff] %vm566_vm0, %v990_v59 }
 0x13a   :  { %1107 = vst.msk [vmem:[%s2345_s5 + $0x8] sm:$0xff] %vm566_vm0, %v1091_v15  ;;  %v1088_v30 = vadd.f32 %v1245_v12, %v1072_v17  ;;  %v1235_v63 = vsel %vm998_vm12, 1.0, %v2366_v10  ;;  %vm1006_vm13 = vcmp.gt.f32.partialorder %v990_v59, 1.0  ;;  %v985_v49 = vsub.f32 %v969_v41, %v2394_v14 }
 0x13b   :  { %v1099_v21 = vmax.f32 %v1083_v55, 0.0  ;;  %v1096_v19 = vmax.f32 %v1080_v47, 0.0  ;;  %v1078_v36 = vadd.f32 %v1235_v63, %v1062_v28  ;;  %v1243_v62 = vsel %vm1006_vm13, 1.0, %v2366_v10 }
 0x13c   :  { %v1104_v4 = vmax.f32 %v1088_v30, 0.0  ;;  %v1086_v53 = vadd.f32 %v1243_v62, %v1070_v27  ;;  %vm1001_vm14 = vcmp.gt.f32.partialorder %v985_v49, 1.0  ;;  %1049 = vst.msk [vmem:[%s2344_s6 + $0x38] sm:$0xff] %vm566_vm0, %v985_v49  ;;  %v977_v1 = vadd.f32 %v2395_v56, %v879_v13 }
 0x13d   :  { %1115 = vst.msk [vmem:[%s2345_s5 + $0x48] sm:$0xff] %vm566_vm0, %v1099_v21  ;;  %1112 = vst.msk [vmem:[%s2345_s5 + $0x30] sm:$0xff] %vm566_vm0, %v1096_v19  ;;  %v1094_v35 = vmax.f32 %v1078_v36, 0.0  ;;  %v1238_v2 = vsel %vm1001_vm14, 1.0, %v2366_v10  ;;  %v839_v43 = vadd.f32 %v838_v61, %v2073_v58  ;;  %v871_v31 = vadd.f32 %v870_v22, %v2101_v34  ;;  %v1073_v58 = vld [vmem:[%s2343_s4 + $0x78] sm:$0xff] }
 0x13e   :  { %1120 = vst.msk [vmem:[%s2345_s5 + $0x70] sm:$0xff] %vm566_vm0, %v1104_v4  ;;  %v1102_v6 = vmax.f32 %v1086_v53, 0.0  ;;  %v1081_v51 = vadd.f32 %v1238_v2, %v1065_v25  ;;  %v993_v16 = vsub.f32 %v977_v1, %v2026_v18  ;;  %v1228_v20 = vsel %vm911_vm7, 1.0, %v2366_v10 }
 0x13f   :  { %1110 = vst.msk [vmem:[%s2345_s5 + $0x20] sm:$0xff] %vm566_vm0, %v1094_v35  ;;  %v967_v34 = vadd.f32 %v2028_v7, %v839_v43  ;;  %v975_v38 = vadd.f32 %v2035_v24, %v871_v31  ;;  %v1063_v24 = vld [vmem:[%s2343_s4 + $0x28] sm:$0xff] }
 0x140   :  { %1118 = vst.msk [vmem:[%s2345_s5 + $0x60] sm:$0xff] %vm566_vm0, %v1102_v6  ;;  %v1097_v29 = vmax.f32 %v1081_v51, 0.0  ;;  %vm1009_vm15 = vcmp.gt.f32.partialorder %v993_v16, 1.0  ;;  %1057 = vst.msk [vmem:[%s2344_s6 + $0x78] sm:$0xff] %vm566_vm0, %v993_v16 }
 0x141   :  { %v1246_v18 = vsel %vm1009_vm15, 1.0, %v2366_v10  ;;  %v983_v5 = vsub.f32 %v967_v34, %v2396_v26  ;;  %v991_v40 = vsub.f32 %v975_v38, %v1228_v20 }
 0x142   :  { %1113 = vst.msk [vmem:[%s2345_s5 + $0x38] sm:$0xff] %vm566_vm0, %v1097_v29  ;;  %v1089_v7 = vadd.f32 %v1246_v18, %v1073_v58 }
 0x143   :  { %vm999_vm1 = vcmp.gt.f32.partialorder %v983_v5, 1.0  ;;  %1047 = vst.msk [vmem:[%s2344_s6 + $0x28] sm:$0xff] %vm566_vm0, %v983_v5  ;;  %vm1007_vm2 = vcmp.gt.f32.partialorder %v991_v40, 1.0  ;;  %1055 = vst.msk [vmem:[%s2344_s6 + $0x68] sm:$0xff] %vm566_vm0, %v991_v40 }
 0x144   :  { %v1105_v11 = vmax.f32 %v1089_v7, 0.0  ;;  %v1236_v32 = vsel %vm999_vm1, 1.0, %v2366_v10  ;;  %v1244_v42 = vsel %vm1007_vm2, 1.0, %v2366_v10 }
 0x145   :  { %v1079_v44 = vadd.f32 %v1236_v32, %v1063_v24  ;;  %v1087_v57 = vadd.f32 %v1244_v42, %v1071_v3 }
 0x146   :  { %1121 = vst.msk [vmem:[%s2345_s5 + $0x78] sm:$0xff] %vm566_vm0, %v1105_v11 }
 0x147   :  { %v1095_v46 = vmax.f32 %v1079_v44, 0.0  ;;  %v1103_v48 = vmax.f32 %v1087_v57, 0.0 }
 0x149   :  { %1111 = vst.msk [vmem:[%s2345_s5 + $0x28] sm:$0xff] %vm566_vm0, %v1095_v46  ;;  %1119 = vst.msk [vmem:[%s2345_s5 + $0x68] sm:$0xff] %vm566_vm0, %v1103_v48 }

// kernel: snn_yolo_forward.10
= control target key start
LH: loop header
LB: loop body
LE: loop exit
PB: predicated region body
PF: predicated region fallthrough
CT: control target
= control target key end

     0   :  { %v1990_v0 = vmov 0   ;;  %vm455_vm0 = vcmask 154624   ;;  %vm552_vm1 = vcmask 1040384   ;;  %vm553_vm2 = vcmask 1041408   ;;  %s3243_s1 = inlined_call_operand.vmem [shape: bf16[147,64], index: 1, kind: input, shape index: {}]   ;;  %s3244_s0 = inlined_call_operand.vmem [shape: bf16[512,147], index: 0, kind: input, shape index: {}]   ;;  %s3245_s3 = inlined_call_operand.vmem [shape: f32[512,64], index: 3, kind: input, shape index: {}, may-alias: {3,5}]   ;;  %s3246_s2 = inlined_call_operand.vmem [shape: f32[1,64], index: 2, kind: input, shape index: {}]   ;;  %s3247_s5 = inlined_call_operand.vmem [shape: f32[512,64], index: 5, kind: output, shape index: {1}, may-alias: {3,5}]   ;;  %s3248_s4 = inlined_call_operand.vmem [shape: f32[512,64], index: 4, kind: output, shape index: {0}]  }
   0x1   :  { %559 = vmatprep.subr.bf16.mxu0 %v1990_v0  ;;  %1860 = vmatprep.subr.bf16.mxu1 %v1990_v0  ;;  %v1883_v1 = vld [vmem:[%s3243_s1 + $0x38] sm:$0xff]   ;;  %v1884_v2 = vld [vmem:[%s3243_s1 + $0x30] sm:$0xff]   ;;  %v1885_v3 = vld [vmem:[%s3243_s1 + $0x28] sm:$0xff]   ;;  %v1991_v10 = vmov 65535   ;;  %vm1488_vm7 = vcmask 523264  }
   0x2   :  { %560 = vmatpush1.bf16.msra.mxu0 %v1883_v1  ;;  %1870 = vmatpush1.bf16.msra.mxu1 %v1883_v1  ;;  %v1886_v4 = vld [vmem:[%s3243_s1 + $0x20] sm:$0xff]   ;;  %v1887_v7 = vld [vmem:[%s3243_s1 + $0x18] sm:$0xff]   ;;  %v1888_v8 = vld [vmem:[%s3243_s1 + $0x10] sm:$0xff]   ;;  %v554_v11 = vsel %vm552_vm1, 4294967295, %v1991_v10 }
   0x3   :  { %561 = vmatprep.subr.bf16.mxu0 %v1990_v0  ;;  %1861 = vmatprep.subr.bf16.mxu1 %v1990_v0  ;;  %v1895_v5 = vld [vmem:[%s3244_s0 + $0x4] ss:$8 sps:$4 sm:$0xff]   ;;  %v1891_v13 = vld [vmem:[%s3243_s1 + $0x48] ss:$0 sps:$4 sm:$0x33]   ;;  %v555_v14 = vsel %vm553_vm2, %v554_v11, 0 }
   0x4   :  { %1700 = vmatprep.mubr.msk.bf16.mxu0 %vm455_vm0, %v1895_v5  ;;  %v1898_v6 = vld [vmem:[%s3244_s0 + $0x104] ss:$8 sps:$4 sm:$0xff]   ;;  %v557_v15 = vand.u32 %v1891_v13, %v555_v14  ;;  %v1893_v17 = vld [vmem:[%s3244_s0] ss:$8 sps:$4 sm:$0xff]   ;;  %v1899_v19 = vld [vmem:[%s3244_s0 + $0x14] ss:$8 sps:$4 sm:$0xff]  }
   0x5   :  { %1716 = vmatprep.mubr.msk.bf16.mxu1 %vm455_vm0, %v1898_v6  ;;  %v1889_v9 = vld [vmem:[%s3243_s1 + $0x8] sm:$0xff]   ;;  %v1890_v12 = vld [vmem:[%s3243_s1] sm:$0xff]   ;;  %v1901_v20 = vld [vmem:[%s3244_s0 + $0x114] ss:$8 sps:$4 sm:$0xff]  }
   0x6   :  { %562 = vmatpush1.bf16.msra.mxu0 %v1884_v2  ;;  %1871 = vmatpush1.bf16.msra.mxu1 %v1884_v2  ;;  %v1892_v16 = vld [vmem:[%s3243_s1 + $0x40] sm:$0xff]   ;;  %v1903_v21 = vld [vmem:[%s3244_s0 + $0x10] ss:$8 sps:$4 sm:$0xff]   ;;  %v1911_v27 = vld [vmem:[%s3244_s0 + $0x34] ss:$8 sps:$4 sm:$0xff]  }
   0x7   :  { %563 = vmatprep.subr.bf16.mxu0 %v1990_v0  ;;  %1862 = vmatprep.subr.bf16.mxu1 %v1990_v0  ;;  %v1896_v18 = vld [vmem:[%s3244_s0 + $0x100] ss:$8 sps:$4 sm:$0xff]   ;;  %v1904_v22 = vld [vmem:[%s3244_s0 + $0x110] ss:$8 sps:$4 sm:$0xff]   ;;  %v1905_v23 = vld [vmem:[%s3244_s0 + $0x24] ss:$8 sps:$4 sm:$0xff]  }
   0x8   :  { %v1907_v24 = vld [vmem:[%s3244_s0 + $0x124] ss:$8 sps:$4 sm:$0xff]   ;;  %v1909_v25 = vld [vmem:[%s3244_s0 + $0x20] ss:$8 sps:$4 sm:$0xff]   ;;  %v1913_v28 = vld [vmem:[%s3244_s0 + $0x134] ss:$8 sps:$4 sm:$0xff]  }
   0x9   :  { %v1910_v26 = vld [vmem:[%s3244_s0 + $0x120] ss:$8 sps:$4 sm:$0xff]   ;;  %v1915_v29 = vld [vmem:[%s3244_s0 + $0x30] ss:$8 sps:$4 sm:$0xff]   ;;  %v1917_v31 = vld [vmem:[%s3244_s0 + $0x44] ss:$8 sps:$4 sm:$0xff]  }
   0xa   :  { %564 = vmatpush1.bf16.msra.mxu0 %v1885_v3  ;;  %1872 = vmatpush1.bf16.msra.mxu1 %v1885_v3  ;;  %v1916_v30 = vld [vmem:[%s3244_s0 + $0x130] ss:$8 sps:$4 sm:$0xff]   ;;  %v1919_v32 = vld [vmem:[%s3244_s0 + $0x144] ss:$8 sps:$4 sm:$0xff]   ;;  %v1921_v33 = vld [vmem:[%s3244_s0 + $0x40] ss:$8 sps:$4 sm:$0xff]  }
   0xb   :  { %565 = vmatprep.subr.bf16.mxu0 %v1990_v0  ;;  %1863 = vmatprep.subr.bf16.mxu1 %v1990_v0  ;;  %v1922_v34 = vld [vmem:[%s3244_s0 + $0x140] ss:$8 sps:$4 sm:$0xff]   ;;  %v1923_v35 = vld [vmem:[%s3244_s0 + $0x54] ss:$8 sps:$4 sm:$0xff]   ;;  %v1927_v37 = vld [vmem:[%s3244_s0 + $0x50] ss:$8 sps:$4 sm:$0xff]  }
   0xc   :  { %v1925_v36 = vld [vmem:[%s3244_s0 + $0x154] ss:$8 sps:$4 sm:$0xff]   ;;  %v1928_v38 = vld [vmem:[%s3244_s0 + $0x150] ss:$8 sps:$4 sm:$0xff]   ;;  %v1929_v39 = vld [vmem:[%s3244_s0 + $0x64] ss:$8 sps:$4 sm:$0xff]  }
   0xd   :  { %v1931_v40 = vld [vmem:[%s3244_s0 + $0x164] ss:$8 sps:$4 sm:$0xff]   ;;  %v1933_v41 = vld [vmem:[%s3244_s0 + $0x60] ss:$8 sps:$4 sm:$0xff]   ;;  %v1935_v43 = vld [vmem:[%s3244_s0 + $0x74] ss:$8 sps:$4 sm:$0xff]  }
   0xe   :  { %566 = vmatpush1.bf16.msra.mxu0 %v1886_v4  ;;  %1873 = vmatpush1.bf16.msra.mxu1 %v1886_v4  ;;  %v1934_v42 = vld [vmem:[%s3244_s0 + $0x160] ss:$8 sps:$4 sm:$0xff]   ;;  %v1937_v44 = vld [vmem:[%s3244_s0 + $0x174] ss:$8 sps:$4 sm:$0xff]   ;;  %v1939_v45 = vld [vmem:[%s3244_s0 + $0x70] ss:$8 sps:$4 sm:$0xff]  }
   0xf   :  { %567 = vmatprep.subr.bf16.mxu0 %v1990_v0  ;;  %1864 = vmatprep.subr.bf16.mxu1 %v1990_v0  ;;  %v1940_v46 = vld [vmem:[%s3244_s0 + $0x170] ss:$8 sps:$4 sm:$0xff]   ;;  %v1941_v47 = vld [vmem:[%s3244_s0 + $0x84] ss:$8 sps:$4 sm:$0xff]   ;;  %v1945_v49 = vld [vmem:[%s3244_s0 + $0x80] ss:$8 sps:$4 sm:$0xff]  }
  0x10   :  { %v1943_v48 = vld [vmem:[%s3244_s0 + $0x184] ss:$8 sps:$4 sm:$0xff]   ;;  %v1946_v50 = vld [vmem:[%s3244_s0 + $0x180] ss:$8 sps:$4 sm:$0xff]   ;;  %v1947_v51 = vld [vmem:[%s3244_s0 + $0x94] ss:$8 sps:$4 sm:$0xff]  }
  0x11   :  { %v1949_v52 = vld [vmem:[%s3244_s0 + $0x194] ss:$8 sps:$4 sm:$0xff]   ;;  %v1951_v53 = vld [vmem:[%s3244_s0 + $0x90] ss:$8 sps:$4 sm:$0xff]   ;;  %v1953_v55 = vld [vmem:[%s3244_s0 + $0xa4] ss:$8 sps:$4 sm:$0xff]  }
  0x12   :  { %568 = vmatpush1.bf16.msra.mxu0 %v1887_v7  ;;  %1874 = vmatpush1.bf16.msra.mxu1 %v1887_v7  ;;  %v1952_v54 = vld [vmem:[%s3244_s0 + $0x190] ss:$8 sps:$4 sm:$0xff]   ;;  %v1955_v56 = vld [vmem:[%s3244_s0 + $0x1a4] ss:$8 sps:$4 sm:$0xff]   ;;  %v1957_v57 = vld [vmem:[%s3244_s0 + $0xa0] ss:$8 sps:$4 sm:$0xff]  }
  0x13   :  { %569 = vmatprep.subr.bf16.mxu0 %v1990_v0  ;;  %1865 = vmatprep.subr.bf16.mxu1 %v1990_v0  ;;  %v1958_v58 = vld [vmem:[%s3244_s0 + $0x1a0] ss:$8 sps:$4 sm:$0xff]   ;;  %v1959_v59 = vld [vmem:[%s3244_s0 + $0xb4] ss:$8 sps:$4 sm:$0xff]   ;;  %v1963_v61 = vld [vmem:[%s3244_s0 + $0xb0] ss:$8 sps:$4 sm:$0xff]  }
  0x14   :  { %v1961_v60 = vld [vmem:[%s3244_s0 + $0x1b4] ss:$8 sps:$4 sm:$0xff]   ;;  %v1964_v62 = vld [vmem:[%s3244_s0 + $0x1b0] ss:$8 sps:$4 sm:$0xff]   ;;  %v1965_v63 = vld [vmem:[%s3244_s0 + $0xc4] ss:$8 sps:$4 sm:$0xff]  }
  0x15   :  { %v1969_v1 = vld [vmem:[%s3244_s0 + $0xc0] ss:$8 sps:$4 sm:$0xff]   ;;  %v1971_v3 = vld [vmem:[%s3244_s0 + $0xd4] ss:$8 sps:$4 sm:$0xff]   ;;  %v1975_v5 = vld [vmem:[%s3244_s0 + $0xd0] ss:$8 sps:$4 sm:$0xff]  }
  0x16   :  { %570 = vmatpush1.bf16.msra.mxu0 %v1888_v8  ;;  %1875 = vmatpush1.bf16.msra.mxu1 %v1888_v8  ;;  %v1970_v2 = vld [vmem:[%s3244_s0 + $0x1c0] ss:$8 sps:$4 sm:$0xff]   ;;  %v1973_v4 = vld [vmem:[%s3244_s0 + $0x1d4] ss:$8 sps:$4 sm:$0xff]   ;;  %v1976_v6 = vld [vmem:[%s3244_s0 + $0x1d0] ss:$8 sps:$4 sm:$0xff]  }
  0x17   :  { %571 = vmatprep.subr.bf16.mxu0 %v1990_v0  ;;  %1866 = vmatprep.subr.bf16.mxu1 %v1990_v0  ;;  %v1977_v7 = vld [vmem:[%s3244_s0 + $0xe4] ss:$8 sps:$4 sm:$0xff]   ;;  %v1982_v10 = vld [vmem:[%s3244_s0 + $0x1e0] ss:$8 sps:$4 sm:$0xff]   ;;  %v1983_v11 = vld [vmem:[%s3244_s0 + $0xf4] ss:$8 sps:$4 sm:$0xff]  }
  0x18   :  { %v1979_v8 = vld [vmem:[%s3244_s0 + $0x1e4] ss:$8 sps:$4 sm:$0xff]   ;;  %v1987_v13 = vld [vmem:[%s3244_s0 + $0xf0] ss:$8 sps:$4 sm:$0xff]  }
  0x19   :  { %v1988_v14 = vld [vmem:[%s3244_s0 + $0x1f0] ss:$8 sps:$4 sm:$0xff]  }
  0x1a   :  { %572 = vmatpush1.bf16.msra.mxu0 %v1889_v9  ;;  %1876 = vmatpush1.bf16.msra.mxu1 %v1889_v9  ;;  %v1981_v9 = vld [vmem:[%s3244_s0 + $0xe0] ss:$8 sps:$4 sm:$0xff]  }
  0x1b   :  { %573 = vmatprep.subr.bf16.mxu0 %v1990_v0  ;;  %1867 = vmatprep.subr.bf16.mxu1 %v1990_v0 }
  0x1e   :  { %574 = vmatpush1.bf16.msra.mxu0 %v1890_v12  ;;  %1877 = vmatpush1.bf16.msra.mxu1 %v1890_v12  ;;  %v1985_v12 = vld [vmem:[%s3244_s0 + $0x1f4] ss:$8 sps:$4 sm:$0xff]  }
  0x1f   :  { %587 = vmatprep.subr.bf16.mxu0 %v1990_v0  ;;  %1868 = vmatprep.subr.bf16.mxu1 %v1990_v0 }
  0x22   :  { %588 = vmatpush2.bf16.msra.mxu0 %v557_v15  ;;  %1878 = vmatpush2.bf16.msra.mxu1 %v557_v15  ;;  %v848_v15 = vld [vmem:[%s3245_s3] sm:$0xff] }
  0x23   :  { %589 = vmatprep.subr.bf16.mxu0 %v1990_v0  ;;  %1869 = vmatprep.subr.bf16.mxu1 %v1990_v0  ;;  %v1967_v0 = vld [vmem:[%s3244_s0 + $0x1c4] ss:$8 sps:$4 sm:$0xff]   ;;  %vm912_vm3 = vcmp.gt.f32.partialorder %v848_v15, 1.0 }
  0x26   :  { %590 = vmatpush2.bf16.msra.mxu0 %v1892_v16  ;;  %1879 = vmatpush2.bf16.msra.mxu1 %v1892_v16  ;;  %v880_v16 = vld [vmem:[%s3245_s3 + $0x100] sm:$0xff] }
  0x27   :  { %vm944_vm4 = vcmp.gt.f32.partialorder %v880_v16, 1.0 }
  0x29   :  { %592 = vmatmul.mubr.bf16.vlgmr.msra.gmra.mxu0 %v1893_v17  ;;  %720 = vmatmul.mubr.bf16.vlgmr.msra.gmra.mxu1 %v1896_v18  ;;  %v2286_v17 = vld [vmem:[%s3246_s2] ss:$0 sm:$0xff]  ;;  %v1104_v18 = vmul.f32 0.9, %v848_v15 }
  0x2a   :  { %1701 = vmatprep.mubr.msk.bf16.mxu0 %vm455_vm0, %v1899_v19  ;;  %1717 = vmatprep.mubr.msk.bf16.mxu1 %vm455_vm0, %v1901_v20  ;;  %v1136_v19 = vmul.f32 0.9, %v880_v16  ;;  %v849_v20 = vld [vmem:[%s3245_s3 + $0x8] sm:$0xff] }
  0x2b   :  { %vm913_vm5 = vcmp.gt.f32.partialorder %v849_v20, 1.0 }
  0x31   :  { %600 = vmatmul.mubr.bf16.gmra.mxu0 %v1903_v21  ;;  %728 = vmatmul.mubr.bf16.gmra.mxu1 %v1904_v22  ;;  %v881_v21 = vld [vmem:[%s3245_s3 + $0x108] sm:$0xff] }
  0x32   :  { %1702 = vmatprep.mubr.msk.bf16.mxu0 %vm455_vm0, %v1905_v23  ;;  %1718 = vmatprep.mubr.msk.bf16.mxu1 %vm455_vm0, %v1907_v24  ;;  %vm945_vm6 = vcmp.gt.f32.partialorder %v881_v21, 1.0 }
  0x39   :  { %608 = vmatmul.mubr.bf16.gmra.mxu0 %v1909_v25  ;;  %736 = vmatmul.mubr.bf16.gmra.mxu1 %v1910_v26  ;;  %v1992_v26 = vmov 0.0  }
  0x3a   :  { %1703 = vmatprep.mubr.msk.bf16.mxu0 %vm455_vm0, %v1911_v27  ;;  %1719 = vmatprep.mubr.msk.bf16.mxu1 %vm455_vm0, %v1913_v28  ;;  %v1732_v27 = vsel %vm912_vm3, 1.0, %v1992_v26  ;;  %v1764_v28 = vsel %vm944_vm4, 1.0, %v1992_v26 }
  0x41   :  { %616 = vmatmul.mubr.bf16.gmra.mxu0 %v1915_v29  ;;  %744 = vmatmul.mubr.bf16.gmra.mxu1 %v1916_v30 }
  0x42   :  { %1704 = vmatprep.mubr.msk.bf16.mxu0 %vm455_vm0, %v1917_v31  ;;  %1720 = vmatprep.mubr.msk.bf16.mxu1 %vm455_vm0, %v1919_v32  ;;  %v1105_v31 = vmul.f32 0.9, %v849_v20  ;;  %v1137_v32 = vmul.f32 0.9, %v881_v21 }
  0x49   :  { %624 = vmatmul.mubr.bf16.gmra.mxu0 %v1921_v33  ;;  %752 = vmatmul.mubr.bf16.gmra.mxu1 %v1922_v34 }
  0x4a   :  { %1705 = vmatprep.mubr.msk.bf16.mxu0 %vm455_vm0, %v1923_v35  ;;  %1721 = vmatprep.mubr.msk.bf16.mxu1 %vm455_vm0, %v1925_v36  ;;  %v850_v35 = vld [vmem:[%s3245_s3 + $0x10] sm:$0xff] }
  0x4b   :  { %v882_v36 = vld [vmem:[%s3245_s3 + $0x110] sm:$0xff]  ;;  %vm914_vm8 = vcmp.gt.f32.partialorder %v850_v35, 1.0 }
  0x4c   :  { %vm946_vm9 = vcmp.gt.f32.partialorder %v882_v36, 1.0 }
  0x51   :  { %632 = vmatmul.mubr.bf16.gmra.mxu0 %v1927_v37  ;;  %760 = vmatmul.mubr.bf16.gmra.mxu1 %v1928_v38 }
  0x52   :  { %1706 = vmatprep.mubr.msk.bf16.mxu0 %vm455_vm0, %v1929_v39  ;;  %1722 = vmatprep.mubr.msk.bf16.mxu1 %vm455_vm0, %v1931_v40 }
  0x59   :  { %640 = vmatmul.mubr.bf16.gmra.mxu0 %v1933_v41  ;;  %768 = vmatmul.mubr.bf16.gmra.mxu1 %v1934_v42 }
  0x5a   :  { %1707 = vmatprep.mubr.msk.bf16.mxu0 %vm455_vm0, %v1935_v43  ;;  %1723 = vmatprep.mubr.msk.bf16.mxu1 %vm455_vm0, %v1937_v44  ;;  %v1733_v43 = vsel %vm913_vm5, 1.0, %v1992_v26  ;;  %v1765_v44 = vsel %vm945_vm6, 1.0, %v1992_v26 }
  0x61   :  { %648 = vmatmul.mubr.bf16.gmra.mxu0 %v1939_v45  ;;  %776 = vmatmul.mubr.bf16.gmra.mxu1 %v1940_v46 }
  0x62   :  { %1708 = vmatprep.mubr.msk.bf16.mxu0 %vm455_vm0, %v1941_v47  ;;  %1724 = vmatprep.mubr.msk.bf16.mxu1 %vm455_vm0, %v1943_v48  ;;  %v1106_v47 = vmul.f32 0.9, %v850_v35  ;;  %v1138_v48 = vmul.f32 0.9, %v882_v36 }
  0x69   :  { %656 = vmatmul.mubr.bf16.gmra.mxu0 %v1945_v49  ;;  %784 = vmatmul.mubr.bf16.gmra.mxu1 %v1946_v50 }
  0x6a   :  { %1709 = vmatprep.mubr.msk.bf16.mxu0 %vm455_vm0, %v1947_v51  ;;  %1725 = vmatprep.mubr.msk.bf16.mxu1 %vm455_vm0, %v1949_v52 }
  0x71   :  { %664 = vmatmul.mubr.bf16.gmra.mxu0 %v1951_v53  ;;  %792 = vmatmul.mubr.bf16.gmra.mxu1 %v1952_v54 }
  0x72   :  { %1710 = vmatprep.mubr.msk.bf16.mxu0 %vm455_vm0, %v1953_v55  ;;  %1726 = vmatprep.mubr.msk.bf16.mxu1 %vm455_vm0, %v1955_v56  ;;  %v1734_v56 = vsel %vm914_vm8, 1.0, %v1992_v26 }
  0x79   :  { %672 = vmatmul.mubr.bf16.gmra.mxu0 %v1957_v57  ;;  %800 = vmatmul.mubr.bf16.gmra.mxu1 %v1958_v58  ;;  %v1766_v58 = vsel %vm946_vm9, 1.0, %v1992_v26 }
  0x7a   :  { %1711 = vmatprep.mubr.msk.bf16.mxu0 %vm455_vm0, %v1959_v59  ;;  %1727 = vmatprep.mubr.msk.bf16.mxu1 %vm455_vm0, %v1961_v60 }
  0x81   :  { %680 = vmatmul.mubr.bf16.gmra.mxu0 %v1963_v61  ;;  %808 = vmatmul.mubr.bf16.gmra.mxu1 %v1964_v62 }
  0x82   :  { %1712 = vmatprep.mubr.msk.bf16.mxu0 %vm455_vm0, %v1965_v63  ;;  %1728 = vmatprep.mubr.msk.bf16.mxu1 %vm455_vm0, %v1967_v0 }
  0x89   :  { %688 = vmatmul.mubr.bf16.gmra.mxu0 %v1969_v1  ;;  %816 = vmatmul.mubr.bf16.gmra.mxu1 %v1970_v2 }
  0x8a   :  { %1713 = vmatprep.mubr.msk.bf16.mxu0 %vm455_vm0, %v1971_v3  ;;  %1729 = vmatprep.mubr.msk.bf16.mxu1 %vm455_vm0, %v1973_v4 }
  0x91   :  { %696 = vmatmul.mubr.bf16.gmra.mxu0 %v1975_v5  ;;  %824 = vmatmul.mubr.bf16.gmra.mxu1 %v1976_v6 }
  0x92   :  { %1714 = vmatprep.mubr.msk.bf16.mxu0 %vm455_vm0, %v1977_v7  ;;  %1730 = vmatprep.mubr.msk.bf16.mxu1 %vm455_vm0, %v1979_v8 }
  0x99   :  { %704 = vmatmul.mubr.bf16.gmra.mxu0 %v1981_v9  ;;  %832 = vmatmul.mubr.bf16.gmra.mxu1 %v1982_v10 }
  0x9a   :  { %1715 = vmatprep.mubr.msk.bf16.mxu0 %vm455_vm0, %v1983_v11  ;;  %1731 = vmatprep.mubr.msk.bf16.mxu1 %vm455_vm0, %v1985_v12 }
  0xa1   :  { %712 = vmatmul.mubr.bf16.gmra.mxu0 %v1987_v13  ;;  %840 = vmatmul.mubr.bf16.gmra.mxu1 %v1988_v14 }
  0xe9   :  { %v593_v22 = vpop.f32.mrf.mxu0  ;;  %v721_v23 = vpop.f32.mrf.mxu1 }
  0xea   :  { %v594_v24 = vadd.f32 %v2286_v17, %v593_v22  ;;  %v722_v25 = vadd.f32 %v2286_v17, %v721_v23 }
  0xeb   :  { %v595_v29 = vpop.f32.mrf.mxu0  ;;  %v723_v30 = vpop.f32.mrf.mxu1 }
  0xec   :  { %v1168_v33 = vadd.f32 %v1104_v18, %v594_v24  ;;  %v1200_v34 = vadd.f32 %v1136_v19, %v722_v25 }
  0xed   :  { %v596_v37 = vpop.f32.mrf.mxu0  ;;  %v724_v38 = vpop.f32.mrf.mxu1 }
  0xee   :  { %v1232_v39 = vsub.f32 %v1168_v33, %v1732_v27  ;;  %v1264_v40 = vsub.f32 %v1200_v34, %v1764_v28  ;;  %v597_v41 = vadd.f32 %v2286_v17, %v596_v37  ;;  %v725_v42 = vadd.f32 %v2286_v17, %v724_v38 }
  0xef   :  { %v598_v45 = vpop.f32.mrf.mxu0  ;;  %v726_v46 = vpop.f32.mrf.mxu1 }
  0xf0   :  { %vm1296_vm10 = vcmp.gt.f32.partialorder %v1232_v39, 1.0  ;;  %1489 = vst.msk [vmem:[%s3247_s5] sm:$0xff] %vm1488_vm7, %v1232_v39  ;;  %vm1328_vm11 = vcmp.gt.f32.partialorder %v1264_v40, 1.0  ;;  %1521 = vst.msk [vmem:[%s3247_s5 + $0x100] sm:$0xff] %vm1488_vm7, %v1264_v40  ;;  %v1169_v49 = vadd.f32 %v1105_v31, %v597_v41  ;;  %v1201_v50 = vadd.f32 %v1137_v32, %v725_v42 }
  0xf1   :  { %v1796_v53 = vsel %vm1296_vm10, 1.0, %v1992_v26  ;;  %v1828_v54 = vsel %vm1328_vm11, 1.0, %v1992_v26  ;;  %v601_v55 = vpop.f32.mrf.mxu0  ;;  %v729_v57 = vpop.f32.mrf.mxu1 }
  0xf2   :  { %1553 = vst.msk [vmem:[%s3248_s4] sm:$0xff] %vm1488_vm7, %v1796_v53  ;;  %1585 = vst.msk [vmem:[%s3248_s4 + $0x100] sm:$0xff] %vm1488_vm7, %v1828_v54  ;;  %v1233_v59 = vsub.f32 %v1169_v49, %v1733_v43  ;;  %v1265_v60 = vsub.f32 %v1201_v50, %v1765_v44  ;;  %v602_v61 = vadd.f32 %v2286_v17, %v601_v55 }
  0xf3   :  { %v730_v62 = vadd.f32 %v2286_v17, %v729_v57  ;;  %v603_v63 = vpop.f32.mrf.mxu0  ;;  %v731_v0 = vpop.f32.mrf.mxu1 }
  0xf4   :  { %vm1297_vm14 = vcmp.gt.f32.partialorder %v1233_v59, 1.0  ;;  %vm1329_vm15 = vcmp.gt.f32.partialorder %v1265_v60, 1.0  ;;  %v1170_v3 = vadd.f32 %v1106_v47, %v602_v61 }
  0xf5   :  { %v1202_v4 = vadd.f32 %v1138_v48, %v730_v62  ;;  %v1797_v7 = vsel %vm1297_vm14, 1.0, %v1992_v26  ;;  %v1829_v8 = vsel %vm1329_vm15, 1.0, %v1992_v26  ;;  %v604_v9 = vpop.f32.mrf.mxu0  ;;  %v732_v10 = vpop.f32.mrf.mxu1 }
  0xf6   :  { %1554 = vst.msk [vmem:[%s3248_s4 + $0x8] sm:$0xff] %vm1488_vm7, %v1797_v7  ;;  %1586 = vst.msk [vmem:[%s3248_s4 + $0x108] sm:$0xff] %vm1488_vm7, %v1829_v8  ;;  %v1234_v11 = vsub.f32 %v1170_v3, %v1734_v56  ;;  %v605_v13 = vadd.f32 %v2286_v17, %v604_v9  ;;  %v733_v14 = vadd.f32 %v2286_v17, %v732_v10 }
  0xf7   :  { %v851_v51 = vld [vmem:[%s3245_s3 + $0x18] sm:$0xff]  ;;  %v1266_v12 = vsub.f32 %v1202_v4, %v1766_v58  ;;  %v606_v18 = vpop.f32.mrf.mxu0  ;;  %v734_v19 = vpop.f32.mrf.mxu1 }
  0xf8   :  { %v883_v52 = vld [vmem:[%s3245_s3 + $0x118] sm:$0xff]  ;;  %vm915_vm12 = vcmp.gt.f32.partialorder %v851_v51, 1.0  ;;  %v1107_v1 = vmul.f32 0.9, %v851_v51  ;;  %vm1298_vm2 = vcmp.gt.f32.partialorder %v1234_v11, 1.0 }
  0xf9   :  { %vm947_vm13 = vcmp.gt.f32.partialorder %v883_v52, 1.0  ;;  %v1139_v2 = vmul.f32 0.9, %v883_v52  ;;  %1490 = vst.msk [vmem:[%s3247_s5 + $0x8] sm:$0xff] %vm1488_vm7, %v1233_v59  ;;  %1522 = vst.msk [vmem:[%s3247_s5 + $0x108] sm:$0xff] %vm1488_vm7, %v1265_v60  ;;  %v1735_v15 = vsel %vm915_vm12, 1.0, %v1992_v26  ;;  %v609_v29 = vpop.f32.mrf.mxu0  ;;  %v737_v31 = vpop.f32.mrf.mxu1 }
  0xfa   :  { %v1767_v16 = vsel %vm947_vm13, 1.0, %v1992_v26  ;;  %vm1330_vm3 = vcmp.gt.f32.partialorder %v1266_v12, 1.0  ;;  %v1171_v22 = vadd.f32 %v1107_v1, %v605_v13  ;;  %v1798_v27 = vsel %vm1298_vm2, 1.0, %v1992_v26 }
  0xfb   :  { %v1203_v23 = vadd.f32 %v1139_v2, %v733_v14  ;;  %v1830_v28 = vsel %vm1330_vm3, 1.0, %v1992_v26  ;;  %1555 = vst.msk [vmem:[%s3248_s4 + $0x10] sm:$0xff] %vm1488_vm7, %v1798_v27  ;;  %v610_v35 = vadd.f32 %v2286_v17, %v609_v29  ;;  %v738_v36 = vadd.f32 %v2286_v17, %v737_v31  ;;  %v611_v37 = vpop.f32.mrf.mxu0  ;;  %v739_v38 = vpop.f32.mrf.mxu1 }
  0xfc   :  { %1587 = vst.msk [vmem:[%s3248_s4 + $0x110] sm:$0xff] %vm1488_vm7, %v1830_v28  ;;  %v1235_v33 = vsub.f32 %v1171_v22, %v1735_v15 }
  0xfd   :  { %v1267_v34 = vsub.f32 %v1203_v23, %v1767_v16  ;;  %v612_v47 = vpop.f32.mrf.mxu0  ;;  %v740_v48 = vpop.f32.mrf.mxu1 }
  0xfe   :  { %vm1299_vm6 = vcmp.gt.f32.partialorder %v1235_v33, 1.0  ;;  %v613_v51 = vadd.f32 %v2286_v17, %v612_v47  ;;  %v741_v52 = vadd.f32 %v2286_v17, %v740_v48 }
  0xff   :  { %vm1331_vm8 = vcmp.gt.f32.partialorder %v1267_v34, 1.0  ;;  %v1799_v45 = vsel %vm1299_vm6, 1.0, %v1992_v26  ;;  %v614_v55 = vpop.f32.mrf.mxu0  ;;  %v742_v56 = vpop.f32.mrf.mxu1 }
 0x100   :  { %v852_v5 = vld [vmem:[%s3245_s3 + $0x20] sm:$0xff]  ;;  %v1831_v46 = vsel %vm1331_vm8, 1.0, %v1992_v26  ;;  %1556 = vst.msk [vmem:[%s3248_s4 + $0x18] sm:$0xff] %vm1488_vm7, %v1799_v45 }
 0x101   :  { %v884_v6 = vld [vmem:[%s3245_s3 + $0x120] sm:$0xff]  ;;  %vm916_vm0 = vcmp.gt.f32.partialorder %v852_v5, 1.0  ;;  %v1108_v20 = vmul.f32 0.9, %v852_v5  ;;  %1588 = vst.msk [vmem:[%s3248_s4 + $0x118] sm:$0xff] %vm1488_vm7, %v1831_v46  ;;  %v617_v1 = vpop.f32.mrf.mxu0  ;;  %v745_v3 = vpop.f32.mrf.mxu1 }
 0x102   :  { %vm948_vm1 = vcmp.gt.f32.partialorder %v884_v6, 1.0  ;;  %v1140_v21 = vmul.f32 0.9, %v884_v6  ;;  %1491 = vst.msk [vmem:[%s3247_s5 + $0x10] sm:$0xff] %vm1488_vm7, %v1234_v11  ;;  %1523 = vst.msk [vmem:[%s3247_s5 + $0x110] sm:$0xff] %vm1488_vm7, %v1266_v12  ;;  %v1736_v30 = vsel %vm916_vm0, 1.0, %v1992_v26  ;;  %v618_v7 = vadd.f32 %v2286_v17, %v617_v1 }
 0x103   :  { %v1768_v32 = vsel %vm948_vm1, 1.0, %v1992_v26  ;;  %v1172_v41 = vadd.f32 %v1108_v20, %v610_v35  ;;  %v746_v8 = vadd.f32 %v2286_v17, %v745_v3  ;;  %v619_v9 = vpop.f32.mrf.mxu0  ;;  %v747_v10 = vpop.f32.mrf.mxu1 }
 0x104   :  { %v1204_v42 = vadd.f32 %v1140_v21, %v738_v36 }
 0x105   :  { %v1236_v49 = vsub.f32 %v1172_v41, %v1736_v30  ;;  %v620_v20 = vpop.f32.mrf.mxu0  ;;  %v748_v21 = vpop.f32.mrf.mxu1 }
 0x106   :  { %v1268_v50 = vsub.f32 %v1204_v42, %v1768_v32 }
 0x107   :  { %vm1300_vm11 = vcmp.gt.f32.partialorder %v1236_v49, 1.0  ;;  %v622_v29 = vpop.f32.mrf.mxu0  ;;  %v750_v30 = vpop.f32.mrf.mxu1 }
 0x108   :  { %vm1332_vm12 = vcmp.gt.f32.partialorder %v1268_v50, 1.0  ;;  %v1800_v63 = vsel %vm1300_vm11, 1.0, %v1992_v26 }
 0x109   :  { %v853_v24 = vld [vmem:[%s3245_s3 + $0x28] sm:$0xff]  ;;  %v1832_v0 = vsel %vm1332_vm12, 1.0, %v1992_v26  ;;  %1557 = vst.msk [vmem:[%s3248_s4 + $0x20] sm:$0xff] %vm1488_vm7, %v1800_v63  ;;  %v753_v41 = vpop.f32.mrf.mxu1 }
 0x10a   :  { %v885_v25 = vld [vmem:[%s3245_s3 + $0x128] sm:$0xff]  ;;  %vm917_vm4 = vcmp.gt.f32.partialorder %v853_v24, 1.0  ;;  %v1109_v39 = vmul.f32 0.9, %v853_v24  ;;  %1589 = vst.msk [vmem:[%s3248_s4 + $0x120] sm:$0xff] %vm1488_vm7, %v1832_v0  ;;  %v621_v24 = vadd.f32 %v2286_v17, %v620_v20  ;;  %v754_v46 = vadd.f32 %v2286_v17, %v753_v41 }
 0x10b   :  { %vm949_vm5 = vcmp.gt.f32.partialorder %v885_v25, 1.0  ;;  %v1141_v40 = vmul.f32 0.9, %v885_v25  ;;  %1492 = vst.msk [vmem:[%s3247_s5 + $0x18] sm:$0xff] %vm1488_vm7, %v1235_v33  ;;  %1524 = vst.msk [vmem:[%s3247_s5 + $0x118] sm:$0xff] %vm1488_vm7, %v1267_v34  ;;  %v1737_v53 = vsel %vm917_vm4, 1.0, %v1992_v26  ;;  %v749_v25 = vadd.f32 %v2286_v17, %v748_v21  ;;  %v755_v48 = vpop.f32.mrf.mxu1 }
 0x10c   :  { %v1769_v54 = vsel %vm949_vm5, 1.0, %v1992_v26  ;;  %v1173_v59 = vadd.f32 %v1109_v39, %v613_v51  ;;  %v625_v39 = vpop.f32.mrf.mxu0 }
 0x10d   :  { %v1205_v60 = vadd.f32 %v1141_v40, %v741_v52  ;;  %v626_v45 = vadd.f32 %v2286_v17, %v625_v39 }
 0x10e   :  { %v1237_v5 = vsub.f32 %v1173_v59, %v1737_v53  ;;  %v627_v47 = vpop.f32.mrf.mxu0 }
 0x10f   :  { %v1269_v6 = vsub.f32 %v1205_v60, %v1769_v54 }
 0x110   :  { %vm1301_vm15 = vcmp.gt.f32.partialorder %v1237_v5, 1.0 }
 0x111   :  { %vm1333_vm0 = vcmp.gt.f32.partialorder %v1269_v6, 1.0  ;;  %v1801_v18 = vsel %vm1301_vm15, 1.0, %v1992_v26 }
 0x112   :  { %v854_v43 = vld [vmem:[%s3245_s3 + $0x30] sm:$0xff]  ;;  %v1833_v19 = vsel %vm1333_vm0, 1.0, %v1992_v26  ;;  %1558 = vst.msk [vmem:[%s3248_s4 + $0x28] sm:$0xff] %vm1488_vm7, %v1801_v18 }
 0x113   :  { %v886_v44 = vld [vmem:[%s3245_s3 + $0x130] sm:$0xff]  ;;  %vm918_vm9 = vcmp.gt.f32.partialorder %v854_v43, 1.0  ;;  %v1110_v57 = vmul.f32 0.9, %v854_v43  ;;  %1590 = vst.msk [vmem:[%s3248_s4 + $0x128] sm:$0xff] %vm1488_vm7, %v1833_v19 }
 0x114   :  { %vm950_vm10 = vcmp.gt.f32.partialorder %v886_v44, 1.0  ;;  %v1142_v58 = vmul.f32 0.9, %v886_v44  ;;  %1493 = vst.msk [vmem:[%s3247_s5 + $0x20] sm:$0xff] %vm1488_vm7, %v1236_v49  ;;  %1525 = vst.msk [vmem:[%s3247_s5 + $0x120] sm:$0xff] %vm1488_vm7, %v1268_v50  ;;  %v1738_v2 = vsel %vm918_vm9, 1.0, %v1992_v26 }
 0x115   :  { %v1770_v4 = vsel %vm950_vm10, 1.0, %v1992_v26  ;;  %v1174_v13 = vadd.f32 %v1110_v57, %v618_v7  ;;  %v628_v57 = vpop.f32.mrf.mxu0 }
 0x116   :  { %v1206_v14 = vadd.f32 %v1142_v58, %v746_v8  ;;  %v756_v58 = vpop.f32.mrf.mxu1 }
 0x117   :  { %v1238_v22 = vsub.f32 %v1174_v13, %v1738_v2  ;;  %v630_v1 = vpop.f32.mrf.mxu0 }
 0x118   :  { %v1270_v23 = vsub.f32 %v1206_v14, %v1770_v4  ;;  %v758_v2 = vpop.f32.mrf.mxu1 }
 0x119   :  { %vm1302_vm3 = vcmp.gt.f32.partialorder %v1238_v22, 1.0 }
 0x11a   :  { %vm1334_vm4 = vcmp.gt.f32.partialorder %v1270_v23, 1.0  ;;  %v1802_v37 = vsel %vm1302_vm3, 1.0, %v1992_v26  ;;  %v761_v13 = vpop.f32.mrf.mxu1 }
 0x11b   :  { %v855_v61 = vld [vmem:[%s3245_s3 + $0x38] sm:$0xff]  ;;  %v1834_v38 = vsel %vm1334_vm4, 1.0, %v1992_v26  ;;  %1559 = vst.msk [vmem:[%s3248_s4 + $0x30] sm:$0xff] %vm1488_vm7, %v1802_v37  ;;  %v762_v19 = vadd.f32 %v2286_v17, %v761_v13 }
 0x11c   :  { %v887_v62 = vld [vmem:[%s3245_s3 + $0x138] sm:$0xff]  ;;  %vm919_vm13 = vcmp.gt.f32.partialorder %v855_v61, 1.0  ;;  %v1111_v11 = vmul.f32 0.9, %v855_v61  ;;  %1591 = vst.msk [vmem:[%s3248_s4 + $0x130] sm:$0xff] %vm1488_vm7, %v1834_v38  ;;  %v629_v61 = vadd.f32 %v2286_v17, %v628_v57  ;;  %v763_v21 = vpop.f32.mrf.mxu1 }
 0x11d   :  { %vm951_vm14 = vcmp.gt.f32.partialorder %v887_v62, 1.0  ;;  %v1143_v12 = vmul.f32 0.9, %v887_v62  ;;  %1494 = vst.msk [vmem:[%s3247_s5 + $0x28] sm:$0xff] %vm1488_vm7, %v1237_v5  ;;  %1526 = vst.msk [vmem:[%s3247_s5 + $0x128] sm:$0xff] %vm1488_vm7, %v1269_v6  ;;  %v1739_v27 = vsel %vm919_vm13, 1.0, %v1992_v26  ;;  %v757_v62 = vadd.f32 %v2286_v17, %v756_v58 }
 0x11e   :  { %v1771_v28 = vsel %vm951_vm14, 1.0, %v1992_v26  ;;  %v1175_v33 = vadd.f32 %v1111_v11, %v621_v24  ;;  %v633_v11 = vpop.f32.mrf.mxu0 }
 0x11f   :  { %v1207_v34 = vadd.f32 %v1143_v12, %v749_v25  ;;  %v634_v18 = vadd.f32 %v2286_v17, %v633_v11 }
 0x120   :  { %v1239_v43 = vsub.f32 %v1175_v33, %v1739_v27  ;;  %v635_v20 = vpop.f32.mrf.mxu0 }
 0x121   :  { %v1271_v44 = vsub.f32 %v1207_v34, %v1771_v28 }
 0x122   :  { %vm1303_vm8 = vcmp.gt.f32.partialorder %v1239_v43, 1.0 }
 0x123   :  { %vm1335_vm9 = vcmp.gt.f32.partialorder %v1271_v44, 1.0  ;;  %v1803_v55 = vsel %vm1303_vm8, 1.0, %v1992_v26 }
 0x124   :  { %v856_v15 = vld [vmem:[%s3245_s3 + $0x40] sm:$0xff]  ;;  %v1835_v56 = vsel %vm1335_vm9, 1.0, %v1992_v26  ;;  %1560 = vst.msk [vmem:[%s3248_s4 + $0x38] sm:$0xff] %vm1488_vm7, %v1803_v55 }
 0x125   :  { %v888_v16 = vld [vmem:[%s3245_s3 + $0x140] sm:$0xff]  ;;  %vm920_vm1 = vcmp.gt.f32.partialorder %v856_v15, 1.0  ;;  %v1112_v31 = vmul.f32 0.9, %v856_v15  ;;  %1592 = vst.msk [vmem:[%s3248_s4 + $0x138] sm:$0xff] %vm1488_vm7, %v1835_v56 }
 0x126   :  { %vm952_vm2 = vcmp.gt.f32.partialorder %v888_v16, 1.0  ;;  %v1144_v32 = vmul.f32 0.9, %v888_v16  ;;  %1495 = vst.msk [vmem:[%s3247_s5 + $0x30] sm:$0xff] %vm1488_vm7, %v1238_v22  ;;  %1527 = vst.msk [vmem:[%s3247_s5 + $0x130] sm:$0xff] %vm1488_vm7, %v1270_v23  ;;  %v1740_v40 = vsel %vm920_vm1, 1.0, %v1992_v26 }
 0x127   :  { %v1772_v42 = vsel %vm952_vm2, 1.0, %v1992_v26  ;;  %v1176_v51 = vadd.f32 %v1112_v31, %v626_v45  ;;  %v636_v31 = vpop.f32.mrf.mxu0 }
 0x128   :  { %v1208_v52 = vadd.f32 %v1144_v32, %v754_v46  ;;  %v764_v32 = vpop.f32.mrf.mxu1 }
 0x129   :  { %v1240_v59 = vsub.f32 %v1176_v51, %v1740_v40  ;;  %v638_v39 = vpop.f32.mrf.mxu0 }
 0x12a   :  { %v1272_v60 = vsub.f32 %v1208_v52, %v1772_v42  ;;  %v766_v40 = vpop.f32.mrf.mxu1 }
 0x12b   :  { %vm1304_vm12 = vcmp.gt.f32.partialorder %v1240_v59, 1.0 }
 0x12c   :  { %vm1336_vm13 = vcmp.gt.f32.partialorder %v1272_v60, 1.0  ;;  %v1804_v9 = vsel %vm1304_vm12, 1.0, %v1992_v26  ;;  %v769_v51 = vpop.f32.mrf.mxu1 }
 0x12d   :  { %v857_v35 = vld [vmem:[%s3245_s3 + $0x48] sm:$0xff]  ;;  %v1836_v10 = vsel %vm1336_vm13, 1.0, %v1992_v26  ;;  %1561 = vst.msk [vmem:[%s3248_s4 + $0x40] sm:$0xff] %vm1488_vm7, %v1804_v9  ;;  %v770_v56 = vadd.f32 %v2286_v17, %v769_v51 }
 0x12e   :  { %v889_v36 = vld [vmem:[%s3245_s3 + $0x148] sm:$0xff]  ;;  %vm921_vm5 = vcmp.gt.f32.partialorder %v857_v35, 1.0  ;;  %v1113_v49 = vmul.f32 0.9, %v857_v35  ;;  %1593 = vst.msk [vmem:[%s3248_s4 + $0x140] sm:$0xff] %vm1488_vm7, %v1836_v10  ;;  %v637_v35 = vadd.f32 %v2286_v17, %v636_v31  ;;  %v771_v58 = vpop.f32.mrf.mxu1 }
 0x12f   :  { %vm953_vm6 = vcmp.gt.f32.partialorder %v889_v36, 1.0  ;;  %v1145_v50 = vmul.f32 0.9, %v889_v36  ;;  %1496 = vst.msk [vmem:[%s3247_s5 + $0x38] sm:$0xff] %vm1488_vm7, %v1239_v43  ;;  %1528 = vst.msk [vmem:[%s3247_s5 + $0x138] sm:$0xff] %vm1488_vm7, %v1271_v44  ;;  %v1741_v63 = vsel %vm921_vm5, 1.0, %v1992_v26  ;;  %v765_v36 = vadd.f32 %v2286_v17, %v764_v32 }
 0x130   :  { %v1773_v0 = vsel %vm953_vm6, 1.0, %v1992_v26  ;;  %v1177_v5 = vadd.f32 %v1113_v49, %v629_v61  ;;  %v641_v49 = vpop.f32.mrf.mxu0 }
 0x131   :  { %v1209_v6 = vadd.f32 %v1145_v50, %v757_v62  ;;  %v642_v55 = vadd.f32 %v2286_v17, %v641_v49 }
 0x132   :  { %v1241_v15 = vsub.f32 %v1177_v5, %v1741_v63  ;;  %v643_v57 = vpop.f32.mrf.mxu0 }
 0x133   :  { %v1273_v16 = vsub.f32 %v1209_v6, %v1773_v0 }
 0x134   :  { %vm1305_vm0 = vcmp.gt.f32.partialorder %v1241_v15, 1.0 }
 0x135   :  { %vm1337_vm1 = vcmp.gt.f32.partialorder %v1273_v16, 1.0  ;;  %v1805_v29 = vsel %vm1305_vm0, 1.0, %v1992_v26 }
 0x136   :  { %v858_v53 = vld [vmem:[%s3245_s3 + $0x50] sm:$0xff]  ;;  %v1837_v30 = vsel %vm1337_vm1, 1.0, %v1992_v26  ;;  %1562 = vst.msk [vmem:[%s3248_s4 + $0x48] sm:$0xff] %vm1488_vm7, %v1805_v29 }
 0x137   :  { %v890_v54 = vld [vmem:[%s3245_s3 + $0x150] sm:$0xff]  ;;  %vm922_vm10 = vcmp.gt.f32.partialorder %v858_v53, 1.0  ;;  %v1114_v3 = vmul.f32 0.9, %v858_v53  ;;  %1594 = vst.msk [vmem:[%s3248_s4 + $0x148] sm:$0xff] %vm1488_vm7, %v1837_v30 }
 0x138   :  { %vm954_vm11 = vcmp.gt.f32.partialorder %v890_v54, 1.0  ;;  %v1146_v4 = vmul.f32 0.9, %v890_v54  ;;  %1497 = vst.msk [vmem:[%s3247_s5 + $0x40] sm:$0xff] %vm1488_vm7, %v1240_v59  ;;  %1529 = vst.msk [vmem:[%s3247_s5 + $0x140] sm:$0xff] %vm1488_vm7, %v1272_v60  ;;  %v1742_v12 = vsel %vm922_vm10, 1.0, %v1992_v26 }
 0x139   :  { %v1774_v14 = vsel %vm954_vm11, 1.0, %v1992_v26  ;;  %v1178_v24 = vadd.f32 %v1114_v3, %v634_v18  ;;  %v644_v3 = vpop.f32.mrf.mxu0 }
 0x13a   :  { %v1210_v25 = vadd.f32 %v1146_v4, %v762_v19  ;;  %v772_v4 = vpop.f32.mrf.mxu1 }
 0x13b   :  { %v1242_v33 = vsub.f32 %v1178_v24, %v1742_v12  ;;  %v646_v11 = vpop.f32.mrf.mxu0 }
 0x13c   :  { %v1274_v34 = vsub.f32 %v1210_v25, %v1774_v14  ;;  %v774_v12 = vpop.f32.mrf.mxu1 }
 0x13d   :  { %vm1306_vm4 = vcmp.gt.f32.partialorder %v1242_v33, 1.0 }
 0x13e   :  { %vm1338_vm5 = vcmp.gt.f32.partialorder %v1274_v34, 1.0  ;;  %v1806_v47 = vsel %vm1306_vm4, 1.0, %v1992_v26  ;;  %v777_v24 = vpop.f32.mrf.mxu1 }
 0x13f   :  { %v859_v7 = vld [vmem:[%s3245_s3 + $0x58] sm:$0xff]  ;;  %v1838_v48 = vsel %vm1338_vm5, 1.0, %v1992_v26  ;;  %1563 = vst.msk [vmem:[%s3248_s4 + $0x50] sm:$0xff] %vm1488_vm7, %v1806_v47  ;;  %v778_v30 = vadd.f32 %v2286_v17, %v777_v24 }
 0x140   :  { %v891_v8 = vld [vmem:[%s3245_s3 + $0x158] sm:$0xff]  ;;  %vm923_vm14 = vcmp.gt.f32.partialorder %v859_v7, 1.0  ;;  %v1115_v22 = vmul.f32 0.9, %v859_v7  ;;  %1595 = vst.msk [vmem:[%s3248_s4 + $0x150] sm:$0xff] %vm1488_vm7, %v1838_v48  ;;  %v645_v7 = vadd.f32 %v2286_v17, %v644_v3  ;;  %v779_v32 = vpop.f32.mrf.mxu1 }
 0x141   :  { %vm955_vm15 = vcmp.gt.f32.partialorder %v891_v8, 1.0  ;;  %v1147_v23 = vmul.f32 0.9, %v891_v8  ;;  %1498 = vst.msk [vmem:[%s3247_s5 + $0x48] sm:$0xff] %vm1488_vm7, %v1241_v15  ;;  %1530 = vst.msk [vmem:[%s3247_s5 + $0x148] sm:$0xff] %vm1488_vm7, %v1273_v16  ;;  %v1743_v37 = vsel %vm923_vm14, 1.0, %v1992_v26  ;;  %v773_v8 = vadd.f32 %v2286_v17, %v772_v4 }
 0x142   :  { %v1775_v38 = vsel %vm955_vm15, 1.0, %v1992_v26  ;;  %v1179_v43 = vadd.f32 %v1115_v22, %v637_v35  ;;  %v649_v22 = vpop.f32.mrf.mxu0 }
 0x143   :  { %v1211_v44 = vadd.f32 %v1147_v23, %v765_v36  ;;  %v650_v29 = vadd.f32 %v2286_v17, %v649_v22 }
 0x144   :  { %v1243_v53 = vsub.f32 %v1179_v43, %v1743_v37  ;;  %v651_v31 = vpop.f32.mrf.mxu0 }
 0x145   :  { %v1275_v54 = vsub.f32 %v1211_v44, %v1775_v38 }
 0x146   :  { %vm1307_vm9 = vcmp.gt.f32.partialorder %v1243_v53, 1.0 }
 0x147   :  { %vm1339_vm10 = vcmp.gt.f32.partialorder %v1275_v54, 1.0  ;;  %v1807_v1 = vsel %vm1307_vm9, 1.0, %v1992_v26 }
 0x148   :  { %v860_v27 = vld [vmem:[%s3245_s3 + $0x60] sm:$0xff]  ;;  %v1839_v2 = vsel %vm1339_vm10, 1.0, %v1992_v26  ;;  %1564 = vst.msk [vmem:[%s3248_s4 + $0x58] sm:$0xff] %vm1488_vm7, %v1807_v1 }
 0x149   :  { %v892_v28 = vld [vmem:[%s3245_s3 + $0x160] sm:$0xff]  ;;  %vm924_vm2 = vcmp.gt.f32.partialorder %v860_v27, 1.0  ;;  %v1116_v41 = vmul.f32 0.9, %v860_v27  ;;  %1596 = vst.msk [vmem:[%s3248_s4 + $0x158] sm:$0xff] %vm1488_vm7, %v1839_v2 }
 0x14a   :  { %vm956_vm3 = vcmp.gt.f32.partialorder %v892_v28, 1.0  ;;  %v1148_v42 = vmul.f32 0.9, %v892_v28  ;;  %1499 = vst.msk [vmem:[%s3247_s5 + $0x50] sm:$0xff] %vm1488_vm7, %v1242_v33  ;;  %1531 = vst.msk [vmem:[%s3247_s5 + $0x150] sm:$0xff] %vm1488_vm7, %v1274_v34  ;;  %v1744_v50 = vsel %vm924_vm2, 1.0, %v1992_v26 }
 0x14b   :  { %v1776_v52 = vsel %vm956_vm3, 1.0, %v1992_v26  ;;  %v1180_v61 = vadd.f32 %v1116_v41, %v642_v55  ;;  %v652_v41 = vpop.f32.mrf.mxu0 }
 0x14c   :  { %v1212_v62 = vadd.f32 %v1148_v42, %v770_v56  ;;  %v780_v42 = vpop.f32.mrf.mxu1 }
 0x14d   :  { %v1244_v5 = vsub.f32 %v1180_v61, %v1744_v50  ;;  %v654_v49 = vpop.f32.mrf.mxu0 }
 0x14e   :  { %v1276_v6 = vsub.f32 %v1212_v62, %v1776_v52  ;;  %v782_v50 = vpop.f32.mrf.mxu1 }
 0x14f   :  { %vm1308_vm13 = vcmp.gt.f32.partialorder %v1244_v5, 1.0 }
 0x150   :  { %vm1340_vm14 = vcmp.gt.f32.partialorder %v1276_v6, 1.0  ;;  %v1808_v20 = vsel %vm1308_vm13, 1.0, %v1992_v26  ;;  %v785_v61 = vpop.f32.mrf.mxu1 }
 0x151   :  { %v861_v45 = vld [vmem:[%s3245_s3 + $0x68] sm:$0xff]  ;;  %v1840_v21 = vsel %vm1340_vm14, 1.0, %v1992_v26  ;;  %1565 = vst.msk [vmem:[%s3248_s4 + $0x60] sm:$0xff] %vm1488_vm7, %v1808_v20  ;;  %v786_v2 = vadd.f32 %v2286_v17, %v785_v61 }
 0x152   :  { %v893_v46 = vld [vmem:[%s3245_s3 + $0x168] sm:$0xff]  ;;  %vm925_vm6 = vcmp.gt.f32.partialorder %v861_v45, 1.0  ;;  %v1117_v59 = vmul.f32 0.9, %v861_v45  ;;  %1597 = vst.msk [vmem:[%s3248_s4 + $0x160] sm:$0xff] %vm1488_vm7, %v1840_v21  ;;  %v653_v45 = vadd.f32 %v2286_v17, %v652_v41  ;;  %v787_v4 = vpop.f32.mrf.mxu1 }
 0x153   :  { %vm957_vm8 = vcmp.gt.f32.partialorder %v893_v46, 1.0  ;;  %v1149_v60 = vmul.f32 0.9, %v893_v46  ;;  %1500 = vst.msk [vmem:[%s3247_s5 + $0x58] sm:$0xff] %vm1488_vm7, %v1243_v53  ;;  %1532 = vst.msk [vmem:[%s3247_s5 + $0x158] sm:$0xff] %vm1488_vm7, %v1275_v54  ;;  %v1745_v9 = vsel %vm925_vm6, 1.0, %v1992_v26  ;;  %v781_v46 = vadd.f32 %v2286_v17, %v780_v42 }
 0x154   :  { %v1777_v10 = vsel %vm957_vm8, 1.0, %v1992_v26  ;;  %v1181_v15 = vadd.f32 %v1117_v59, %v645_v7  ;;  %v657_v59 = vpop.f32.mrf.mxu0 }
 0x155   :  { %v1213_v16 = vadd.f32 %v1149_v60, %v773_v8  ;;  %v658_v1 = vadd.f32 %v2286_v17, %v657_v59 }
 0x156   :  { %v1245_v27 = vsub.f32 %v1181_v15, %v1745_v9  ;;  %v659_v3 = vpop.f32.mrf.mxu0 }
 0x157   :  { %v1277_v28 = vsub.f32 %v1213_v16, %v1777_v10 }
 0x158   :  { %vm1309_vm1 = vcmp.gt.f32.partialorder %v1245_v27, 1.0 }
 0x159   :  { %vm1341_vm2 = vcmp.gt.f32.partialorder %v1277_v28, 1.0  ;;  %v1809_v39 = vsel %vm1309_vm1, 1.0, %v1992_v26 }
 0x15a   :  { %v862_v63 = vld [vmem:[%s3245_s3 + $0x70] sm:$0xff]  ;;  %v1841_v40 = vsel %vm1341_vm2, 1.0, %v1992_v26  ;;  %1566 = vst.msk [vmem:[%s3248_s4 + $0x68] sm:$0xff] %vm1488_vm7, %v1809_v39 }
 0x15b   :  { %v894_v0 = vld [vmem:[%s3245_s3 + $0x170] sm:$0xff]  ;;  %vm926_vm11 = vcmp.gt.f32.partialorder %v862_v63, 1.0  ;;  %v1118_v13 = vmul.f32 0.9, %v862_v63  ;;  %1598 = vst.msk [vmem:[%s3248_s4 + $0x168] sm:$0xff] %vm1488_vm7, %v1841_v40 }
 0x15c   :  { %vm958_vm12 = vcmp.gt.f32.partialorder %v894_v0, 1.0  ;;  %v1150_v14 = vmul.f32 0.9, %v894_v0  ;;  %1501 = vst.msk [vmem:[%s3247_s5 + $0x60] sm:$0xff] %vm1488_vm7, %v1244_v5  ;;  %1533 = vst.msk [vmem:[%s3247_s5 + $0x160] sm:$0xff] %vm1488_vm7, %v1276_v6  ;;  %v1746_v23 = vsel %vm926_vm11, 1.0, %v1992_v26 }
 0x15d   :  { %v1778_v25 = vsel %vm958_vm12, 1.0, %v1992_v26  ;;  %v1182_v35 = vadd.f32 %v1118_v13, %v650_v29  ;;  %v660_v13 = vpop.f32.mrf.mxu0 }
 0x15e   :  { %v1214_v36 = vadd.f32 %v1150_v14, %v778_v30  ;;  %v788_v14 = vpop.f32.mrf.mxu1 }
 0x15f   :  { %v1246_v43 = vsub.f32 %v1182_v35, %v1746_v23  ;;  %v662_v22 = vpop.f32.mrf.mxu0 }
 0x160   :  { %v1278_v44 = vsub.f32 %v1214_v36, %v1778_v25  ;;  %v790_v23 = vpop.f32.mrf.mxu1 }
 0x161   :  { %vm1310_vm5 = vcmp.gt.f32.partialorder %v1246_v43, 1.0 }
 0x162   :  { %vm1342_vm6 = vcmp.gt.f32.partialorder %v1278_v44, 1.0  ;;  %v1810_v57 = vsel %vm1310_vm5, 1.0, %v1992_v26  ;;  %v793_v35 = vpop.f32.mrf.mxu1 }
 0x163   :  { %v863_v18 = vld [vmem:[%s3245_s3 + $0x78] sm:$0xff]  ;;  %v1842_v58 = vsel %vm1342_vm6, 1.0, %v1992_v26  ;;  %1567 = vst.msk [vmem:[%s3248_s4 + $0x70] sm:$0xff] %vm1488_vm7, %v1810_v57  ;;  %v794_v40 = vadd.f32 %v2286_v17, %v793_v35 }
 0x164   :  { %v895_v19 = vld [vmem:[%s3245_s3 + $0x178] sm:$0xff]  ;;  %vm927_vm15 = vcmp.gt.f32.partialorder %v863_v18, 1.0  ;;  %v1119_v33 = vmul.f32 0.9, %v863_v18  ;;  %1599 = vst.msk [vmem:[%s3248_s4 + $0x170] sm:$0xff] %vm1488_vm7, %v1842_v58  ;;  %v661_v18 = vadd.f32 %v2286_v17, %v660_v13  ;;  %v795_v42 = vpop.f32.mrf.mxu1 }
 0x165   :  { %vm959_vm0 = vcmp.gt.f32.partialorder %v895_v19, 1.0  ;;  %v1151_v34 = vmul.f32 0.9, %v895_v19  ;;  %1502 = vst.msk [vmem:[%s3247_s5 + $0x68] sm:$0xff] %vm1488_vm7, %v1245_v27  ;;  %1534 = vst.msk [vmem:[%s3247_s5 + $0x168] sm:$0xff] %vm1488_vm7, %v1277_v28  ;;  %v1747_v47 = vsel %vm927_vm15, 1.0, %v1992_v26  ;;  %v789_v19 = vadd.f32 %v2286_v17, %v788_v14 }
 0x166   :  { %v1779_v48 = vsel %vm959_vm0, 1.0, %v1992_v26  ;;  %v1183_v53 = vadd.f32 %v1119_v33, %v653_v45  ;;  %v665_v33 = vpop.f32.mrf.mxu0 }
 0x167   :  { %v1215_v54 = vadd.f32 %v1151_v34, %v781_v46  ;;  %v666_v39 = vadd.f32 %v2286_v17, %v665_v33 }
 0x168   :  { %v1247_v63 = vsub.f32 %v1183_v53, %v1747_v47  ;;  %v667_v41 = vpop.f32.mrf.mxu0 }
 0x169   :  { %v1279_v0 = vsub.f32 %v1215_v54, %v1779_v48 }
 0x16a   :  { %vm1311_vm10 = vcmp.gt.f32.partialorder %v1247_v63, 1.0 }
 0x16b   :  { %vm1343_vm11 = vcmp.gt.f32.partialorder %v1279_v0, 1.0  ;;  %v1811_v11 = vsel %vm1311_vm10, 1.0, %v1992_v26 }
 0x16c   :  { %v864_v37 = vld [vmem:[%s3245_s3 + $0x80] sm:$0xff]  ;;  %v1843_v12 = vsel %vm1343_vm11, 1.0, %v1992_v26  ;;  %1568 = vst.msk [vmem:[%s3248_s4 + $0x78] sm:$0xff] %vm1488_vm7, %v1811_v11 }
 0x16d   :  { %v896_v38 = vld [vmem:[%s3245_s3 + $0x180] sm:$0xff]  ;;  %vm928_vm3 = vcmp.gt.f32.partialorder %v864_v37, 1.0  ;;  %v1120_v51 = vmul.f32 0.9, %v864_v37  ;;  %1600 = vst.msk [vmem:[%s3248_s4 + $0x178] sm:$0xff] %vm1488_vm7, %v1843_v12 }
 0x16e   :  { %vm960_vm4 = vcmp.gt.f32.partialorder %v896_v38, 1.0  ;;  %v1152_v52 = vmul.f32 0.9, %v896_v38  ;;  %1503 = vst.msk [vmem:[%s3247_s5 + $0x70] sm:$0xff] %vm1488_vm7, %v1246_v43  ;;  %1535 = vst.msk [vmem:[%s3247_s5 + $0x170] sm:$0xff] %vm1488_vm7, %v1278_v44  ;;  %v1748_v60 = vsel %vm928_vm3, 1.0, %v1992_v26 }
 0x16f   :  { %v1780_v62 = vsel %vm960_vm4, 1.0, %v1992_v26  ;;  %v1184_v7 = vadd.f32 %v1120_v51, %v658_v1  ;;  %v668_v51 = vpop.f32.mrf.mxu0 }
 0x170   :  { %v1216_v8 = vadd.f32 %v1152_v52, %v786_v2  ;;  %v796_v52 = vpop.f32.mrf.mxu1 }
 0x171   :  { %v1248_v15 = vsub.f32 %v1184_v7, %v1748_v60  ;;  %v670_v59 = vpop.f32.mrf.mxu0 }
 0x172   :  { %v1280_v16 = vsub.f32 %v1216_v8, %v1780_v62  ;;  %v798_v60 = vpop.f32.mrf.mxu1 }
 0x173   :  { %vm1312_vm14 = vcmp.gt.f32.partialorder %v1248_v15, 1.0  ;;  %v673_v4 = vpop.f32.mrf.mxu0 }
 0x174   :  { %vm1344_vm15 = vcmp.gt.f32.partialorder %v1280_v16, 1.0  ;;  %v1812_v31 = vsel %vm1312_vm14, 1.0, %v1992_v26 }
 0x175   :  { %v865_v55 = vld [vmem:[%s3245_s3 + $0x88] sm:$0xff]  ;;  %v1844_v32 = vsel %vm1344_vm15, 1.0, %v1992_v26  ;;  %1569 = vst.msk [vmem:[%s3248_s4 + $0x80] sm:$0xff] %vm1488_vm7, %v1812_v31  ;;  %v675_v13 = vpop.f32.mrf.mxu0 }
 0x176   :  { %v897_v56 = vld [vmem:[%s3245_s3 + $0x188] sm:$0xff]  ;;  %vm929_vm8 = vcmp.gt.f32.partialorder %v865_v55, 1.0  ;;  %v1121_v5 = vmul.f32 0.9, %v865_v55  ;;  %1601 = vst.msk [vmem:[%s3248_s4 + $0x180] sm:$0xff] %vm1488_vm7, %v1844_v32  ;;  %v669_v55 = vadd.f32 %v2286_v17, %v668_v51 }
 0x177   :  { %vm961_vm9 = vcmp.gt.f32.partialorder %v897_v56, 1.0  ;;  %v1153_v6 = vmul.f32 0.9, %v897_v56  ;;  %1504 = vst.msk [vmem:[%s3247_s5 + $0x78] sm:$0xff] %vm1488_vm7, %v1247_v63  ;;  %1536 = vst.msk [vmem:[%s3247_s5 + $0x178] sm:$0xff] %vm1488_vm7, %v1279_v0  ;;  %v1749_v20 = vsel %vm929_vm8, 1.0, %v1992_v26  ;;  %v797_v56 = vadd.f32 %v2286_v17, %v796_v52 }
 0x178   :  { %v1781_v21 = vsel %vm961_vm9, 1.0, %v1992_v26  ;;  %v1185_v27 = vadd.f32 %v1121_v5, %v661_v18 }
 0x179   :  { %v1217_v28 = vadd.f32 %v1153_v6, %v789_v19  ;;  %v801_v6 = vpop.f32.mrf.mxu1 }
 0x17a   :  { %v1249_v37 = vsub.f32 %v1185_v27, %v1749_v20 }
 0x17b   :  { %v1281_v38 = vsub.f32 %v1217_v28, %v1781_v21  ;;  %v803_v14 = vpop.f32.mrf.mxu1 }
 0x17c   :  { %vm1313_vm2 = vcmp.gt.f32.partialorder %v1249_v37, 1.0 }
 0x17d   :  { %vm1345_vm3 = vcmp.gt.f32.partialorder %v1281_v38, 1.0  ;;  %v1813_v49 = vsel %vm1313_vm2, 1.0, %v1992_v26 }
 0x17e   :  { %v866_v9 = vld [vmem:[%s3245_s3 + $0x90] sm:$0xff]  ;;  %v1845_v50 = vsel %vm1345_vm3, 1.0, %v1992_v26  ;;  %1570 = vst.msk [vmem:[%s3248_s4 + $0x88] sm:$0xff] %vm1488_vm7, %v1813_v49 }
 0x17f   :  { %v898_v10 = vld [vmem:[%s3245_s3 + $0x190] sm:$0xff]  ;;  %vm930_vm12 = vcmp.gt.f32.partialorder %v866_v9, 1.0  ;;  %v1122_v24 = vmul.f32 0.9, %v866_v9  ;;  %1602 = vst.msk [vmem:[%s3248_s4 + $0x188] sm:$0xff] %vm1488_vm7, %v1845_v50 }
 0x180   :  { %vm962_vm13 = vcmp.gt.f32.partialorder %v898_v10, 1.0  ;;  %v1154_v25 = vmul.f32 0.9, %v898_v10  ;;  %1505 = vst.msk [vmem:[%s3247_s5 + $0x80] sm:$0xff] %vm1488_vm7, %v1248_v15  ;;  %1537 = vst.msk [vmem:[%s3247_s5 + $0x180] sm:$0xff] %vm1488_vm7, %v1280_v16  ;;  %v1750_v34 = vsel %vm930_vm12, 1.0, %v1992_v26 }
 0x181   :  { %v1782_v36 = vsel %vm962_vm13, 1.0, %v1992_v26  ;;  %v1186_v45 = vadd.f32 %v1122_v24, %v666_v39  ;;  %v2879_v10 = vld [vmem:[%s3246_s2] ss:$0 sm:$0xff]  ;;  %v676_v24 = vpop.f32.mrf.mxu0 }
 0x182   :  { %v1218_v46 = vadd.f32 %v1154_v25, %v794_v40  ;;  %v674_v11 = vadd.f32 %v2879_v10, %v673_v4  ;;  %v802_v12 = vadd.f32 %v2879_v10, %v801_v6  ;;  %v804_v25 = vpop.f32.mrf.mxu1 }
 0x183   :  { %v1250_v53 = vsub.f32 %v1186_v45, %v1750_v34  ;;  %v678_v33 = vpop.f32.mrf.mxu0 }
 0x184   :  { %v1282_v54 = vsub.f32 %v1218_v46, %v1782_v36  ;;  %v806_v34 = vpop.f32.mrf.mxu1 }
 0x185   :  { %vm1314_vm6 = vcmp.gt.f32.partialorder %v1250_v53, 1.0 }
 0x186   :  { %vm1346_vm8 = vcmp.gt.f32.partialorder %v1282_v54, 1.0  ;;  %v1814_v2 = vsel %vm1314_vm6, 1.0, %v1992_v26  ;;  %v809_v45 = vpop.f32.mrf.mxu1 }
 0x187   :  { %v867_v29 = vld [vmem:[%s3245_s3 + $0x98] sm:$0xff]  ;;  %v1846_v3 = vsel %vm1346_vm8, 1.0, %v1992_v26  ;;  %1571 = vst.msk [vmem:[%s3248_s4 + $0x90] sm:$0xff] %vm1488_vm7, %v1814_v2  ;;  %v810_v50 = vadd.f32 %v2879_v10, %v809_v45 }
 0x188   :  { %v899_v30 = vld [vmem:[%s3245_s3 + $0x198] sm:$0xff]  ;;  %vm931_vm0 = vcmp.gt.f32.partialorder %v867_v29, 1.0  ;;  %v1123_v43 = vmul.f32 0.9, %v867_v29  ;;  %1603 = vst.msk [vmem:[%s3248_s4 + $0x190] sm:$0xff] %vm1488_vm7, %v1846_v3  ;;  %v677_v29 = vadd.f32 %v2879_v10, %v676_v24  ;;  %v811_v52 = vpop.f32.mrf.mxu1 }
 0x189   :  { %vm963_vm1 = vcmp.gt.f32.partialorder %v899_v30, 1.0  ;;  %v1155_v44 = vmul.f32 0.9, %v899_v30  ;;  %1506 = vst.msk [vmem:[%s3247_s5 + $0x88] sm:$0xff] %vm1488_vm7, %v1249_v37  ;;  %1538 = vst.msk [vmem:[%s3247_s5 + $0x188] sm:$0xff] %vm1488_vm7, %v1281_v38  ;;  %v1751_v57 = vsel %vm931_vm0, 1.0, %v1992_v26  ;;  %v805_v30 = vadd.f32 %v2879_v10, %v804_v25 }
 0x18a   :  { %v1783_v58 = vsel %vm963_vm1, 1.0, %v1992_v26  ;;  %v1187_v17 = vadd.f32 %v1123_v43, %v669_v55  ;;  %v681_v43 = vpop.f32.mrf.mxu0 }
 0x18b   :  { %v1219_v63 = vadd.f32 %v1155_v44, %v797_v56  ;;  %v682_v49 = vadd.f32 %v2879_v10, %v681_v43 }
 0x18c   :  { %v1251_v8 = vsub.f32 %v1187_v17, %v1751_v57  ;;  %v683_v51 = vpop.f32.mrf.mxu0 }
 0x18d   :  { %v1283_v9 = vsub.f32 %v1219_v63, %v1783_v58 }
 0x18e   :  { %vm1315_vm11 = vcmp.gt.f32.partialorder %v1251_v8, 1.0 }
 0x18f   :  { %vm1347_vm12 = vcmp.gt.f32.partialorder %v1283_v9, 1.0  ;;  %v1815_v22 = vsel %vm1315_vm11, 1.0, %v1992_v26 }
 0x190   :  { %v868_v47 = vld [vmem:[%s3245_s3 + $0xa0] sm:$0xff]  ;;  %v1847_v23 = vsel %vm1347_vm12, 1.0, %v1992_v26  ;;  %1572 = vst.msk [vmem:[%s3248_s4 + $0x98] sm:$0xff] %vm1488_vm7, %v1815_v22 }
 0x191   :  { %v900_v48 = vld [vmem:[%s3245_s3 + $0x1a0] sm:$0xff]  ;;  %vm932_vm4 = vcmp.gt.f32.partialorder %v868_v47, 1.0  ;;  %v1124_v61 = vmul.f32 0.9, %v868_v47  ;;  %1604 = vst.msk [vmem:[%s3248_s4 + $0x198] sm:$0xff] %vm1488_vm7, %v1847_v23 }
 0x192   :  { %vm964_vm5 = vcmp.gt.f32.partialorder %v900_v48, 1.0  ;;  %v1156_v62 = vmul.f32 0.9, %v900_v48  ;;  %1507 = vst.msk [vmem:[%s3247_s5 + $0x90] sm:$0xff] %vm1488_vm7, %v1250_v53  ;;  %1539 = vst.msk [vmem:[%s3247_s5 + $0x190] sm:$0xff] %vm1488_vm7, %v1282_v54  ;;  %v1752_v5 = vsel %vm932_vm4, 1.0, %v1992_v26 }
 0x193   :  { %v1784_v7 = vsel %vm964_vm5, 1.0, %v1992_v26  ;;  %v1188_v18 = vadd.f32 %v1124_v61, %v674_v11  ;;  %v684_v61 = vpop.f32.mrf.mxu0 }
 0x194   :  { %v1220_v19 = vadd.f32 %v1156_v62, %v802_v12  ;;  %v812_v62 = vpop.f32.mrf.mxu1 }
 0x195   :  { %v1252_v27 = vsub.f32 %v1188_v18, %v1752_v5  ;;  %v686_v4 = vpop.f32.mrf.mxu0 }
 0x196   :  { %v1284_v28 = vsub.f32 %v1220_v19, %v1784_v7  ;;  %v814_v5 = vpop.f32.mrf.mxu1 }
 0x197   :  { %vm1316_vm15 = vcmp.gt.f32.partialorder %v1252_v27, 1.0 }
 0x198   :  { %vm1348_vm0 = vcmp.gt.f32.partialorder %v1284_v28, 1.0  ;;  %v1816_v41 = vsel %vm1316_vm15, 1.0, %v1992_v26  ;;  %v817_v18 = vpop.f32.mrf.mxu1 }
 0x199   :  { %v869_v0 = vld [vmem:[%s3245_s3 + $0xa8] sm:$0xff]  ;;  %v1848_v42 = vsel %vm1348_vm0, 1.0, %v1992_v26  ;;  %1573 = vst.msk [vmem:[%s3248_s4 + $0xa0] sm:$0xff] %vm1488_vm7, %v1816_v41  ;;  %v818_v23 = vadd.f32 %v2879_v10, %v817_v18 }
 0x19a   :  { %v901_v1 = vld [vmem:[%s3245_s3 + $0x1a8] sm:$0xff]  ;;  %vm933_vm9 = vcmp.gt.f32.partialorder %v869_v0, 1.0  ;;  %v1125_v15 = vmul.f32 0.9, %v869_v0  ;;  %1605 = vst.msk [vmem:[%s3248_s4 + $0x1a0] sm:$0xff] %vm1488_vm7, %v1848_v42  ;;  %v685_v0 = vadd.f32 %v2879_v10, %v684_v61  ;;  %v819_v25 = vpop.f32.mrf.mxu1 }
 0x19b   :  { %vm965_vm10 = vcmp.gt.f32.partialorder %v901_v1, 1.0  ;;  %v1157_v16 = vmul.f32 0.9, %v901_v1  ;;  %1508 = vst.msk [vmem:[%s3247_s5 + $0x98] sm:$0xff] %vm1488_vm7, %v1251_v8  ;;  %1540 = vst.msk [vmem:[%s3247_s5 + $0x198] sm:$0xff] %vm1488_vm7, %v1283_v9  ;;  %v1753_v31 = vsel %vm933_vm9, 1.0, %v1992_v26  ;;  %v813_v1 = vadd.f32 %v2879_v10, %v812_v62 }
 0x19c   :  { %v1785_v32 = vsel %vm965_vm10, 1.0, %v1992_v26  ;;  %v1189_v37 = vadd.f32 %v1125_v15, %v677_v29  ;;  %v689_v15 = vpop.f32.mrf.mxu0 }
 0x19d   :  { %v1221_v38 = vadd.f32 %v1157_v16, %v805_v30  ;;  %v690_v22 = vadd.f32 %v2879_v10, %v689_v15 }
 0x19e   :  { %v1253_v47 = vsub.f32 %v1189_v37, %v1753_v31  ;;  %v691_v24 = vpop.f32.mrf.mxu0 }
 0x19f   :  { %v1285_v48 = vsub.f32 %v1221_v38, %v1785_v32 }
 0x1a0   :  { %vm1317_vm3 = vcmp.gt.f32.partialorder %v1253_v47, 1.0 }
 0x1a1   :  { %vm1349_vm4 = vcmp.gt.f32.partialorder %v1285_v48, 1.0  ;;  %v1817_v59 = vsel %vm1317_vm3, 1.0, %v1992_v26 }
 0x1a2   :  { %v870_v20 = vld [vmem:[%s3245_s3 + $0xb0] sm:$0xff]  ;;  %v1849_v60 = vsel %vm1349_vm4, 1.0, %v1992_v26  ;;  %1574 = vst.msk [vmem:[%s3248_s4 + $0xa8] sm:$0xff] %vm1488_vm7, %v1817_v59 }
 0x1a3   :  { %v902_v21 = vld [vmem:[%s3245_s3 + $0x1b0] sm:$0xff]  ;;  %vm934_vm13 = vcmp.gt.f32.partialorder %v870_v20, 1.0  ;;  %v1126_v35 = vmul.f32 0.9, %v870_v20  ;;  %1606 = vst.msk [vmem:[%s3248_s4 + $0x1a8] sm:$0xff] %vm1488_vm7, %v1849_v60 }
 0x1a4   :  { %vm966_vm14 = vcmp.gt.f32.partialorder %v902_v21, 1.0  ;;  %v1158_v36 = vmul.f32 0.9, %v902_v21  ;;  %1509 = vst.msk [vmem:[%s3247_s5 + $0xa0] sm:$0xff] %vm1488_vm7, %v1252_v27  ;;  %1541 = vst.msk [vmem:[%s3247_s5 + $0x1a0] sm:$0xff] %vm1488_vm7, %v1284_v28  ;;  %v1754_v44 = vsel %vm934_vm13, 1.0, %v1992_v26 }
 0x1a5   :  { %v1786_v46 = vsel %vm966_vm14, 1.0, %v1992_v26  ;;  %v1190_v55 = vadd.f32 %v1126_v35, %v682_v49  ;;  %v692_v35 = vpop.f32.mrf.mxu0 }
 0x1a6   :  { %v1222_v56 = vadd.f32 %v1158_v36, %v810_v50  ;;  %v820_v36 = vpop.f32.mrf.mxu1 }
 0x1a7   :  { %v1254_v17 = vsub.f32 %v1190_v55, %v1754_v44  ;;  %v694_v43 = vpop.f32.mrf.mxu0 }
 0x1a8   :  { %v1286_v63 = vsub.f32 %v1222_v56, %v1786_v46  ;;  %v822_v44 = vpop.f32.mrf.mxu1 }
 0x1a9   :  { %vm1318_vm8 = vcmp.gt.f32.partialorder %v1254_v17, 1.0 }
 0x1aa   :  { %vm1350_vm9 = vcmp.gt.f32.partialorder %v1286_v63, 1.0  ;;  %v1818_v13 = vsel %vm1318_vm8, 1.0, %v1992_v26  ;;  %v825_v55 = vpop.f32.mrf.mxu1 }
 0x1ab   :  { %v871_v39 = vld [vmem:[%s3245_s3 + $0xb8] sm:$0xff]  ;;  %v1850_v14 = vsel %vm1350_vm9, 1.0, %v1992_v26  ;;  %1575 = vst.msk [vmem:[%s3248_s4 + $0xb0] sm:$0xff] %vm1488_vm7, %v1818_v13  ;;  %v826_v60 = vadd.f32 %v2879_v10, %v825_v55 }
 0x1ac   :  { %v903_v40 = vld [vmem:[%s3245_s3 + $0x1b8] sm:$0xff]  ;;  %vm935_vm1 = vcmp.gt.f32.partialorder %v871_v39, 1.0  ;;  %v1127_v53 = vmul.f32 0.9, %v871_v39  ;;  %1607 = vst.msk [vmem:[%s3248_s4 + $0x1b0] sm:$0xff] %vm1488_vm7, %v1850_v14  ;;  %v693_v39 = vadd.f32 %v2879_v10, %v692_v35  ;;  %v827_v62 = vpop.f32.mrf.mxu1 }
 0x1ad   :  { %vm967_vm2 = vcmp.gt.f32.partialorder %v903_v40, 1.0  ;;  %v1159_v54 = vmul.f32 0.9, %v903_v40  ;;  %1510 = vst.msk [vmem:[%s3247_s5 + $0xa8] sm:$0xff] %vm1488_vm7, %v1253_v47  ;;  %1542 = vst.msk [vmem:[%s3247_s5 + $0x1a8] sm:$0xff] %vm1488_vm7, %v1285_v48  ;;  %v1755_v2 = vsel %vm935_vm1, 1.0, %v1992_v26  ;;  %v821_v40 = vadd.f32 %v2879_v10, %v820_v36 }
 0x1ae   :  { %v1787_v3 = vsel %vm967_vm2, 1.0, %v1992_v26  ;;  %v1191_v8 = vadd.f32 %v1127_v53, %v685_v0  ;;  %v697_v53 = vpop.f32.mrf.mxu0 }
 0x1af   :  { %v1223_v9 = vadd.f32 %v1159_v54, %v813_v1  ;;  %v698_v59 = vadd.f32 %v2879_v10, %v697_v53 }
 0x1b0   :  { %v1255_v20 = vsub.f32 %v1191_v8, %v1755_v2  ;;  %v699_v61 = vpop.f32.mrf.mxu0 }
 0x1b1   :  { %v1287_v21 = vsub.f32 %v1223_v9, %v1787_v3 }
 0x1b2   :  { %vm1319_vm12 = vcmp.gt.f32.partialorder %v1255_v20, 1.0 }
 0x1b3   :  { %vm1351_vm13 = vcmp.gt.f32.partialorder %v1287_v21, 1.0  ;;  %v1819_v33 = vsel %vm1319_vm12, 1.0, %v1992_v26 }
 0x1b4   :  { %v872_v57 = vld [vmem:[%s3245_s3 + $0xc0] sm:$0xff]  ;;  %v1851_v34 = vsel %vm1351_vm13, 1.0, %v1992_v26  ;;  %1576 = vst.msk [vmem:[%s3248_s4 + $0xb8] sm:$0xff] %vm1488_vm7, %v1819_v33 }
 0x1b5   :  { %v904_v58 = vld [vmem:[%s3245_s3 + $0x1c0] sm:$0xff]  ;;  %vm936_vm5 = vcmp.gt.f32.partialorder %v872_v57, 1.0  ;;  %v1128_v6 = vmul.f32 0.9, %v872_v57  ;;  %1608 = vst.msk [vmem:[%s3248_s4 + $0x1b8] sm:$0xff] %vm1488_vm7, %v1851_v34 }
 0x1b6   :  { %vm968_vm6 = vcmp.gt.f32.partialorder %v904_v58, 1.0  ;;  %v1160_v7 = vmul.f32 0.9, %v904_v58  ;;  %1511 = vst.msk [vmem:[%s3247_s5 + $0xb0] sm:$0xff] %vm1488_vm7, %v1254_v17  ;;  %1543 = vst.msk [vmem:[%s3247_s5 + $0x1b0] sm:$0xff] %vm1488_vm7, %v1286_v63  ;;  %v1756_v16 = vsel %vm936_vm5, 1.0, %v1992_v26 }
 0x1b7   :  { %v1788_v19 = vsel %vm968_vm6, 1.0, %v1992_v26  ;;  %v1192_v29 = vadd.f32 %v1128_v6, %v690_v22  ;;  %v700_v6 = vpop.f32.mrf.mxu0 }
 0x1b8   :  { %v1224_v30 = vadd.f32 %v1160_v7, %v818_v23  ;;  %v828_v7 = vpop.f32.mrf.mxu1 }
 0x1b9   :  { %v1256_v37 = vsub.f32 %v1192_v29, %v1756_v16  ;;  %v702_v15 = vpop.f32.mrf.mxu0 }
 0x1ba   :  { %v1288_v38 = vsub.f32 %v1224_v30, %v1788_v19  ;;  %v830_v16 = vpop.f32.mrf.mxu1 }
 0x1bb   :  { %vm1320_vm0 = vcmp.gt.f32.partialorder %v1256_v37, 1.0 }
 0x1bc   :  { %vm1352_vm1 = vcmp.gt.f32.partialorder %v1288_v38, 1.0  ;;  %v1820_v51 = vsel %vm1320_vm0, 1.0, %v1992_v26  ;;  %v833_v29 = vpop.f32.mrf.mxu1 }
 0x1bd   :  { %v873_v11 = vld [vmem:[%s3245_s3 + $0xc8] sm:$0xff]  ;;  %v1852_v52 = vsel %vm1352_vm1, 1.0, %v1992_v26  ;;  %1577 = vst.msk [vmem:[%s3248_s4 + $0xc0] sm:$0xff] %vm1488_vm7, %v1820_v51  ;;  %v834_v34 = vadd.f32 %v2879_v10, %v833_v29 }
 0x1be   :  { %v905_v12 = vld [vmem:[%s3245_s3 + $0x1c8] sm:$0xff]  ;;  %vm937_vm10 = vcmp.gt.f32.partialorder %v873_v11, 1.0  ;;  %v1129_v27 = vmul.f32 0.9, %v873_v11  ;;  %1609 = vst.msk [vmem:[%s3248_s4 + $0x1c0] sm:$0xff] %vm1488_vm7, %v1852_v52  ;;  %v701_v11 = vadd.f32 %v2879_v10, %v700_v6  ;;  %v835_v36 = vpop.f32.mrf.mxu1 }
 0x1bf   :  { %vm969_vm11 = vcmp.gt.f32.partialorder %v905_v12, 1.0  ;;  %v1161_v28 = vmul.f32 0.9, %v905_v12  ;;  %1512 = vst.msk [vmem:[%s3247_s5 + $0xb8] sm:$0xff] %vm1488_vm7, %v1255_v20  ;;  %1544 = vst.msk [vmem:[%s3247_s5 + $0x1b8] sm:$0xff] %vm1488_vm7, %v1287_v21  ;;  %v1757_v41 = vsel %vm937_vm10, 1.0, %v1992_v26  ;;  %v829_v12 = vadd.f32 %v2879_v10, %v828_v7 }
 0x1c0   :  { %v1789_v42 = vsel %vm969_vm11, 1.0, %v1992_v26  ;;  %v1193_v47 = vadd.f32 %v1129_v27, %v693_v39  ;;  %v705_v27 = vpop.f32.mrf.mxu0 }
 0x1c1   :  { %v1225_v48 = vadd.f32 %v1161_v28, %v821_v40  ;;  %v706_v33 = vadd.f32 %v2879_v10, %v705_v27 }
 0x1c2   :  { %v1257_v57 = vsub.f32 %v1193_v47, %v1757_v41  ;;  %v707_v35 = vpop.f32.mrf.mxu0 }
 0x1c3   :  { %v1289_v58 = vsub.f32 %v1225_v48, %v1789_v42 }
 0x1c4   :  { %vm1321_vm4 = vcmp.gt.f32.partialorder %v1257_v57, 1.0 }
 0x1c5   :  { %vm1353_vm5 = vcmp.gt.f32.partialorder %v1289_v58, 1.0  ;;  %v1821_v4 = vsel %vm1321_vm4, 1.0, %v1992_v26 }
 0x1c6   :  { %v874_v31 = vld [vmem:[%s3245_s3 + $0xd0] sm:$0xff]  ;;  %v1853_v5 = vsel %vm1353_vm5, 1.0, %v1992_v26  ;;  %1578 = vst.msk [vmem:[%s3248_s4 + $0xc8] sm:$0xff] %vm1488_vm7, %v1821_v4 }
 0x1c7   :  { %v906_v32 = vld [vmem:[%s3245_s3 + $0x1d0] sm:$0xff]  ;;  %vm938_vm14 = vcmp.gt.f32.partialorder %v874_v31, 1.0  ;;  %v1130_v45 = vmul.f32 0.9, %v874_v31  ;;  %1610 = vst.msk [vmem:[%s3248_s4 + $0x1c8] sm:$0xff] %vm1488_vm7, %v1853_v5 }
 0x1c8   :  { %vm970_vm15 = vcmp.gt.f32.partialorder %v906_v32, 1.0  ;;  %v1162_v46 = vmul.f32 0.9, %v906_v32  ;;  %1513 = vst.msk [vmem:[%s3247_s5 + $0xc0] sm:$0xff] %vm1488_vm7, %v1256_v37  ;;  %1545 = vst.msk [vmem:[%s3247_s5 + $0x1c0] sm:$0xff] %vm1488_vm7, %v1288_v38  ;;  %v1758_v54 = vsel %vm938_vm14, 1.0, %v1992_v26 }
 0x1c9   :  { %v1790_v56 = vsel %vm970_vm15, 1.0, %v1992_v26  ;;  %v1194_v0 = vadd.f32 %v1130_v45, %v698_v59  ;;  %v708_v45 = vpop.f32.mrf.mxu0 }
 0x1ca   :  { %v1226_v1 = vadd.f32 %v1162_v46, %v826_v60  ;;  %v836_v46 = vpop.f32.mrf.mxu1 }
 0x1cb   :  { %v1258_v8 = vsub.f32 %v1194_v0, %v1758_v54  ;;  %v710_v53 = vpop.f32.mrf.mxu0 }
 0x1cc   :  { %v1290_v9 = vsub.f32 %v1226_v1, %v1790_v56  ;;  %v838_v54 = vpop.f32.mrf.mxu1 }
 0x1cd   :  { %vm1322_vm9 = vcmp.gt.f32.partialorder %v1258_v8, 1.0 }
 0x1ce   :  { %vm1354_vm10 = vcmp.gt.f32.partialorder %v1290_v9, 1.0  ;;  %v1822_v24 = vsel %vm1322_vm9, 1.0, %v1992_v26  ;;  %v841_v0 = vpop.f32.mrf.mxu1 }
 0x1cf   :  { %v875_v49 = vld [vmem:[%s3245_s3 + $0xd8] sm:$0xff]  ;;  %v1854_v25 = vsel %vm1354_vm10, 1.0, %v1992_v26  ;;  %1579 = vst.msk [vmem:[%s3248_s4 + $0xd0] sm:$0xff] %vm1488_vm7, %v1822_v24  ;;  %v842_v5 = vadd.f32 %v2879_v10, %v841_v0 }
 0x1d0   :  { %v907_v50 = vld [vmem:[%s3245_s3 + $0x1d8] sm:$0xff]  ;;  %vm939_vm2 = vcmp.gt.f32.partialorder %v875_v49, 1.0  ;;  %v1131_v17 = vmul.f32 0.9, %v875_v49  ;;  %1611 = vst.msk [vmem:[%s3248_s4 + $0x1d0] sm:$0xff] %vm1488_vm7, %v1854_v25  ;;  %v709_v49 = vadd.f32 %v2879_v10, %v708_v45  ;;  %v843_v7 = vpop.f32.mrf.mxu1 }
 0x1d1   :  { %vm971_vm3 = vcmp.gt.f32.partialorder %v907_v50, 1.0  ;;  %v1163_v63 = vmul.f32 0.9, %v907_v50  ;;  %1514 = vst.msk [vmem:[%s3247_s5 + $0xc8] sm:$0xff] %vm1488_vm7, %v1257_v57  ;;  %1546 = vst.msk [vmem:[%s3247_s5 + $0x1c8] sm:$0xff] %vm1488_vm7, %v1289_v58  ;;  %v1759_v13 = vsel %vm939_vm2, 1.0, %v1992_v26  ;;  %v837_v50 = vadd.f32 %v2879_v10, %v836_v46 }
 0x1d2   :  { %v1791_v14 = vsel %vm971_vm3, 1.0, %v1992_v26  ;;  %v1195_v20 = vadd.f32 %v1131_v17, %v701_v11  ;;  %v713_v17 = vpop.f32.mrf.mxu0  ;;  %v844_v16 = vpop.f32.mrf.mxu1 }
 0x1d3   :  { %v1227_v21 = vadd.f32 %v1163_v63, %v829_v12  ;;  %v714_v4 = vadd.f32 %v2879_v10, %v713_v17 }
 0x1d4   :  { %v1259_v31 = vsub.f32 %v1195_v20, %v1759_v13  ;;  %v715_v6 = vpop.f32.mrf.mxu0  ;;  %v846_v25 = vpop.f32.mrf.mxu1 }
 0x1d5   :  { %v1291_v32 = vsub.f32 %v1227_v21, %v1791_v14  ;;  %v845_v21 = vadd.f32 %v2879_v10, %v844_v16 }
 0x1d6   :  { %vm1323_vm13 = vcmp.gt.f32.partialorder %v1259_v31, 1.0  ;;  %v716_v15 = vpop.f32.mrf.mxu0 }
 0x1d7   :  { %vm1355_vm14 = vcmp.gt.f32.partialorder %v1291_v32, 1.0  ;;  %v1823_v43 = vsel %vm1323_vm13, 1.0, %v1992_v26  ;;  %v717_v20 = vadd.f32 %v2879_v10, %v716_v15 }
 0x1d8   :  { %v876_v2 = vld [vmem:[%s3245_s3 + $0xe0] sm:$0xff]  ;;  %v1855_v44 = vsel %vm1355_vm14, 1.0, %v1992_v26  ;;  %1580 = vst.msk [vmem:[%s3248_s4 + $0xd8] sm:$0xff] %vm1488_vm7, %v1823_v43  ;;  %v718_v24 = vpop.f32.mrf.mxu0 }
 0x1d9   :  { %v908_v3 = vld [vmem:[%s3245_s3 + $0x1e0] sm:$0xff]  ;;  %vm940_vm6 = vcmp.gt.f32.partialorder %v876_v2, 1.0  ;;  %v1132_v18 = vmul.f32 0.9, %v876_v2  ;;  %1612 = vst.msk [vmem:[%s3248_s4 + $0x1d8] sm:$0xff] %vm1488_vm7, %v1855_v44 }
 0x1da   :  { %vm972_vm8 = vcmp.gt.f32.partialorder %v908_v3, 1.0  ;;  %v1164_v19 = vmul.f32 0.9, %v908_v3  ;;  %1515 = vst.msk [vmem:[%s3247_s5 + $0xd0] sm:$0xff] %vm1488_vm7, %v1258_v8  ;;  %1547 = vst.msk [vmem:[%s3247_s5 + $0x1d0] sm:$0xff] %vm1488_vm7, %v1290_v9  ;;  %v1760_v28 = vsel %vm940_vm6, 1.0, %v1992_v26 }
 0x1db   :  { %v1792_v30 = vsel %vm972_vm8, 1.0, %v1992_v26  ;;  %v1196_v39 = vadd.f32 %v1132_v18, %v706_v33 }
 0x1dc   :  { %v1228_v40 = vadd.f32 %v1164_v19, %v834_v34 }
 0x1dd   :  { %v1260_v47 = vsub.f32 %v1196_v39, %v1760_v28 }
 0x1de   :  { %v1292_v48 = vsub.f32 %v1228_v40, %v1792_v30 }
 0x1df   :  { %vm1324_vm1 = vcmp.gt.f32.partialorder %v1260_v47, 1.0 }
 0x1e0   :  { %vm1356_vm2 = vcmp.gt.f32.partialorder %v1292_v48, 1.0  ;;  %v1824_v61 = vsel %vm1324_vm1, 1.0, %v1992_v26 }
 0x1e1   :  { %v877_v22 = vld [vmem:[%s3245_s3 + $0xe8] sm:$0xff]  ;;  %v1856_v62 = vsel %vm1356_vm2, 1.0, %v1992_v26  ;;  %1581 = vst.msk [vmem:[%s3248_s4 + $0xe0] sm:$0xff] %vm1488_vm7, %v1824_v61 }
 0x1e2   :  { %v909_v23 = vld [vmem:[%s3245_s3 + $0x1e8] sm:$0xff]  ;;  %vm941_vm11 = vcmp.gt.f32.partialorder %v877_v22, 1.0  ;;  %v1133_v37 = vmul.f32 0.9, %v877_v22  ;;  %1613 = vst.msk [vmem:[%s3248_s4 + $0x1e0] sm:$0xff] %vm1488_vm7, %v1856_v62 }
 0x1e3   :  { %vm973_vm12 = vcmp.gt.f32.partialorder %v909_v23, 1.0  ;;  %v1165_v38 = vmul.f32 0.9, %v909_v23  ;;  %1516 = vst.msk [vmem:[%s3247_s5 + $0xd8] sm:$0xff] %vm1488_vm7, %v1259_v31  ;;  %1548 = vst.msk [vmem:[%s3247_s5 + $0x1d8] sm:$0xff] %vm1488_vm7, %v1291_v32  ;;  %v1761_v51 = vsel %vm941_vm11, 1.0, %v1992_v26 }
 0x1e4   :  { %v1793_v52 = vsel %vm973_vm12, 1.0, %v1992_v26  ;;  %v1197_v57 = vadd.f32 %v1133_v37, %v709_v49 }
 0x1e5   :  { %v1229_v58 = vadd.f32 %v1165_v38, %v837_v50 }
 0x1e6   :  { %v1261_v2 = vsub.f32 %v1197_v57, %v1761_v51 }
 0x1e7   :  { %v1293_v3 = vsub.f32 %v1229_v58, %v1793_v52 }
 0x1e8   :  { %vm1325_vm5 = vcmp.gt.f32.partialorder %v1261_v2, 1.0 }
 0x1e9   :  { %vm1357_vm6 = vcmp.gt.f32.partialorder %v1293_v3, 1.0  ;;  %v1825_v13 = vsel %vm1325_vm5, 1.0, %v1992_v26 }
 0x1ea   :  { %v878_v41 = vld [vmem:[%s3245_s3 + $0xf0] sm:$0xff]  ;;  %v1857_v14 = vsel %vm1357_vm6, 1.0, %v1992_v26  ;;  %1582 = vst.msk [vmem:[%s3248_s4 + $0xe8] sm:$0xff] %vm1488_vm7, %v1825_v13 }
 0x1eb   :  { %v910_v42 = vld [vmem:[%s3245_s3 + $0x1f0] sm:$0xff]  ;;  %vm942_vm15 = vcmp.gt.f32.partialorder %v878_v41, 1.0  ;;  %v1134_v55 = vmul.f32 0.9, %v878_v41  ;;  %1614 = vst.msk [vmem:[%s3248_s4 + $0x1e8] sm:$0xff] %vm1488_vm7, %v1857_v14 }
 0x1ec   :  { %vm974_vm0 = vcmp.gt.f32.partialorder %v910_v42, 1.0  ;;  %v1166_v56 = vmul.f32 0.9, %v910_v42  ;;  %1517 = vst.msk [vmem:[%s3247_s5 + $0xe0] sm:$0xff] %vm1488_vm7, %v1260_v47  ;;  %1549 = vst.msk [vmem:[%s3247_s5 + $0x1e0] sm:$0xff] %vm1488_vm7, %v1292_v48  ;;  %v1762_v63 = vsel %vm942_vm15, 1.0, %v1992_v26 }
 0x1ed   :  { %v1794_v1 = vsel %vm974_vm0, 1.0, %v1992_v26  ;;  %v1198_v11 = vadd.f32 %v1134_v55, %v714_v4 }
 0x1ee   :  { %v1230_v12 = vadd.f32 %v1166_v56, %v842_v5 }
 0x1ef   :  { %v1262_v18 = vsub.f32 %v1198_v11, %v1762_v63 }
 0x1f0   :  { %v1294_v19 = vsub.f32 %v1230_v12, %v1794_v1 }
 0x1f1   :  { %vm1326_vm8 = vcmp.gt.f32.partialorder %v1262_v18, 1.0 }
 0x1f2   :  { %vm1358_vm9 = vcmp.gt.f32.partialorder %v1294_v19, 1.0  ;;  %v1826_v28 = vsel %vm1326_vm8, 1.0, %v1992_v26 }
 0x1f3   :  { %v879_v59 = vld [vmem:[%s3245_s3 + $0xf8] sm:$0xff]  ;;  %v1858_v29 = vsel %vm1358_vm9, 1.0, %v1992_v26  ;;  %1583 = vst.msk [vmem:[%s3248_s4 + $0xf0] sm:$0xff] %vm1488_vm7, %v1826_v28 }
 0x1f4   :  { %v911_v60 = vld [vmem:[%s3245_s3 + $0x1f8] sm:$0xff]  ;;  %vm943_vm3 = vcmp.gt.f32.partialorder %v879_v59, 1.0  ;;  %v1135_v8 = vmul.f32 0.9, %v879_v59  ;;  %1615 = vst.msk [vmem:[%s3248_s4 + $0x1f0] sm:$0xff] %vm1488_vm7, %v1858_v29 }
 0x1f5   :  { %vm975_vm4 = vcmp.gt.f32.partialorder %v911_v60, 1.0  ;;  %v1167_v9 = vmul.f32 0.9, %v911_v60  ;;  %1518 = vst.msk [vmem:[%s3247_s5 + $0xe8] sm:$0xff] %vm1488_vm7, %v1261_v2  ;;  %1550 = vst.msk [vmem:[%s3247_s5 + $0x1e8] sm:$0xff] %vm1488_vm7, %v1293_v3  ;;  %v1763_v22 = vsel %vm943_vm3, 1.0, %v1992_v26 }
 0x1f6   :  { %v1795_v23 = vsel %vm975_vm4, 1.0, %v1992_v26  ;;  %1519 = vst.msk [vmem:[%s3247_s5 + $0xf0] sm:$0xff] %vm1488_vm7, %v1262_v18  ;;  %1551 = vst.msk [vmem:[%s3247_s5 + $0x1f0] sm:$0xff] %vm1488_vm7, %v1294_v19  ;;  %v1199_v10 = vadd.f32 %v1135_v8, %v717_v20 }
 0x1f7   :  { %v1231_v27 = vadd.f32 %v1167_v9, %v845_v21 }
 0x1f8   :  { %v1263_v30 = vsub.f32 %v1199_v10, %v1763_v22 }
 0x1f9   :  { %v1295_v31 = vsub.f32 %v1231_v27, %v1795_v23 }
 0x1fa   :  { %vm1327_vm10 = vcmp.gt.f32.partialorder %v1263_v30, 1.0  ;;  %1520 = vst.msk [vmem:[%s3247_s5 + $0xf8] sm:$0xff] %vm1488_vm7, %v1263_v30 }
 0x1fb   :  { %vm1359_vm11 = vcmp.gt.f32.partialorder %v1295_v31, 1.0  ;;  %1552 = vst.msk [vmem:[%s3247_s5 + $0x1f8] sm:$0xff] %vm1488_vm7, %v1295_v31  ;;  %v1827_v32 = vsel %vm1327_vm10, 1.0, %v1992_v26 }
 0x1fc   :  { %v1859_v33 = vsel %vm1359_vm11, 1.0, %v1992_v26  ;;  %1584 = vst.msk [vmem:[%s3248_s4 + $0xf8] sm:$0xff] %vm1488_vm7, %v1827_v32 }
 0x1fd   :  { %1616 = vst.msk [vmem:[%s3248_s4 + $0x1f8] sm:$0xff] %vm1488_vm7, %v1859_v33 }

// kernel: snn_yolo_forward.12
= control target key start
LH: loop header
LB: loop body
LE: loop exit
PB: predicated region body
PF: predicated region fallthrough
CT: control target
= control target key end

     0   :  { %vm386_vm0 = vcmask 523264   ;;  %s1173_s1 = inlined_call_operand.vmem [shape: bf16[576,128], index: 1, kind: input, shape index: {}]   ;;  %s1174_s0 = inlined_call_operand.vmem [shape: bf16[32,576], index: 0, kind: input, shape index: {}]   ;;  %s1175_s4 = inlined_call_operand.vmem [shape: bf16[64,128], index: 4, kind: input, shape index: {}]   ;;  %s1176_s3 = inlined_call_operand.vmem [shape: bf16[32,64], index: 3, kind: input, shape index: {}]   ;;  %s1177_s2 = inlined_call_operand.vmem [shape: f32[1,128], index: 2, kind: input, shape index: {}]   ;;  %s1178_s6 = inlined_call_operand.vmem [shape: f32[32,128], index: 6, kind: input, shape index: {}, may-alias: {6,8}]   ;;  %s1179_s5 = inlined_call_operand.vmem [shape: f32[1,128], index: 5, kind: input, shape index: {}]   ;;  %s1180_s8 = inlined_call_operand.vmem [shape: f32[32,128], index: 8, kind: output, shape index: {1}, may-alias: {6,8}]   ;;  %s1181_s7 = inlined_call_operand.vmem [shape: f32[32,128], index: 7, kind: output, shape index: {0}]  }
   0x1   :  { %v871_v0 = vld [vmem:[%s1173_s1 + $0x78] sm:$0xff]   ;;  %v875_v4 = vld [vmem:[%s1173_s1 + $0x70] sm:$0xff]   ;;  %v879_v8 = vld [vmem:[%s1173_s1 + $0x68] sm:$0xff]  }
   0x2   :  { %v872_v1 = vld [vmem:[%s1173_s1 + $0xf8] sm:$0xff]   ;;  %778 = vmatprep.subr.bf16.mxu0 %v871_v0  ;;  %v876_v5 = vld [vmem:[%s1173_s1 + $0xf0] sm:$0xff]   ;;  %v880_v9 = vld [vmem:[%s1173_s1 + $0xe8] sm:$0xff]  }
   0x3   :  { %v873_v2 = vld [vmem:[%s1173_s1 + $0x38] sm:$0xff]   ;;  %806 = vmatprep.subr.bf16.mxu1 %v872_v1  ;;  %v877_v6 = vld [vmem:[%s1173_s1 + $0x30] sm:$0xff]   ;;  %v881_v10 = vld [vmem:[%s1173_s1 + $0x28] sm:$0xff]  }
   0x4   :  { %v874_v3 = vld [vmem:[%s1173_s1 + $0xb8] sm:$0xff]   ;;  %779 = vmatpush3.bf16.msra.mxu0 %v873_v2  ;;  %v878_v7 = vld [vmem:[%s1173_s1 + $0xb0] sm:$0xff]   ;;  %v882_v11 = vld [vmem:[%s1173_s1 + $0xa8] sm:$0xff]  }
   0x5   :  { %807 = vmatpush3.bf16.msra.mxu1 %v874_v3  ;;  %780 = vmatprep.subr.bf16.mxu0 %v875_v4  ;;  %v883_v12 = vld [vmem:[%s1173_s1 + $0x60] sm:$0xff]   ;;  %v887_v16 = vld [vmem:[%s1173_s1 + $0x58] sm:$0xff]   ;;  %v891_v20 = vld [vmem:[%s1173_s1 + $0x50] sm:$0xff]  }
   0x6   :  { %808 = vmatprep.subr.bf16.mxu1 %v876_v5  ;;  %v884_v13 = vld [vmem:[%s1173_s1 + $0xe0] sm:$0xff]   ;;  %v888_v17 = vld [vmem:[%s1173_s1 + $0xd8] sm:$0xff]   ;;  %v892_v21 = vld [vmem:[%s1173_s1 + $0xd0] sm:$0xff]  }
   0x7   :  { %v885_v14 = vld [vmem:[%s1173_s1 + $0x20] sm:$0xff]   ;;  %v889_v18 = vld [vmem:[%s1173_s1 + $0x18] sm:$0xff]   ;;  %v893_v22 = vld [vmem:[%s1173_s1 + $0x10] sm:$0xff]  }
   0x8   :  { %781 = vmatpush3.bf16.msra.mxu0 %v877_v6  ;;  %v886_v15 = vld [vmem:[%s1173_s1 + $0xa0] sm:$0xff]   ;;  %v890_v19 = vld [vmem:[%s1173_s1 + $0x98] sm:$0xff]   ;;  %v894_v23 = vld [vmem:[%s1173_s1 + $0x90] sm:$0xff]  }
   0x9   :  { %809 = vmatpush3.bf16.msra.mxu1 %v878_v7  ;;  %782 = vmatprep.subr.bf16.mxu0 %v879_v8  ;;  %v895_v24 = vld [vmem:[%s1173_s1 + $0x48] sm:$0xff]   ;;  %v899_v28 = vld [vmem:[%s1173_s1 + $0x40] sm:$0xff]   ;;  %v909_v36 = vld [vmem:[%s1173_s1 + $0x118] sm:$0xff]  }
   0xa   :  { %810 = vmatprep.subr.bf16.mxu1 %v880_v9  ;;  %v896_v25 = vld [vmem:[%s1173_s1 + $0xc8] sm:$0xff]   ;;  %v900_v29 = vld [vmem:[%s1173_s1 + $0xc0] sm:$0xff]   ;;  %v910_v37 = vld [vmem:[%s1175_s4 + $0x18] sm:$0xff]  }
   0xb   :  { %v897_v26 = vld [vmem:[%s1173_s1 + $0x8] sm:$0xff]   ;;  %v901_v30 = vld [vmem:[%s1173_s1] sm:$0xff]   ;;  %v911_v38 = vld [vmem:[%s1173_s1 + $0x110] sm:$0xff]  }
   0xc   :  { %783 = vmatpush3.bf16.msra.mxu0 %v881_v10  ;;  %v898_v27 = vld [vmem:[%s1173_s1 + $0x88] sm:$0xff]   ;;  %v902_v31 = vld [vmem:[%s1173_s1 + $0x80] sm:$0xff]   ;;  %v912_v39 = vld [vmem:[%s1175_s4 + $0x10] sm:$0xff]  }
   0xd   :  { %811 = vmatpush3.bf16.msra.mxu1 %v882_v11  ;;  %784 = vmatprep.subr.bf16.mxu0 %v883_v12  ;;  %v903_v32 = vld [vmem:[%s1174_s0] ss:$20 sps:$4 sm:$0xff]   ;;  %v905_v33 = vld [vmem:[%s1174_s0 + $0x4] ss:$20 sps:$4 sm:$0xff]   ;;  %v906_v34 = vld [vmem:[%s1174_s0 + $0x8] ss:$20 sps:$4 sm:$0xff]  }
   0xe   :  { %812 = vmatprep.subr.bf16.mxu1 %v884_v13  ;;  %v908_v35 = vld [vmem:[%s1174_s0 + $0xc] ss:$20 sps:$4 sm:$0xff]   ;;  %425 = vmatprep.mubr.bf16.mxu0 %v905_v33  ;;  %v915_v41 = vld [vmem:[%s1174_s0 + $0x34] ss:$20 sps:$4 sm:$0xff]   ;;  %v918_v43 = vld [vmem:[%s1174_s0 + $0x30] ss:$20 sps:$4 sm:$0xff]  }
   0xf   :  { %474 = vmatprep.mubr.bf16.mxu1 %v908_v35  ;;  %v913_v40 = vld [vmem:[%s1174_s0 + $0x2c] ss:$20 sps:$4 sm:$0xff]   ;;  %v917_v42 = vld [vmem:[%s1174_s0 + $0x28] ss:$20 sps:$4 sm:$0xff]   ;;  %v923_v48 = vld [vmem:[%s1174_s0 + $0x10] ss:$20 sps:$4 sm:$0xff]  }
  0x10   :  { %785 = vmatpush3.bf16.msra.mxu0 %v885_v14  ;;  %v919_v44 = vld [vmem:[%s1173_s1 + $0x108] sm:$0xff]   ;;  %v921_v46 = vld [vmem:[%s1173_s1 + $0x100] sm:$0xff]   ;;  %v542_v8 = vld [vmem:[%s1178_s6 + $0x10] sm:$0xff] }
  0x11   :  { %813 = vmatpush3.bf16.msra.mxu1 %v886_v15  ;;  %786 = vmatprep.subr.bf16.mxu0 %v887_v16  ;;  %v920_v45 = vld [vmem:[%s1175_s4 + $0x8] sm:$0xff]   ;;  %v922_v47 = vld [vmem:[%s1175_s4] sm:$0xff]   ;;  %vm546_vm1 = vcmp.gt.f32.partialorder %v542_v8, 1.0  ;;  %v558_v16 = vmul.f32 0.9, %v542_v8 }
  0x12   :  { %814 = vmatprep.subr.bf16.mxu1 %v888_v17  ;;  %v925_v49 = vld [vmem:[%s1176_s3] sm:$0xff]   ;;  %v924_v50 = vld [vmem:[%s1174_s0 + $0x38] ss:$20 sps:$4 sm:$0xff]  }
  0x13   :  { %v926_v51 = vld [vmem:[%s1176_s3 + $0x8] sm:$0xff]   ;;  %v712_v0 = vld [vmem:[%s1177_s2] ss:$0 sm:$0xff] }
  0x14   :  { %787 = vmatpush3.bf16.msra.mxu0 %v889_v18  ;;  %v540_v15 = vld [vmem:[%s1178_s6] sm:$0xff] }
  0x15   :  { %815 = vmatpush3.bf16.msra.mxu1 %v890_v19  ;;  %788 = vmatprep.subr.bf16.mxu0 %v891_v20  ;;  %vm544_vm2 = vcmp.gt.f32.partialorder %v540_v15, 1.0 }
  0x16   :  { %816 = vmatprep.subr.bf16.mxu1 %v892_v21  ;;  %v543_v21 = vld [vmem:[%s1178_s6 + $0x18] sm:$0xff] }
  0x17   :  { %vm547_vm3 = vcmp.gt.f32.partialorder %v543_v21, 1.0 }
  0x18   :  { %789 = vmatpush3.bf16.msra.mxu0 %v893_v22 }
  0x19   :  { %817 = vmatpush3.bf16.msra.mxu1 %v894_v23  ;;  %790 = vmatprep.subr.bf16.mxu0 %v895_v24 }
  0x1a   :  { %818 = vmatprep.subr.bf16.mxu1 %v896_v25  ;;  %v556_v25 = vmul.f32 0.9, %v540_v15 }
  0x1c   :  { %791 = vmatpush3.bf16.msra.mxu0 %v897_v26  ;;  %v541_v26 = vld [vmem:[%s1178_s6 + $0x8] sm:$0xff] }
  0x1d   :  { %819 = vmatpush3.bf16.msra.mxu1 %v898_v27  ;;  %792 = vmatprep.subr.bf16.mxu0 %v899_v28  ;;  %v927_v28 = vmov 0.0   ;;  %vm545_vm4 = vcmp.gt.f32.partialorder %v541_v26, 1.0 }
  0x1e   :  { %820 = vmatprep.subr.bf16.mxu1 %v900_v29  ;;  %v763_v29 = vsel %vm546_vm1, 1.0, %v927_v28 }
  0x20   :  { %793 = vmatpush3.bf16.msra.mxu0 %v901_v30  ;;  %v769_v30 = vld [vmem:[%s1179_s5] ss:$0 sm:$0xff] }
  0x21   :  { %821 = vmatpush3.bf16.msra.mxu1 %v902_v31  ;;  %846 = vmatprep.subr.bf16.mxu0 %v909_v36 }
  0x22   :  { %858 = vmatprep.subr.bf16.mxu1 %v910_v37 }
  0x23   :  { %426 = vmatmul.mubr.bf16.vlgmr.msra.gmra.mxu0 %v903_v32 }
  0x24   :  { %475 = vmatmul.mubr.bf16.vlgmr.msra.gmra.mxu1 %v906_v34  ;;  %847 = vmatpush3.bf16.msra.mxu0 %v909_v36  ;;  %v559_v36 = vmul.f32 0.9, %v543_v21 }
  0x25   :  { %859 = vmatpush3.bf16.msra.mxu1 %v910_v37  ;;  %848 = vmatprep.subr.bf16.mxu0 %v911_v38  ;;  %v761_v37 = vsel %vm544_vm2, 1.0, %v927_v28 }
  0x26   :  { %860 = vmatprep.subr.bf16.mxu1 %v912_v39  ;;  %433 = vmatprep.mubr.bf16.mxu0 %v913_v40  ;;  %v557_v40 = vmul.f32 0.9, %v541_v26 }
  0x27   :  { %482 = vmatprep.mubr.bf16.mxu1 %v915_v41 }
  0x28   :  { %849 = vmatpush3.bf16.msra.mxu0 %v911_v38 }
  0x29   :  { %861 = vmatpush3.bf16.msra.mxu1 %v912_v39  ;;  %850 = vmatprep.subr.bf16.mxu0 %v919_v44 }
  0x2a   :  { %862 = vmatprep.subr.bf16.mxu1 %v920_v45 }
  0x2b   :  { %434 = vmatmul.mubr.bf16.gmra.mxu0 %v917_v42 }
  0x2c   :  { %483 = vmatmul.mubr.bf16.gmra.mxu1 %v918_v43  ;;  %851 = vmatpush3.bf16.msra.mxu0 %v919_v44 }
  0x2d   :  { %863 = vmatpush3.bf16.msra.mxu1 %v920_v45  ;;  %852 = vmatprep.subr.bf16.mxu0 %v921_v46  ;;  %v764_v45 = vsel %vm547_vm3, 1.0, %v927_v28 }
  0x2e   :  { %864 = vmatprep.subr.bf16.mxu1 %v922_v47  ;;  %854 = vmatprep.mubr.msk.bf16.mxu0 %vm386_vm0, %v923_v48 }
  0x2f   :  { %866 = vmatprep.mubr.msk.bf16.mxu1 %vm386_vm0, %v925_v49 }
  0x30   :  { %853 = vmatpush3.bf16.msra.mxu0 %v921_v46 }
  0x31   :  { %865 = vmatpush3.bf16.msra.mxu1 %v922_v47 }
  0x33   :  { %855 = vmatmul.mubr.msk.bf16.vlgmr.msra.gmra.mxu0 %vm386_vm0, %v924_v50 }
  0x34   :  { %867 = vmatmul.mubr.msk.bf16.vlgmr.msra.gmra.mxu1 %vm386_vm0, %v926_v51 }
  0xe3   :  { %v794_v52 = vpop.f32.mrf.mxu0 }
  0xe4   :  { %v822_v53 = vpop.f32.mrf.mxu1 }
  0xe5   :  { %v795_v54 = vpop.f32.mrf.mxu0 }
  0xe6   :  { %v823_v55 = vpop.f32.mrf.mxu1  ;;  %v796_v62 = vadd.f32 %v795_v54, %v794_v52 }
  0xe7   :  { %v797_v56 = vpop.f32.mrf.mxu0  ;;  %v824_v10 = vadd.f32 %v823_v55, %v822_v53  ;;  %v762_v53 = vsel %vm545_vm4, 1.0, %v927_v28 }
  0xe8   :  { %v825_v57 = vpop.f32.mrf.mxu1  ;;  %v428_v9 = vadd.f32 %v796_v62, %v712_v0 }
  0xe9   :  { %v798_v58 = vpop.f32.mrf.mxu0 }
  0xea   :  { %v826_v59 = vpop.f32.mrf.mxu1  ;;  %v799_v5 = vadd.f32 %v798_v58, %v797_v56  ;;  %v477_v24 = vadd.f32 %v824_v10, %v428_v9 }
  0xeb   :  { %v800_v60 = vpop.f32.mrf.mxu0  ;;  %v827_v27 = vadd.f32 %v826_v59, %v825_v57 }
  0xec   :  { %v828_v61 = vpop.f32.mrf.mxu1  ;;  %v431_v17 = vadd.f32 %v799_v5, %v712_v0 }
  0xed   :  { %v801_v63 = vpop.f32.mrf.mxu0 }
  0xee   :  { %v802_v1 = vadd.f32 %v801_v63, %v800_v60  ;;  %v829_v2 = vpop.f32.mrf.mxu1  ;;  %v480_v39 = vadd.f32 %v827_v27, %v431_v17 }
  0xef   :  { %v830_v3 = vadd.f32 %v829_v2, %v828_v61  ;;  %v803_v4 = vpop.f32.mrf.mxu0 }
  0xf0   :  { %v436_v6 = vadd.f32 %v802_v1, %v712_v0  ;;  %v831_v7 = vpop.f32.mrf.mxu1 }
  0xf1   :  { %v804_v11 = vpop.f32.mrf.mxu0 }
  0xf2   :  { %v805_v12 = vadd.f32 %v804_v11, %v803_v4  ;;  %v832_v13 = vpop.f32.mrf.mxu1  ;;  %v485_v14 = vadd.f32 %v830_v3, %v436_v6 }
  0xf3   :  { %v833_v19 = vadd.f32 %v832_v13, %v831_v7  ;;  %v856_v20 = vpop.f32.mrf.mxu0 }
  0xf4   :  { %v439_v18 = vadd.f32 %v805_v12, %v712_v0  ;;  %v534_v22 = vadd.f32 %v856_v20, %v485_v14  ;;  %v868_v23 = vpop.f32.mrf.mxu1 }
  0xf5   :  { %v525_v31 = vpop.f32.mrf.mxu0  ;;  %v686_v42 = vadd.f32 %v868_v23, %v769_v30 }
  0xf6   :  { %v488_v32 = vadd.f32 %v833_v19, %v439_v18  ;;  %v562_v33 = vadd.f32 %v558_v16, %v534_v22  ;;  %v526_v34 = vadd.f32 %v525_v31, %v477_v24  ;;  %v677_v35 = vpop.f32.mrf.mxu1 }
  0xf7   :  { %v857_v38 = vpop.f32.mrf.mxu0  ;;  %v678_v52 = vadd.f32 %v769_v30, %v677_v35 }
  0xf8   :  { %v566_v41 = vsub.f32 %v562_v33, %v763_v29  ;;  %v560_v43 = vadd.f32 %v556_v25, %v526_v34  ;;  %v537_v44 = vadd.f32 %v857_v38, %v488_v32  ;;  %v869_v46 = vpop.f32.mrf.mxu1 }
  0xf9   :  { %v528_v47 = vpop.f32.mrf.mxu0  ;;  %v689_v58 = vadd.f32 %v869_v46, %v769_v30 }
  0xfa   :  { %582 = vst [vmem:[%s1180_s8 + $0x10] sm:$0xff] %v566_v41  ;;  %vm570_vm5 = vcmp.gt.f32.partialorder %v566_v41, 1.0  ;;  %v564_v48 = vsub.f32 %v560_v43, %v761_v37  ;;  %v563_v49 = vadd.f32 %v559_v36, %v537_v44  ;;  %v529_v50 = vadd.f32 %v528_v47, %v480_v39  ;;  %v680_v59 = vpop.f32.mrf.mxu1 }
  0xfb   :  { %v767_v51 = vsel %vm570_vm5, 1.0, %v927_v28  ;;  %v681_v2 = vadd.f32 %v769_v30, %v680_v59 }
  0xfc   :  { %v694_v54 = vadd.f32 %v767_v51, %v686_v42  ;;  %580 = vst [vmem:[%s1180_s8] sm:$0xff] %v564_v48  ;;  %vm568_vm6 = vcmp.gt.f32.partialorder %v564_v48, 1.0  ;;  %v567_v55 = vsub.f32 %v563_v49, %v764_v45  ;;  %v561_v56 = vadd.f32 %v557_v40, %v529_v50 }
  0xfd   :  { %v765_v57 = vsel %vm568_vm6, 1.0, %v927_v28 }
  0xfe   :  { %v698_v60 = vmax.f32 %v694_v54, 0.0  ;;  %v692_v61 = vadd.f32 %v765_v57, %v678_v52  ;;  %583 = vst [vmem:[%s1180_s8 + $0x18] sm:$0xff] %v567_v55  ;;  %vm571_vm7 = vcmp.gt.f32.partialorder %v567_v55, 1.0  ;;  %v565_v62 = vsub.f32 %v561_v56, %v762_v53 }
  0xff   :  { %v768_v63 = vsel %vm571_vm7, 1.0, %v927_v28 }
 0x100   :  { %702 = vst [vmem:[%s1181_s7 + $0x10] sm:$0xff] %v698_v60  ;;  %v696_v0 = vmax.f32 %v692_v61, 0.0  ;;  %v695_v1 = vadd.f32 %v768_v63, %v689_v58  ;;  %581 = vst [vmem:[%s1180_s8 + $0x8] sm:$0xff] %v565_v62  ;;  %vm569_vm8 = vcmp.gt.f32.partialorder %v565_v62, 1.0 }
 0x101   :  { %v766_v3 = vsel %vm569_vm8, 1.0, %v927_v28 }
 0x102   :  { %700 = vst [vmem:[%s1181_s7] sm:$0xff] %v696_v0  ;;  %v699_v4 = vmax.f32 %v695_v1, 0.0  ;;  %v693_v5 = vadd.f32 %v766_v3, %v681_v2 }
 0x104   :  { %703 = vst [vmem:[%s1181_s7 + $0x18] sm:$0xff] %v699_v4  ;;  %v697_v6 = vmax.f32 %v693_v5, 0.0 }
 0x106   :  { %701 = vst [vmem:[%s1181_s7 + $0x8] sm:$0xff] %v697_v6 }

// kernel: snn_yolo_forward.13
= control target key start
LH: loop header
LB: loop body
LE: loop exit
PB: predicated region body
PF: predicated region fallthrough
CT: control target
= control target key end

     0   :  { %s2338_s1 = inlined_call_operand.vmem [shape: bf16[1152,256], index: 1, kind: input, shape index: {}]   ;;  %s2339_s0 = inlined_call_operand.vmem [shape: bf16[8,1152], index: 0, kind: input, shape index: {}]   ;;  %s2340_s4 = inlined_call_operand.vmem [shape: bf16[128,256], index: 4, kind: input, shape index: {}]   ;;  %s2341_s3 = inlined_call_operand.vmem [shape: bf16[8,128], index: 3, kind: input, shape index: {}]   ;;  %s2342_s2 = inlined_call_operand.vmem [shape: f32[1,256], index: 2, kind: input, shape index: {}]   ;;  %s2343_s6 = inlined_call_operand.vmem [shape: f32[8,256], index: 6, kind: input, shape index: {}, may-alias: {6,8}]   ;;  %s2344_s5 = inlined_call_operand.vmem [shape: f32[1,256], index: 5, kind: input, shape index: {}]   ;;  %s2345_s8 = inlined_call_operand.vmem [shape: f32[8,256], index: 8, kind: output, shape index: {1}, may-alias: {6,8}]   ;;  %s2346_s7 = inlined_call_operand.vmem [shape: f32[8,256], index: 7, kind: output, shape index: {0}]  }
   0x1   :  { %v1508_v0 = vld [vmem:[%s2338_s1 + $0x74] ss:$8 sps:$4 sm:$0xff]   ;;  %v1512_v2 = vld [vmem:[%s2338_s1 + $0x70] ss:$8 sps:$4 sm:$0xff]   ;;  %v1514_v4 = vld [vmem:[%s2338_s1 + $0x64] ss:$8 sps:$4 sm:$0xff]  }
   0x2   :  { %v1510_v1 = vld [vmem:[%s2338_s1 + $0x174] ss:$8 sps:$4 sm:$0xff]   ;;  %942 = vmatprep.subr.bf16.mxu0 %v1508_v0  ;;  %v1513_v3 = vld [vmem:[%s2338_s1 + $0x170] ss:$8 sps:$4 sm:$0xff]   ;;  %v1516_v5 = vld [vmem:[%s2338_s1 + $0x164] ss:$8 sps:$4 sm:$0xff]  }
   0x3   :  { %983 = vmatprep.subr.bf16.mxu1 %v1510_v1  ;;  %943 = vmatpush1.bf16.msra.mxu0 %v1512_v2  ;;  %v1518_v6 = vld [vmem:[%s2338_s1 + $0x60] ss:$8 sps:$4 sm:$0xff]   ;;  %v1520_v8 = vld [vmem:[%s2338_s1 + $0x54] ss:$8 sps:$4 sm:$0xff]   ;;  %v1524_v10 = vld [vmem:[%s2338_s1 + $0x50] ss:$8 sps:$4 sm:$0xff]  }
   0x4   :  { %984 = vmatpush1.bf16.msra.mxu1 %v1513_v3  ;;  %944 = vmatprep.subr.bf16.mxu0 %v1514_v4  ;;  %v1519_v7 = vld [vmem:[%s2338_s1 + $0x160] ss:$8 sps:$4 sm:$0xff]   ;;  %v1522_v9 = vld [vmem:[%s2338_s1 + $0x154] ss:$8 sps:$4 sm:$0xff]   ;;  %v1525_v11 = vld [vmem:[%s2338_s1 + $0x150] ss:$8 sps:$4 sm:$0xff]  }
   0x5   :  { %985 = vmatprep.subr.bf16.mxu1 %v1516_v5  ;;  %v1526_v12 = vld [vmem:[%s2338_s1 + $0x44] ss:$8 sps:$4 sm:$0xff]   ;;  %v1530_v14 = vld [vmem:[%s2338_s1 + $0x40] ss:$8 sps:$4 sm:$0xff]   ;;  %v1532_v16 = vld [vmem:[%s2338_s1 + $0x34] ss:$8 sps:$4 sm:$0xff]  }
   0x6   :  { %v1528_v13 = vld [vmem:[%s2338_s1 + $0x144] ss:$8 sps:$4 sm:$0xff]   ;;  %v1531_v15 = vld [vmem:[%s2338_s1 + $0x140] ss:$8 sps:$4 sm:$0xff]   ;;  %v1534_v17 = vld [vmem:[%s2338_s1 + $0x134] ss:$8 sps:$4 sm:$0xff]  }
   0x7   :  { %945 = vmatpush1.bf16.msra.mxu0 %v1518_v6  ;;  %v1536_v18 = vld [vmem:[%s2338_s1 + $0x30] ss:$8 sps:$4 sm:$0xff]   ;;  %v1538_v20 = vld [vmem:[%s2338_s1 + $0x24] ss:$8 sps:$4 sm:$0xff]   ;;  %v1542_v22 = vld [vmem:[%s2338_s1 + $0x20] ss:$8 sps:$4 sm:$0xff]  }
   0x8   :  { %986 = vmatpush1.bf16.msra.mxu1 %v1519_v7  ;;  %946 = vmatprep.subr.bf16.mxu0 %v1520_v8  ;;  %v1537_v19 = vld [vmem:[%s2338_s1 + $0x130] ss:$8 sps:$4 sm:$0xff]   ;;  %v1540_v21 = vld [vmem:[%s2338_s1 + $0x124] ss:$8 sps:$4 sm:$0xff]   ;;  %v1543_v23 = vld [vmem:[%s2338_s1 + $0x120] ss:$8 sps:$4 sm:$0xff]  }
   0x9   :  { %987 = vmatprep.subr.bf16.mxu1 %v1522_v9  ;;  %v1544_v24 = vld [vmem:[%s2338_s1 + $0x14] ss:$8 sps:$4 sm:$0xff]   ;;  %v1548_v26 = vld [vmem:[%s2338_s1 + $0x10] ss:$8 sps:$4 sm:$0xff]   ;;  %v1550_v28 = vld [vmem:[%s2338_s1 + $0x4] ss:$8 sps:$4 sm:$0xff]  }
   0xa   :  { %v1546_v25 = vld [vmem:[%s2338_s1 + $0x114] ss:$8 sps:$4 sm:$0xff]   ;;  %v1549_v27 = vld [vmem:[%s2338_s1 + $0x110] ss:$8 sps:$4 sm:$0xff]   ;;  %v1552_v29 = vld [vmem:[%s2338_s1 + $0x104] ss:$8 sps:$4 sm:$0xff]  }
   0xb   :  { %947 = vmatpush1.bf16.msra.mxu0 %v1524_v10  ;;  %v1554_v30 = vld [vmem:[%s2338_s1] ss:$8 sps:$4 sm:$0xff]   ;;  %v1556_v32 = vld [vmem:[%s2338_s1 + $0xf4] ss:$8 sps:$4 sm:$0xff]   ;;  %v1560_v34 = vld [vmem:[%s2338_s1 + $0xf0] ss:$8 sps:$4 sm:$0xff]  }
   0xc   :  { %988 = vmatpush1.bf16.msra.mxu1 %v1525_v11  ;;  %948 = vmatprep.subr.bf16.mxu0 %v1526_v12  ;;  %v1555_v31 = vld [vmem:[%s2338_s1 + $0x100] ss:$8 sps:$4 sm:$0xff]   ;;  %v1558_v33 = vld [vmem:[%s2338_s1 + $0x1f4] ss:$8 sps:$4 sm:$0xff]   ;;  %v1561_v35 = vld [vmem:[%s2338_s1 + $0x1f0] ss:$8 sps:$4 sm:$0xff]  }
   0xd   :  { %989 = vmatprep.subr.bf16.mxu1 %v1528_v13  ;;  %v1562_v36 = vld [vmem:[%s2338_s1 + $0xe4] ss:$8 sps:$4 sm:$0xff]   ;;  %v1566_v38 = vld [vmem:[%s2338_s1 + $0xe0] ss:$8 sps:$4 sm:$0xff]   ;;  %v1568_v40 = vld [vmem:[%s2338_s1 + $0xd4] ss:$8 sps:$4 sm:$0xff]  }
   0xe   :  { %v1564_v37 = vld [vmem:[%s2338_s1 + $0x1e4] ss:$8 sps:$4 sm:$0xff]   ;;  %v1567_v39 = vld [vmem:[%s2338_s1 + $0x1e0] ss:$8 sps:$4 sm:$0xff]   ;;  %v1570_v41 = vld [vmem:[%s2338_s1 + $0x1d4] ss:$8 sps:$4 sm:$0xff]  }
   0xf   :  { %949 = vmatpush1.bf16.msra.mxu0 %v1530_v14  ;;  %v1572_v42 = vld [vmem:[%s2338_s1 + $0xd0] ss:$8 sps:$4 sm:$0xff]   ;;  %v1574_v44 = vld [vmem:[%s2338_s1 + $0xc4] ss:$8 sps:$4 sm:$0xff]   ;;  %v1578_v49 = vld [vmem:[%s2338_s1 + $0xc0] ss:$8 sps:$4 sm:$0xff]  }
  0x10   :  { %990 = vmatpush1.bf16.msra.mxu1 %v1531_v15  ;;  %950 = vmatprep.subr.bf16.mxu0 %v1532_v16  ;;  %v1573_v43 = vld [vmem:[%s2338_s1 + $0x1d0] ss:$8 sps:$4 sm:$0xff]   ;;  %v1576_v45 = vld [vmem:[%s2338_s1 + $0x1c4] ss:$8 sps:$4 sm:$0xff]   ;;  %v1579_v50 = vld [vmem:[%s2338_s1 + $0x1c0] ss:$8 sps:$4 sm:$0xff]  }
  0x11   :  { %991 = vmatprep.subr.bf16.mxu1 %v1534_v17  ;;  %v29_v46 = vld [vmem:[%s2339_s0] sm:$0xff]  ;;  %v30_v48 = vld [vmem:[%s2339_s0 + $0x8] sm:$0xff]  ;;  %v1580_v52 = vld [vmem:[%s2338_s1 + $0xb4] ss:$8 sps:$4 sm:$0xff]  }
  0x12   :  { %v1334_v47 = vcombine.high %v29_v46, %v29_v46  ;;  %v1336_v51 = vcombine.high %v30_v48, %v30_v48  ;;  %v1582_v53 = vld [vmem:[%s2338_s1 + $0x1b4] ss:$8 sps:$4 sm:$0xff]   ;;  %v1584_v54 = vld [vmem:[%s2338_s1 + $0xb0] ss:$8 sps:$4 sm:$0xff]   ;;  %v1586_v56 = vld [vmem:[%s2338_s1 + $0xa4] ss:$8 sps:$4 sm:$0xff]   ;;  %v1333_v6 = vcombine.low %v29_v46, %v29_v46  ;;  %v1335_v7 = vcombine.low %v30_v48, %v30_v48 }
  0x13   :  { %951 = vmatpush1.bf16.msra.mxu0 %v1536_v18  ;;  %v1585_v55 = vld [vmem:[%s2338_s1 + $0x1b0] ss:$8 sps:$4 sm:$0xff]   ;;  %v1588_v57 = vld [vmem:[%s2338_s1 + $0x1a4] ss:$8 sps:$4 sm:$0xff]   ;;  %v1590_v58 = vld [vmem:[%s2338_s1 + $0xa0] ss:$8 sps:$4 sm:$0xff]  }
  0x14   :  { %992 = vmatpush1.bf16.msra.mxu1 %v1537_v19  ;;  %952 = vmatprep.subr.bf16.mxu0 %v1538_v20  ;;  %v1591_v59 = vld [vmem:[%s2338_s1 + $0x1a0] ss:$8 sps:$4 sm:$0xff]   ;;  %v1592_v60 = vld [vmem:[%s2338_s1 + $0x94] ss:$8 sps:$4 sm:$0xff]   ;;  %v1596_v62 = vld [vmem:[%s2338_s1 + $0x90] ss:$8 sps:$4 sm:$0xff]  }
  0x15   :  { %993 = vmatprep.subr.bf16.mxu1 %v1540_v21  ;;  %974 = vmatprep.mubr.bf16.mxu0 %v1334_v47  ;;  %v1594_v61 = vld [vmem:[%s2338_s1 + $0x194] ss:$8 sps:$4 sm:$0xff]   ;;  %v1597_v63 = vld [vmem:[%s2338_s1 + $0x190] ss:$8 sps:$4 sm:$0xff]   ;;  %v1598_v0 = vld [vmem:[%s2338_s1 + $0x84] ss:$8 sps:$4 sm:$0xff]  }
  0x16   :  { %1015 = vmatprep.mubr.bf16.mxu1 %v1336_v51  ;;  %v1600_v1 = vld [vmem:[%s2338_s1 + $0x184] ss:$8 sps:$4 sm:$0xff]   ;;  %v1602_v2 = vld [vmem:[%s2338_s1 + $0x80] ss:$8 sps:$4 sm:$0xff]   ;;  %v1610_v4 = vld [vmem:[%s2338_s1 + $0x274] ss:$8 sps:$4 sm:$0xff]  }
  0x17   :  { %953 = vmatpush1.bf16.msra.mxu0 %v1542_v22  ;;  %v1603_v3 = vld [vmem:[%s2338_s1 + $0x180] ss:$8 sps:$4 sm:$0xff]   ;;  %v1613_v5 = vld [vmem:[%s2338_s1 + $0x374] ss:$8 sps:$4 sm:$0xff]   ;;  %v1608_v8 = vld [vmem:[%s2338_s1 + $0x270] ss:$8 sps:$4 sm:$0xff]  }
  0x18   :  { %994 = vmatpush1.bf16.msra.mxu1 %v1543_v23  ;;  %954 = vmatprep.subr.bf16.mxu0 %v1544_v24  ;;  %v1611_v9 = vld [vmem:[%s2338_s1 + $0x370] ss:$8 sps:$4 sm:$0xff]   ;;  %v1616_v10 = vld [vmem:[%s2338_s1 + $0x264] ss:$8 sps:$4 sm:$0xff]   ;;  %v1614_v12 = vld [vmem:[%s2338_s1 + $0x260] ss:$8 sps:$4 sm:$0xff]  }
  0x19   :  { %995 = vmatprep.subr.bf16.mxu1 %v1546_v25  ;;  %v1619_v11 = vld [vmem:[%s2338_s1 + $0x364] ss:$8 sps:$4 sm:$0xff]   ;;  %v1617_v13 = vld [vmem:[%s2338_s1 + $0x360] ss:$8 sps:$4 sm:$0xff]   ;;  %v1622_v14 = vld [vmem:[%s2338_s1 + $0x254] ss:$8 sps:$4 sm:$0xff]  }
  0x1a   :  { %v1625_v15 = vld [vmem:[%s2338_s1 + $0x354] ss:$8 sps:$4 sm:$0xff]   ;;  %v1620_v16 = vld [vmem:[%s2338_s1 + $0x250] ss:$8 sps:$4 sm:$0xff]   ;;  %v1628_v18 = vld [vmem:[%s2338_s1 + $0x244] ss:$8 sps:$4 sm:$0xff]  }
  0x1b   :  { %955 = vmatpush1.bf16.msra.mxu0 %v1548_v26  ;;  %v1623_v17 = vld [vmem:[%s2338_s1 + $0x350] ss:$8 sps:$4 sm:$0xff]   ;;  %v1631_v19 = vld [vmem:[%s2338_s1 + $0x344] ss:$8 sps:$4 sm:$0xff]   ;;  %v1626_v20 = vld [vmem:[%s2338_s1 + $0x240] ss:$8 sps:$4 sm:$0xff]  }
  0x1c   :  { %996 = vmatpush1.bf16.msra.mxu1 %v1549_v27  ;;  %956 = vmatprep.subr.bf16.mxu0 %v1550_v28  ;;  %v1629_v21 = vld [vmem:[%s2338_s1 + $0x340] ss:$8 sps:$4 sm:$0xff]   ;;  %v1634_v22 = vld [vmem:[%s2338_s1 + $0x234] ss:$8 sps:$4 sm:$0xff]   ;;  %v1632_v24 = vld [vmem:[%s2338_s1 + $0x230] ss:$8 sps:$4 sm:$0xff]  }
  0x1d   :  { %997 = vmatprep.subr.bf16.mxu1 %v1552_v29  ;;  %v1637_v23 = vld [vmem:[%s2338_s1 + $0x334] ss:$8 sps:$4 sm:$0xff]   ;;  %v1635_v25 = vld [vmem:[%s2338_s1 + $0x330] ss:$8 sps:$4 sm:$0xff]   ;;  %v1640_v26 = vld [vmem:[%s2338_s1 + $0x224] ss:$8 sps:$4 sm:$0xff]  }
  0x1e   :  { %v1643_v27 = vld [vmem:[%s2338_s1 + $0x324] ss:$8 sps:$4 sm:$0xff]   ;;  %v1638_v28 = vld [vmem:[%s2338_s1 + $0x220] ss:$8 sps:$4 sm:$0xff]   ;;  %v1673_v51 = vld [vmem:[%s2338_s1 + $0x3d4] ss:$8 sps:$4 sm:$0xff]  }
  0x1f   :  { %957 = vmatpush1.bf16.msra.mxu0 %v1554_v30  ;;  %v1641_v29 = vld [vmem:[%s2338_s1 + $0x320] ss:$8 sps:$4 sm:$0xff]   ;;  %v1646_v30 = vld [vmem:[%s2338_s1 + $0x214] ss:$8 sps:$4 sm:$0xff]   ;;  %v1664_v46 = vld [vmem:[%s2338_s1 + $0x2e4] ss:$8 sps:$4 sm:$0xff]  }
  0x20   :  { %998 = vmatpush1.bf16.msra.mxu1 %v1555_v31  ;;  %958 = vmatprep.subr.bf16.mxu0 %v1556_v32  ;;  %v1649_v31 = vld [vmem:[%s2338_s1 + $0x314] ss:$8 sps:$4 sm:$0xff]   ;;  %v1667_v47 = vld [vmem:[%s2338_s1 + $0x3e4] ss:$8 sps:$4 sm:$0xff]   ;;  %v1662_v48 = vld [vmem:[%s2338_s1 + $0x2e0] ss:$8 sps:$4 sm:$0xff]  }
  0x21   :  { %999 = vmatprep.subr.bf16.mxu1 %v1558_v33  ;;  %v2083_v32 = vld [vmem:[%s2339_s0 + $0x10] sm:$0xff]  ;;  %v2088_v33 = vld [vmem:[%s2339_s0 + $0x18] sm:$0xff] }
  0x23   :  { %959 = vmatpush2.bf16.msra.mxu0 %v1560_v34  ;;  %v1644_v34 = vld [vmem:[%s2338_s1 + $0x210] ss:$8 sps:$4 sm:$0xff]  }
  0x24   :  { %1000 = vmatpush2.bf16.msra.mxu1 %v1561_v35  ;;  %960 = vmatprep.subr.bf16.mxu0 %v1562_v36  ;;  %v1647_v35 = vld [vmem:[%s2338_s1 + $0x310] ss:$8 sps:$4 sm:$0xff]   ;;  %v1338_v36 = vcombine.high %v2083_v32, %v2083_v32 }
  0x25   :  { %1001 = vmatprep.subr.bf16.mxu1 %v1564_v37  ;;  %v1340_v37 = vcombine.high %v2088_v33, %v2088_v33 }
  0x27   :  { %961 = vmatpush2.bf16.msra.mxu0 %v1566_v38  ;;  %v1652_v38 = vld [vmem:[%s2338_s1 + $0x204] ss:$8 sps:$4 sm:$0xff]  }
  0x28   :  { %1002 = vmatpush2.bf16.msra.mxu1 %v1567_v39  ;;  %962 = vmatprep.subr.bf16.mxu0 %v1568_v40  ;;  %v1655_v39 = vld [vmem:[%s2338_s1 + $0x304] ss:$8 sps:$4 sm:$0xff]   ;;  %v1650_v40 = vld [vmem:[%s2338_s1 + $0x200] ss:$8 sps:$4 sm:$0xff]  }
  0x29   :  { %1003 = vmatprep.subr.bf16.mxu1 %v1570_v41  ;;  %v1653_v41 = vld [vmem:[%s2338_s1 + $0x300] ss:$8 sps:$4 sm:$0xff]  }
  0x2b   :  { %963 = vmatpush2.bf16.msra.mxu0 %v1572_v42  ;;  %v1658_v42 = vld [vmem:[%s2338_s1 + $0x2f4] ss:$8 sps:$4 sm:$0xff]  }
  0x2c   :  { %1004 = vmatpush2.bf16.msra.mxu1 %v1573_v43  ;;  %964 = vmatprep.subr.bf16.mxu0 %v1574_v44  ;;  %v1661_v43 = vld [vmem:[%s2338_s1 + $0x3f4] ss:$8 sps:$4 sm:$0xff]   ;;  %v1656_v44 = vld [vmem:[%s2338_s1 + $0x2f0] ss:$8 sps:$4 sm:$0xff]  }
  0x2d   :  { %1005 = vmatprep.subr.bf16.mxu1 %v1576_v45  ;;  %v1659_v45 = vld [vmem:[%s2338_s1 + $0x3f0] ss:$8 sps:$4 sm:$0xff]  }
  0x2f   :  { %965 = vmatpush2.bf16.msra.mxu0 %v1578_v49  ;;  %v1665_v49 = vld [vmem:[%s2338_s1 + $0x3e0] ss:$8 sps:$4 sm:$0xff]  }
  0x30   :  { %1006 = vmatpush2.bf16.msra.mxu1 %v1579_v50  ;;  %966 = vmatprep.subr.bf16.mxu0 %v1580_v52  ;;  %v1670_v50 = vld [vmem:[%s2338_s1 + $0x2d4] ss:$8 sps:$4 sm:$0xff]   ;;  %v1668_v52 = vld [vmem:[%s2338_s1 + $0x2d0] ss:$8 sps:$4 sm:$0xff]  }
  0x31   :  { %1007 = vmatprep.subr.bf16.mxu1 %v1582_v53  ;;  %v1671_v53 = vld [vmem:[%s2338_s1 + $0x3d0] ss:$8 sps:$4 sm:$0xff]  }
  0x33   :  { %967 = vmatpush2.bf16.msra.mxu0 %v1584_v54  ;;  %v1676_v54 = vld [vmem:[%s2338_s1 + $0x2c4] ss:$8 sps:$4 sm:$0xff]  }
  0x34   :  { %1008 = vmatpush2.bf16.msra.mxu1 %v1585_v55  ;;  %968 = vmatprep.subr.bf16.mxu0 %v1586_v56  ;;  %v1679_v55 = vld [vmem:[%s2338_s1 + $0x3c4] ss:$8 sps:$4 sm:$0xff]   ;;  %v1674_v56 = vld [vmem:[%s2338_s1 + $0x2c0] ss:$8 sps:$4 sm:$0xff]  }
  0x35   :  { %1009 = vmatprep.subr.bf16.mxu1 %v1588_v57  ;;  %v1677_v57 = vld [vmem:[%s2338_s1 + $0x3c0] ss:$8 sps:$4 sm:$0xff]  }
  0x37   :  { %969 = vmatpush2.bf16.msra.mxu0 %v1590_v58  ;;  %v1682_v58 = vld [vmem:[%s2338_s1 + $0x2b4] ss:$8 sps:$4 sm:$0xff]  }
  0x38   :  { %1010 = vmatpush2.bf16.msra.mxu1 %v1591_v59  ;;  %970 = vmatprep.subr.bf16.mxu0 %v1592_v60  ;;  %v1685_v59 = vld [vmem:[%s2338_s1 + $0x3b4] ss:$8 sps:$4 sm:$0xff]   ;;  %v1680_v60 = vld [vmem:[%s2338_s1 + $0x2b0] ss:$8 sps:$4 sm:$0xff]  }
  0x39   :  { %1011 = vmatprep.subr.bf16.mxu1 %v1594_v61  ;;  %v1683_v61 = vld [vmem:[%s2338_s1 + $0x3b0] ss:$8 sps:$4 sm:$0xff]  }
  0x3b   :  { %971 = vmatpush2.bf16.msra.mxu0 %v1596_v62  ;;  %v1688_v62 = vld [vmem:[%s2338_s1 + $0x2a4] ss:$8 sps:$4 sm:$0xff]  }
  0x3c   :  { %1012 = vmatpush2.bf16.msra.mxu1 %v1597_v63  ;;  %972 = vmatprep.subr.bf16.mxu0 %v1598_v0  ;;  %v1691_v63 = vld [vmem:[%s2338_s1 + $0x3a4] ss:$8 sps:$4 sm:$0xff]   ;;  %v1686_v0 = vld [vmem:[%s2338_s1 + $0x2a0] ss:$8 sps:$4 sm:$0xff]  }
  0x3d   :  { %1013 = vmatprep.subr.bf16.mxu1 %v1600_v1  ;;  %v1689_v1 = vld [vmem:[%s2338_s1 + $0x3a0] ss:$8 sps:$4 sm:$0xff]  }
  0x3f   :  { %973 = vmatpush2.bf16.msra.mxu0 %v1602_v2  ;;  %v1694_v2 = vld [vmem:[%s2338_s1 + $0x294] ss:$8 sps:$4 sm:$0xff]  }
  0x40   :  { %1014 = vmatpush2.bf16.msra.mxu1 %v1603_v3  ;;  %1024 = vmatprep.subr.bf16.mxu0 %v1610_v4  ;;  %v1697_v3 = vld [vmem:[%s2338_s1 + $0x394] ss:$8 sps:$4 sm:$0xff]   ;;  %v1692_v4 = vld [vmem:[%s2338_s1 + $0x290] ss:$8 sps:$4 sm:$0xff]  }
  0x41   :  { %1065 = vmatprep.subr.bf16.mxu1 %v1613_v5  ;;  %v1695_v5 = vld [vmem:[%s2338_s1 + $0x390] ss:$8 sps:$4 sm:$0xff]  }
  0x42   :  { %975 = vmatmul.mubr.bf16.vlgmr.msra.gmra.mxu0 %v1333_v6  ;;  %v1700_v6 = vld [vmem:[%s2338_s1 + $0x284] ss:$8 sps:$4 sm:$0xff]  }
  0x43   :  { %1016 = vmatmul.mubr.bf16.vlgmr.msra.gmra.mxu1 %v1335_v7  ;;  %1025 = vmatpush1.bf16.msra.mxu0 %v1608_v8  ;;  %v1703_v7 = vld [vmem:[%s2338_s1 + $0x384] ss:$8 sps:$4 sm:$0xff]   ;;  %v1698_v8 = vld [vmem:[%s2338_s1 + $0x280] ss:$8 sps:$4 sm:$0xff]  }
  0x44   :  { %1066 = vmatpush1.bf16.msra.mxu1 %v1611_v9  ;;  %1026 = vmatprep.subr.bf16.mxu0 %v1616_v10  ;;  %v1701_v9 = vld [vmem:[%s2338_s1 + $0x380] ss:$8 sps:$4 sm:$0xff]   ;;  %v1710_v10 = vld [vmem:[%s2338_s1 + $0x474] ss:$8 sps:$4 sm:$0xff]  }
  0x45   :  { %1067 = vmatprep.subr.bf16.mxu1 %v1619_v11  ;;  %1056 = vmatprep.mubr.bf16.mxu0 %v1338_v36  ;;  %v1713_v11 = vld [vmem:[%s2340_s4 + $0x74] ss:$8 sps:$4 sm:$0xff]   ;;  %v1741_v36 = vld [vmem:[%s2340_s4 + $0x20] ss:$8 sps:$4 sm:$0xff]  }
  0x46   :  { %1097 = vmatprep.mubr.bf16.mxu1 %v1340_v37  ;;  %v1746_v37 = vld [vmem:[%s2338_s1 + $0x414] ss:$8 sps:$4 sm:$0xff]  }
  0x47   :  { %1027 = vmatpush1.bf16.msra.mxu0 %v1614_v12  ;;  %v1337_v12 = vcombine.low %v2083_v32, %v2083_v32  ;;  %v1735_v32 = vld [vmem:[%s2340_s4 + $0x30] ss:$8 sps:$4 sm:$0xff]  }
  0x48   :  { %1068 = vmatpush1.bf16.msra.mxu1 %v1617_v13  ;;  %1028 = vmatprep.subr.bf16.mxu0 %v1622_v14  ;;  %v1339_v13 = vcombine.low %v2088_v33, %v2088_v33  ;;  %v1708_v14 = vld [vmem:[%s2338_s1 + $0x470] ss:$8 sps:$4 sm:$0xff]   ;;  %v1740_v33 = vld [vmem:[%s2338_s1 + $0x424] ss:$8 sps:$4 sm:$0xff]  }
  0x49   :  { %1069 = vmatprep.subr.bf16.mxu1 %v1625_v15  ;;  %v1711_v15 = vld [vmem:[%s2340_s4 + $0x70] ss:$8 sps:$4 sm:$0xff]  }
  0x4b   :  { %1029 = vmatpush1.bf16.msra.mxu0 %v1620_v16  ;;  %v1716_v16 = vld [vmem:[%s2338_s1 + $0x464] ss:$8 sps:$4 sm:$0xff]  }
  0x4c   :  { %1070 = vmatpush1.bf16.msra.mxu1 %v1623_v17  ;;  %1030 = vmatprep.subr.bf16.mxu0 %v1628_v18  ;;  %v1719_v17 = vld [vmem:[%s2340_s4 + $0x64] ss:$8 sps:$4 sm:$0xff]   ;;  %v1714_v18 = vld [vmem:[%s2338_s1 + $0x460] ss:$8 sps:$4 sm:$0xff]  }
  0x4d   :  { %1071 = vmatprep.subr.bf16.mxu1 %v1631_v19  ;;  %v1717_v19 = vld [vmem:[%s2340_s4 + $0x60] ss:$8 sps:$4 sm:$0xff]  }
  0x4f   :  { %1031 = vmatpush1.bf16.msra.mxu0 %v1626_v20  ;;  %v1722_v20 = vld [vmem:[%s2338_s1 + $0x454] ss:$8 sps:$4 sm:$0xff]  }
  0x50   :  { %1072 = vmatpush1.bf16.msra.mxu1 %v1629_v21  ;;  %1032 = vmatprep.subr.bf16.mxu0 %v1634_v22  ;;  %v1725_v21 = vld [vmem:[%s2340_s4 + $0x54] ss:$8 sps:$4 sm:$0xff]   ;;  %v1757_v22 = vmov 0  }
  0x51   :  { %1073 = vmatprep.subr.bf16.mxu1 %v1637_v23  ;;  %v1720_v23 = vld [vmem:[%s2338_s1 + $0x450] ss:$8 sps:$4 sm:$0xff]  }
  0x53   :  { %1033 = vmatpush1.bf16.msra.mxu0 %v1632_v24  ;;  %v1723_v24 = vld [vmem:[%s2340_s4 + $0x50] ss:$8 sps:$4 sm:$0xff]  }
  0x54   :  { %1074 = vmatpush1.bf16.msra.mxu1 %v1635_v25  ;;  %1034 = vmatprep.subr.bf16.mxu0 %v1640_v26  ;;  %v1728_v25 = vld [vmem:[%s2338_s1 + $0x444] ss:$8 sps:$4 sm:$0xff]  }
  0x55   :  { %1075 = vmatprep.subr.bf16.mxu1 %v1643_v27  ;;  %v1731_v26 = vld [vmem:[%s2340_s4 + $0x44] ss:$8 sps:$4 sm:$0xff]   ;;  %v1726_v27 = vld [vmem:[%s2338_s1 + $0x440] ss:$8 sps:$4 sm:$0xff]  }
  0x57   :  { %1035 = vmatpush1.bf16.msra.mxu0 %v1638_v28  ;;  %v1729_v28 = vld [vmem:[%s2340_s4 + $0x40] ss:$8 sps:$4 sm:$0xff]  }
  0x58   :  { %1076 = vmatpush1.bf16.msra.mxu1 %v1641_v29  ;;  %1036 = vmatprep.subr.bf16.mxu0 %v1646_v30  ;;  %v1734_v29 = vld [vmem:[%s2338_s1 + $0x434] ss:$8 sps:$4 sm:$0xff]  }
  0x59   :  { %1077 = vmatprep.subr.bf16.mxu1 %v1649_v31  ;;  %v1737_v30 = vld [vmem:[%s2340_s4 + $0x34] ss:$8 sps:$4 sm:$0xff]   ;;  %v1732_v31 = vld [vmem:[%s2338_s1 + $0x430] ss:$8 sps:$4 sm:$0xff]  }
  0x5b   :  { %1037 = vmatpush1.bf16.msra.mxu0 %v1644_v34  ;;  %v1743_v34 = vld [vmem:[%s2340_s4 + $0x24] ss:$8 sps:$4 sm:$0xff]  }
  0x5c   :  { %1078 = vmatpush1.bf16.msra.mxu1 %v1647_v35  ;;  %1038 = vmatprep.subr.bf16.mxu0 %v1652_v38  ;;  %v1738_v35 = vld [vmem:[%s2338_s1 + $0x420] ss:$8 sps:$4 sm:$0xff]   ;;  %v1749_v38 = vld [vmem:[%s2340_s4 + $0x14] ss:$8 sps:$4 sm:$0xff]  }
  0x5d   :  { %1079 = vmatprep.subr.bf16.mxu1 %v1655_v39  ;;  %v1744_v39 = vld [vmem:[%s2338_s1 + $0x410] ss:$8 sps:$4 sm:$0xff]  }
  0x5f   :  { %1039 = vmatpush1.bf16.msra.mxu0 %v1650_v40  ;;  %v1747_v40 = vld [vmem:[%s2340_s4 + $0x10] ss:$8 sps:$4 sm:$0xff]  }
  0x60   :  { %1080 = vmatpush1.bf16.msra.mxu1 %v1653_v41  ;;  %1040 = vmatprep.subr.bf16.mxu0 %v1658_v42  ;;  %v1752_v41 = vld [vmem:[%s2338_s1 + $0x404] ss:$8 sps:$4 sm:$0xff]  }
  0x61   :  { %1081 = vmatprep.subr.bf16.mxu1 %v1661_v43  ;;  %v1755_v42 = vld [vmem:[%s2340_s4 + $0x4] ss:$8 sps:$4 sm:$0xff]   ;;  %v1750_v43 = vld [vmem:[%s2338_s1 + $0x400] ss:$8 sps:$4 sm:$0xff]  }
  0x63   :  { %1041 = vmatpush2.bf16.msra.mxu0 %v1656_v44  ;;  %v1753_v44 = vld [vmem:[%s2340_s4] ss:$8 sps:$4 sm:$0xff]  }
  0x64   :  { %1082 = vmatpush2.bf16.msra.mxu1 %v1659_v45  ;;  %1042 = vmatprep.subr.bf16.mxu0 %v1664_v46  ;;  %v1756_v45 = vld [vmem:[%s2339_s0 + $0x20] ss:$0 sps:$4 sm:$0xff]  }
  0x65   :  { %1083 = vmatprep.subr.bf16.mxu1 %v1667_v47  ;;  %v1169_v46 = vld [vmem:[%s2341_s3] sm:$0xf]  ;;  %v180_v47 = vlaneseq }
  0x67   :  { %1043 = vmatpush2.bf16.msra.mxu0 %v1662_v48  ;;  %v181_v48 = vshrl.u32 %v180_v47, 7 }
  0x68   :  { %1084 = vmatpush2.bf16.msra.mxu1 %v1665_v49  ;;  %1044 = vmatprep.subr.bf16.mxu0 %v1670_v50  ;;  %v178_v50 = vld [vmem:[%s2342_s2] sm:$0x3] }
  0x69   :  { %1085 = vmatprep.subr.bf16.mxu1 %v1673_v51  ;;  %v182_v49 = vsub.s32 0, %v181_v48  ;;  %v186_v51 = vsub.s32 1, %v181_v48 }
  0x6b   :  { %1045 = vmatpush2.bf16.msra.mxu0 %v1668_v52  ;;  %v183_v52 = vrot.slane %v178_v50, %v182_v49 }
  0x6c   :  { %1086 = vmatpush2.bf16.msra.mxu1 %v1671_v53  ;;  %1046 = vmatprep.subr.bf16.mxu0 %v1676_v54  ;;  %v187_v53 = vrot.slane %v178_v50, %v186_v51 }
  0x6d   :  { %1087 = vmatprep.subr.bf16.mxu1 %v1679_v55 }
  0x6f   :  { %1047 = vmatpush2.bf16.msra.mxu0 %v1674_v56 }
  0x70   :  { %1088 = vmatpush2.bf16.msra.mxu1 %v1677_v57  ;;  %1048 = vmatprep.subr.bf16.mxu0 %v1682_v58 }
  0x71   :  { %1089 = vmatprep.subr.bf16.mxu1 %v1685_v59 }
  0x73   :  { %1049 = vmatpush2.bf16.msra.mxu0 %v1680_v60 }
  0x74   :  { %1090 = vmatpush2.bf16.msra.mxu1 %v1683_v61  ;;  %1050 = vmatprep.subr.bf16.mxu0 %v1688_v62 }
  0x75   :  { %1091 = vmatprep.subr.bf16.mxu1 %v1691_v63 }
  0x77   :  { %1051 = vmatpush2.bf16.msra.mxu0 %v1686_v0 }
  0x78   :  { %1092 = vmatpush2.bf16.msra.mxu1 %v1689_v1  ;;  %1052 = vmatprep.subr.bf16.mxu0 %v1694_v2 }
  0x79   :  { %1093 = vmatprep.subr.bf16.mxu1 %v1697_v3 }
  0x7b   :  { %1053 = vmatpush2.bf16.msra.mxu0 %v1692_v4 }
  0x7c   :  { %1094 = vmatpush2.bf16.msra.mxu1 %v1695_v5  ;;  %1054 = vmatprep.subr.bf16.mxu0 %v1700_v6 }
  0x7d   :  { %1095 = vmatprep.subr.bf16.mxu1 %v1703_v7 }
  0x7f   :  { %1055 = vmatpush2.bf16.msra.mxu0 %v1698_v8 }
  0x80   :  { %1096 = vmatpush2.bf16.msra.mxu1 %v1701_v9  ;;  %1106 = vmatprep.subr.bf16.mxu0 %v1710_v10 }
  0x81   :  { %1278 = vmatprep.subr.bf16.mxu1 %v1713_v11  ;;  %v1147_v11 = vld [vmem:[%s2343_s6] sm:$0xff] }
  0x82   :  { %1057 = vmatmul.mubr.bf16.vlgmr.msra.gmra.mxu0 %v1337_v12  ;;  %vm1149_vm0 = vcmp.gt.f32.partialorder %v1147_v11, 1.0 }
  0x83   :  { %1098 = vmatmul.mubr.bf16.vlgmr.msra.gmra.mxu1 %v1339_v13  ;;  %1107 = vmatpush1.bf16.msra.mxu0 %v1708_v14  ;;  %v1148_v13 = vld [vmem:[%s2343_s6 + $0x8] sm:$0xff]  ;;  %v1186_v14 = vld [vmem:[%s2344_s5] sm:$0x3] }
  0x84   :  { %1279 = vmatpush1.bf16.msra.mxu1 %v1711_v15  ;;  %1108 = vmatprep.subr.bf16.mxu0 %v1716_v16  ;;  %v1155_v16 = vmul.f32 0.9, %v1147_v11  ;;  %vm1150_vm1 = vcmp.gt.f32.partialorder %v1148_v13, 1.0 }
  0x85   :  { %1280 = vmatprep.subr.bf16.mxu1 %v1719_v17  ;;  %1138 = vmatprep.mubr.bf16.mxu0 %v1757_v22 }
  0x86   :  { %1310 = vmatprep.mubr.bf16.mxu1 %v1757_v22  ;;  %v1191_v22 = vrot.slane %v1186_v14, %v182_v49 }
  0x87   :  { %1109 = vmatpush1.bf16.msra.mxu0 %v1714_v18 }
  0x88   :  { %1281 = vmatpush1.bf16.msra.mxu1 %v1717_v19  ;;  %1110 = vmatprep.subr.bf16.mxu0 %v1722_v20  ;;  %v1156_v19 = vmul.f32 0.9, %v1148_v13 }
  0x89   :  { %1282 = vmatprep.subr.bf16.mxu1 %v1725_v21 }
  0x8b   :  { %1111 = vmatpush1.bf16.msra.mxu0 %v1720_v23  ;;  %v1758_v23 = vmov 0.0  }
  0x8c   :  { %1283 = vmatpush1.bf16.msra.mxu1 %v1723_v24  ;;  %1112 = vmatprep.subr.bf16.mxu0 %v1728_v25  ;;  %v1486_v24 = vsel %vm1149_vm0, 1.0, %v1758_v23 }
  0x8d   :  { %1284 = vmatprep.subr.bf16.mxu1 %v1731_v26 }
  0x8f   :  { %1113 = vmatpush1.bf16.msra.mxu0 %v1726_v27 }
  0x90   :  { %1285 = vmatpush1.bf16.msra.mxu1 %v1729_v28  ;;  %1114 = vmatprep.subr.bf16.mxu0 %v1734_v29  ;;  %v1487_v29 = vsel %vm1150_vm1, 1.0, %v1758_v23 }
  0x91   :  { %1286 = vmatprep.subr.bf16.mxu1 %v1737_v30 }
  0x93   :  { %1115 = vmatpush1.bf16.msra.mxu0 %v1732_v31 }
  0x94   :  { %1287 = vmatpush1.bf16.msra.mxu1 %v1735_v32  ;;  %1116 = vmatprep.subr.bf16.mxu0 %v1740_v33 }
  0x95   :  { %1288 = vmatprep.subr.bf16.mxu1 %v1743_v34 }
  0x97   :  { %1117 = vmatpush1.bf16.msra.mxu0 %v1738_v35  ;;  %v1195_v35 = vrot.slane %v1186_v14, %v186_v51 }
  0x98   :  { %1289 = vmatpush1.bf16.msra.mxu1 %v1741_v36  ;;  %1118 = vmatprep.subr.bf16.mxu0 %v1746_v37 }
  0x99   :  { %1290 = vmatprep.subr.bf16.mxu1 %v1749_v38 }
  0x9b   :  { %1119 = vmatpush1.bf16.msra.mxu0 %v1744_v39 }
  0x9c   :  { %1291 = vmatpush1.bf16.msra.mxu1 %v1747_v40  ;;  %1120 = vmatprep.subr.bf16.mxu0 %v1752_v41 }
  0x9d   :  { %1292 = vmatprep.subr.bf16.mxu1 %v1755_v42 }
  0x9f   :  { %1121 = vmatpush1.bf16.msra.mxu0 %v1750_v43 }
  0xa0   :  { %1293 = vmatpush1.bf16.msra.mxu1 %v1753_v44 }
  0xa2   :  { %1139 = vmatmul.mubr.bf16.vlgmr.msra.gmra.mxu0 %v1756_v45 }
  0xa3   :  { %1311 = vmatmul.mubr.bf16.vlgmr.msra.gmra.mxu1 %v1169_v46 }
 0x102   :  { %v976_v54 = vpop.f32.mrf.mxu0 }
 0x103   :  { %v1017_v55 = vpop.f32.mrf.mxu1  ;;  %v977_v56 = vadd.f32 %v976_v54, %v183_v52 }
 0x104   :  { %v978_v57 = vpop.f32.mrf.mxu0 }
 0x105   :  { %v1019_v58 = vpop.f32.mrf.mxu1  ;;  %v1018_v59 = vadd.f32 %v1017_v55, %v977_v56  ;;  %v979_v60 = vadd.f32 %v978_v57, %v187_v53 }
 0x106   :  { %v980_v61 = vpop.f32.mrf.mxu0 }
 0x107   :  { %v1021_v62 = vpop.f32.mrf.mxu1  ;;  %v1020_v63 = vadd.f32 %v1019_v58, %v979_v60 }
 0x108   :  { %v981_v0 = vpop.f32.mrf.mxu0 }
 0x109   :  { %v1022_v1 = vpop.f32.mrf.mxu1 }
 0x142   :  { %v1058_v2 = vpop.f32.mrf.mxu0 }
 0x143   :  { %v1099_v3 = vpop.f32.mrf.mxu1  ;;  %v1059_v10 = vadd.f32 %v1058_v2, %v1018_v59 }
 0x144   :  { %v1060_v4 = vpop.f32.mrf.mxu0 }
 0x145   :  { %v1101_v5 = vpop.f32.mrf.mxu1  ;;  %v1061_v12 = vadd.f32 %v1060_v4, %v1020_v63  ;;  %v1100_v15 = vadd.f32 %v1099_v3, %v1059_v10 }
 0x146   :  { %v1062_v6 = vpop.f32.mrf.mxu0 }
 0x147   :  { %v1103_v7 = vpop.f32.mrf.mxu1  ;;  %v1102_v20 = vadd.f32 %v1101_v5, %v1061_v12 }
 0x148   :  { %v1063_v8 = vpop.f32.mrf.mxu0 }
 0x149   :  { %v1104_v9 = vpop.f32.mrf.mxu1 }
 0x162   :  { %v1140_v17 = vpop.f32.mrf.mxu0 }
 0x163   :  { %v1312_v18 = vpop.f32.mrf.mxu1  ;;  %v1141_v21 = vadd.f32 %v1140_v17, %v1100_v15 }
 0x164   :  { %v1142_v25 = vpop.f32.mrf.mxu0  ;;  %v1313_v33 = vadd.f32 %v1312_v18, %v1191_v22 }
 0x165   :  { %v1314_v26 = vpop.f32.mrf.mxu1  ;;  %v1157_v27 = vadd.f32 %v1155_v16, %v1141_v21  ;;  %v1143_v28 = vadd.f32 %v1142_v25, %v1102_v20 }
 0x166   :  { %v1144_v30 = vpop.f32.mrf.mxu0  ;;  %v1315_v41 = vadd.f32 %v1314_v26, %v1195_v35 }
 0x167   :  { %v1316_v31 = vpop.f32.mrf.mxu1  ;;  %v1159_v32 = vsub.f32 %v1157_v27, %v1486_v24  ;;  %v1158_v34 = vadd.f32 %v1156_v19, %v1143_v28 }
 0x168   :  { %v1145_v36 = vpop.f32.mrf.mxu0 }
 0x169   :  { %v1317_v37 = vpop.f32.mrf.mxu1  ;;  %1167 = vst [vmem:[%s2345_s8] sm:$0xff] %v1159_v32  ;;  %vm1161_vm2 = vcmp.gt.f32.partialorder %v1159_v32, 1.0  ;;  %v1160_v38 = vsub.f32 %v1158_v34, %v1487_v29 }
 0x16a   :  { %v1488_v39 = vsel %vm1161_vm2, 1.0, %v1758_v23 }
 0x16b   :  { %v1319_v40 = vadd.f32 %v1488_v39, %v1313_v33  ;;  %1168 = vst [vmem:[%s2345_s8 + $0x8] sm:$0xff] %v1160_v38  ;;  %vm1162_vm3 = vcmp.gt.f32.partialorder %v1160_v38, 1.0 }
 0x16c   :  { %v1489_v42 = vsel %vm1162_vm3, 1.0, %v1758_v23 }
 0x16d   :  { %v1321_v43 = vmax.f32 %v1319_v40, 0.0  ;;  %v1320_v44 = vadd.f32 %v1489_v42, %v1315_v41 }
 0x16f   :  { %1323 = vst [vmem:[%s2346_s7] sm:$0xff] %v1321_v43  ;;  %v1322_v45 = vmax.f32 %v1320_v44, 0.0 }
 0x171   :  { %1324 = vst [vmem:[%s2346_s7 + $0x8] sm:$0xff] %v1322_v45 }

// kernel: snn_yolo_forward.14
= control target key start
LH: loop header
LB: loop body
LE: loop exit
PB: predicated region body
PF: predicated region fallthrough
CT: control target
= control target key end

     0   :  { %vm34_vm0 = vcmask 1043456   ;;  %vm166_vm1 = vcmask 1041409   ;;  %vm936_vm3 = vcmask 517120   ;;  %s1577_s1 = inlined_call_operand.vmem [shape: bf16[256,512], index: 1, kind: input, shape index: {}]   ;;  %s1578_s0 = inlined_call_operand.vmem [shape: f32[2,4,256], index: 0, kind: input, shape index: {}]   ;;  %s1579_s3 = inlined_call_operand.vmem [shape: bf16[512,64], index: 3, kind: input, shape index: {}]   ;;  %s1580_s2 = inlined_call_operand.vmem [shape: f32[1,512], index: 2, kind: input, shape index: {}]   ;;  %s1581_s4 = inlined_call_operand.vmem [shape: f32[1,64], index: 4, kind: input, shape index: {}]   ;;  %s1582_s5 = inlined_call_operand.vmem [shape: f32[2,64], index: 5, kind: input, shape index: {}, may-alias: {5,7}]   ;;  %s1583_s7 = inlined_call_operand.vmem [shape: f32[2,64], index: 7, kind: output, shape index: {1}, may-alias: {5,7}]   ;;  %s1584_s6 = inlined_call_operand.vmem [shape: f32[2,64], index: 6, kind: output, shape index: {0}]  }
   0x1   :  { %v1091_v0 = vld [vmem:[%s1577_s1 + $0xe4] ss:$16 sps:$4 sm:$0xff]   ;;  %v1093_v1 = vld [vmem:[%s1577_s1 + $0xec] ss:$16 sps:$4 sm:$0xff]   ;;  %v1095_v2 = vld [vmem:[%s1577_s1 + $0xe0] ss:$16 sps:$4 sm:$0xff]  }
   0x2   :  { %493 = vmatprep.subr.bf16.mxu0 %v1091_v0  ;;  %v1096_v3 = vld [vmem:[%s1577_s1 + $0xe8] ss:$16 sps:$4 sm:$0xff]   ;;  %534 = vmatprep.subr.bf16.mxu1 %v1093_v1  ;;  %v1097_v4 = vld [vmem:[%s1577_s1 + $0xc4] ss:$16 sps:$4 sm:$0xff]   ;;  %v1099_v5 = vld [vmem:[%s1577_s1 + $0xcc] ss:$16 sps:$4 sm:$0xff]  }
   0x3   :  { %494 = vmatpush1.bf16.msra.mxu0 %v1095_v2  ;;  %535 = vmatpush1.bf16.msra.mxu1 %v1096_v3  ;;  %v1101_v6 = vld [vmem:[%s1577_s1 + $0xc0] ss:$16 sps:$4 sm:$0xff]   ;;  %v1102_v7 = vld [vmem:[%s1577_s1 + $0xc8] ss:$16 sps:$4 sm:$0xff]   ;;  %v1103_v8 = vld [vmem:[%s1577_s1 + $0xa4] ss:$16 sps:$4 sm:$0xff]  }
   0x4   :  { %495 = vmatprep.subr.bf16.mxu0 %v1097_v4  ;;  %536 = vmatprep.subr.bf16.mxu1 %v1099_v5  ;;  %v1105_v9 = vld [vmem:[%s1577_s1 + $0xac] ss:$16 sps:$4 sm:$0xff]   ;;  %v1107_v10 = vld [vmem:[%s1577_s1 + $0xa0] ss:$16 sps:$4 sm:$0xff]   ;;  %v1108_v11 = vld [vmem:[%s1577_s1 + $0xa8] ss:$16 sps:$4 sm:$0xff]  }
   0x5   :  { %v1109_v12 = vld [vmem:[%s1577_s1 + $0x84] ss:$16 sps:$4 sm:$0xff]   ;;  %v1111_v13 = vld [vmem:[%s1577_s1 + $0x8c] ss:$16 sps:$4 sm:$0xff]   ;;  %v1113_v14 = vld [vmem:[%s1577_s1 + $0x80] ss:$16 sps:$4 sm:$0xff]  }
   0x6   :  { %v1114_v15 = vld [vmem:[%s1577_s1 + $0x88] ss:$16 sps:$4 sm:$0xff]   ;;  %v1115_v16 = vld [vmem:[%s1577_s1 + $0x64] ss:$16 sps:$4 sm:$0xff]   ;;  %v1117_v17 = vld [vmem:[%s1577_s1 + $0x6c] ss:$16 sps:$4 sm:$0xff]  }
   0x7   :  { %496 = vmatpush1.bf16.msra.mxu0 %v1101_v6  ;;  %537 = vmatpush1.bf16.msra.mxu1 %v1102_v7  ;;  %v1119_v18 = vld [vmem:[%s1577_s1 + $0x60] ss:$16 sps:$4 sm:$0xff]   ;;  %v1120_v19 = vld [vmem:[%s1577_s1 + $0x68] ss:$16 sps:$4 sm:$0xff]   ;;  %v1121_v20 = vld [vmem:[%s1577_s1 + $0x44] ss:$16 sps:$4 sm:$0xff]  }
   0x8   :  { %497 = vmatprep.subr.bf16.mxu0 %v1103_v8  ;;  %538 = vmatprep.subr.bf16.mxu1 %v1105_v9  ;;  %v1123_v21 = vld [vmem:[%s1577_s1 + $0x4c] ss:$16 sps:$4 sm:$0xff]   ;;  %v1125_v22 = vld [vmem:[%s1577_s1 + $0x40] ss:$16 sps:$4 sm:$0xff]   ;;  %v1126_v23 = vld [vmem:[%s1577_s1 + $0x48] ss:$16 sps:$4 sm:$0xff]  }
   0x9   :  { %v1127_v24 = vld [vmem:[%s1577_s1 + $0x24] ss:$16 sps:$4 sm:$0xff]   ;;  %v1129_v25 = vld [vmem:[%s1577_s1 + $0x2c] ss:$16 sps:$4 sm:$0xff]   ;;  %v1131_v26 = vld [vmem:[%s1577_s1 + $0x20] ss:$16 sps:$4 sm:$0xff]  }
   0xa   :  { %v1132_v27 = vld [vmem:[%s1577_s1 + $0x28] ss:$16 sps:$4 sm:$0xff]   ;;  %v1133_v28 = vld [vmem:[%s1577_s1 + $0x4] ss:$16 sps:$4 sm:$0xff]   ;;  %v1135_v29 = vld [vmem:[%s1577_s1 + $0xc] ss:$16 sps:$4 sm:$0xff]  }
   0xb   :  { %498 = vmatpush1.bf16.msra.mxu0 %v1107_v10  ;;  %539 = vmatpush1.bf16.msra.mxu1 %v1108_v11  ;;  %v1137_v30 = vld [vmem:[%s1577_s1] ss:$16 sps:$4 sm:$0xff]   ;;  %v1138_v31 = vld [vmem:[%s1577_s1 + $0x8] ss:$16 sps:$4 sm:$0xff]   ;;  %v1139_v32 = vld [vmem:[%s1577_s1 + $0x1e4] ss:$16 sps:$4 sm:$0xff]  }
   0xc   :  { %499 = vmatprep.subr.bf16.mxu0 %v1109_v12  ;;  %540 = vmatprep.subr.bf16.mxu1 %v1111_v13  ;;  %v1141_v33 = vld [vmem:[%s1577_s1 + $0x1ec] ss:$16 sps:$4 sm:$0xff]   ;;  %v1143_v34 = vld [vmem:[%s1577_s1 + $0x1e0] ss:$16 sps:$4 sm:$0xff]   ;;  %v1144_v35 = vld [vmem:[%s1577_s1 + $0x1e8] ss:$16 sps:$4 sm:$0xff]  }
   0xd   :  { %v1145_v36 = vld [vmem:[%s1577_s1 + $0x1c4] ss:$16 sps:$4 sm:$0xff]   ;;  %v1147_v37 = vld [vmem:[%s1577_s1 + $0x1cc] ss:$16 sps:$4 sm:$0xff]   ;;  %v1149_v38 = vld [vmem:[%s1577_s1 + $0x1c0] ss:$16 sps:$4 sm:$0xff]  }
   0xe   :  { %v1150_v39 = vld [vmem:[%s1577_s1 + $0x1c8] ss:$16 sps:$4 sm:$0xff]   ;;  %v1151_v40 = vld [vmem:[%s1577_s1 + $0x1a4] ss:$16 sps:$4 sm:$0xff]   ;;  %v1153_v41 = vld [vmem:[%s1577_s1 + $0x1ac] ss:$16 sps:$4 sm:$0xff]  }
   0xf   :  { %500 = vmatpush1.bf16.msra.mxu0 %v1113_v14  ;;  %541 = vmatpush1.bf16.msra.mxu1 %v1114_v15  ;;  %v1155_v42 = vld [vmem:[%s1577_s1 + $0x1a0] ss:$16 sps:$4 sm:$0xff]   ;;  %v1156_v43 = vld [vmem:[%s1577_s1 + $0x1a8] ss:$16 sps:$4 sm:$0xff]   ;;  %v1157_v44 = vld [vmem:[%s1577_s1 + $0x184] ss:$16 sps:$4 sm:$0xff]  }
  0x10   :  { %501 = vmatprep.subr.bf16.mxu0 %v1115_v16  ;;  %542 = vmatprep.subr.bf16.mxu1 %v1117_v17  ;;  %v1159_v45 = vld [vmem:[%s1577_s1 + $0x18c] ss:$16 sps:$4 sm:$0xff]   ;;  %v1161_v46 = vld [vmem:[%s1577_s1 + $0x180] ss:$16 sps:$4 sm:$0xff]   ;;  %v1162_v47 = vld [vmem:[%s1577_s1 + $0x188] ss:$16 sps:$4 sm:$0xff]  }
  0x11   :  { %v26_v48 = vld [vmem:[%s1578_s0] sm:$0xff]  ;;  %v27_v50 = vld [vmem:[%s1578_s0 + $0x8] sm:$0xff] }
  0x12   :  { %v1163_v49 = vld [vmem:[%s1577_s1 + $0x164] ss:$16 sps:$4 sm:$0xff]   ;;  %v30_v51 = vcombine.high %v26_v48, %v26_v48  ;;  %v35_v52 = vsel %vm34_vm0, %v26_v48, 0.0  ;;  %v1165_v53 = vld [vmem:[%s1577_s1 + $0x16c] ss:$16 sps:$4 sm:$0xff]   ;;  %v31_v54 = vcombine.high %v27_v50, %v27_v50  ;;  %v49_v56 = vsel %vm34_vm0, %v27_v50, 0.0 }
  0x13   :  { %502 = vmatpush1.bf16.msra.mxu0 %v1119_v18  ;;  %543 = vmatpush1.bf16.msra.mxu1 %v1120_v19  ;;  %v36_v55 = vrot.slane %v35_v52, 4  ;;  %v50_v58 = vrot.slane %v49_v56, 4  ;;  %v1167_v59 = vld [vmem:[%s1577_s1 + $0x160] ss:$16 sps:$4 sm:$0xff]   ;;  %v1168_v60 = vld [vmem:[%s1577_s1 + $0x168] ss:$16 sps:$4 sm:$0xff]  }
  0x14   :  { %503 = vmatprep.subr.bf16.mxu0 %v1121_v20  ;;  %544 = vmatprep.subr.bf16.mxu1 %v1123_v21  ;;  %v42_v57 = vsel %vm34_vm0, %v30_v51, 0.0  ;;  %v56_v62 = vsel %vm34_vm0, %v31_v54, 0.0  ;;  %v1169_v0 = vld [vmem:[%s1577_s1 + $0x144] ss:$16 sps:$4 sm:$0xff]   ;;  %v1171_v1 = vld [vmem:[%s1577_s1 + $0x14c] ss:$16 sps:$4 sm:$0xff]  }
  0x15   :  { %v43_v61 = vrot.slane %v42_v57, 4  ;;  %v37_v63 = vadd.f32 %v36_v55, %v35_v52  ;;  %v57_v2 = vrot.slane %v56_v62, 4  ;;  %v51_v3 = vadd.f32 %v50_v58, %v49_v56  ;;  %v1173_v8 = vld [vmem:[%s1577_s1 + $0x140] ss:$16 sps:$4 sm:$0xff]   ;;  %v1174_v9 = vld [vmem:[%s1577_s1 + $0x148] ss:$16 sps:$4 sm:$0xff]  }
  0x16   :  { %v1175_v12 = vld [vmem:[%s1577_s1 + $0x124] ss:$16 sps:$4 sm:$0xff]   ;;  %v1177_v13 = vld [vmem:[%s1577_s1 + $0x12c] ss:$16 sps:$4 sm:$0xff]   ;;  %v1179_v20 = vld [vmem:[%s1577_s1 + $0x120] ss:$16 sps:$4 sm:$0xff]  }
  0x17   :  { %504 = vmatpush1.bf16.msra.mxu0 %v1125_v22  ;;  %545 = vmatpush1.bf16.msra.mxu1 %v1126_v23  ;;  %v44_v4 = vadd.f32 %v43_v61, %v42_v57  ;;  %v38_v5 = vrot.slane %v37_v63, 2  ;;  %v58_v6 = vadd.f32 %v57_v2, %v56_v62  ;;  %v52_v7 = vrot.slane %v51_v3, 2  ;;  %v1180_v21 = vld [vmem:[%s1577_s1 + $0x128] ss:$16 sps:$4 sm:$0xff]   ;;  %v1193_v52 = vld [vmem:[%s1579_s3 + $0x70] sm:$0xff]   ;;  %v1202_v61 = vld [vmem:[%s1579_s3 + $0xe0] sm:$0xff]  }
  0x18   :  { %505 = vmatprep.subr.bf16.mxu0 %v1127_v24  ;;  %546 = vmatprep.subr.bf16.mxu1 %v1129_v25  ;;  %v1181_v24 = vld [vmem:[%s1577_s1 + $0x104] ss:$16 sps:$4 sm:$0xff]   ;;  %v1183_v25 = vld [vmem:[%s1577_s1 + $0x10c] ss:$16 sps:$4 sm:$0xff]  }
  0x19   :  { %v45_v10 = vrot.slane %v44_v4, 2  ;;  %v39_v11 = vadd.f32 %v38_v5, %v37_v63  ;;  %v59_v14 = vrot.slane %v58_v6, 2  ;;  %v53_v15 = vadd.f32 %v52_v7, %v51_v3  ;;  %v1192_v51 = vld [vmem:[%s1579_s3 + $0xb8] sm:$0xff]   ;;  %v1195_v54 = vld [vmem:[%s1579_s3 + $0x30] sm:$0xff]   ;;  %v1197_v56 = vld [vmem:[%s1579_s3 + $0x68] sm:$0xff]  }
  0x1a   :  { %v1196_v55 = vld [vmem:[%s1579_s3 + $0xb0] sm:$0xff]   ;;  %v1198_v57 = vld [vmem:[%s1579_s3 + $0xe8] sm:$0xff]   ;;  %v1203_v62 = vld [vmem:[%s1579_s3 + $0x20] sm:$0xff]  }
  0x1b   :  { %506 = vmatpush1.bf16.msra.mxu0 %v1131_v26  ;;  %547 = vmatpush1.bf16.msra.mxu1 %v1132_v27  ;;  %v46_v16 = vadd.f32 %v45_v10, %v44_v4  ;;  %v40_v17 = vrot.slane %v39_v11, 1  ;;  %v60_v18 = vadd.f32 %v59_v14, %v58_v6  ;;  %v54_v19 = vrot.slane %v53_v15, 1  ;;  %v1199_v58 = vld [vmem:[%s1579_s3 + $0x28] sm:$0xff]   ;;  %v1204_v63 = vld [vmem:[%s1579_s3 + $0xa0] sm:$0xff]   ;;  %v1207_v2 = vld [vmem:[%s1579_s3 + $0x18] sm:$0xff]  }
  0x1c   :  { %507 = vmatprep.subr.bf16.mxu0 %v1133_v28  ;;  %548 = vmatprep.subr.bf16.mxu1 %v1135_v29  ;;  %v1208_v3 = vld [vmem:[%s1579_s3 + $0x98] sm:$0xff]   ;;  %v1209_v4 = vld [vmem:[%s1579_s3 + $0x50] sm:$0xff]   ;;  %v1215_v10 = vld [vmem:[%s1579_s3 + $0x8] sm:$0xff]  }
  0x1d   :  { %v47_v22 = vrot.slane %v46_v16, 1  ;;  %v41_v23 = vadd.f32 %v40_v17, %v39_v11  ;;  %v61_v26 = vrot.slane %v60_v18, 1  ;;  %v55_v27 = vadd.f32 %v54_v19, %v53_v15  ;;  %v1210_v5 = vld [vmem:[%s1579_s3 + $0xd0] sm:$0xff]   ;;  %v1216_v11 = vld [vmem:[%s1579_s3 + $0x88] sm:$0xff]   ;;  %v1219_v14 = vld [vmem:[%s1579_s3] sm:$0xff]  }
  0x1e   :  { %v1211_v6 = vld [vmem:[%s1579_s3 + $0x10] sm:$0xff]   ;;  %v1220_v15 = vld [vmem:[%s1579_s3 + $0x80] sm:$0xff]  }
  0x1f   :  { %508 = vmatpush1.bf16.msra.mxu0 %v1137_v30  ;;  %549 = vmatpush1.bf16.msra.mxu1 %v1138_v31  ;;  %v48_v28 = vadd.f32 %v47_v22, %v46_v16  ;;  %v64_v29 = vmul.f32 0.25, %v41_v23  ;;  %v62_v30 = vadd.f32 %v61_v26, %v60_v18  ;;  %v66_v31 = vmul.f32 0.25, %v55_v27  ;;  %v1212_v7 = vld [vmem:[%s1579_s3 + $0x90] sm:$0xff]  }
  0x20   :  { %509 = vmatprep.subr.bf16.mxu0 %v1139_v32  ;;  %550 = vmatprep.subr.bf16.mxu1 %v1141_v33  ;;  %v1185_v32 = vld [vmem:[%s1577_s1 + $0x100] ss:$16 sps:$4 sm:$0xff]   ;;  %v1186_v33 = vld [vmem:[%s1577_s1 + $0x108] ss:$16 sps:$4 sm:$0xff]   ;;  %v138_v16 = vlaneseq }
  0x22   :  { %v139_v17 = vshrl.u32 %v138_v16, 7 }
  0x23   :  { %510 = vmatpush2.bf16.msra.mxu0 %v1143_v34  ;;  %551 = vmatpush2.bf16.msra.mxu1 %v1144_v35  ;;  %v65_v34 = vmul.f32 0.25, %v48_v28  ;;  %v68_v35 = vpack.c.bf16 %v64_v29, %v64_v29 }
  0x24   :  { %511 = vmatprep.subr.bf16.mxu0 %v1145_v36  ;;  %552 = vmatprep.subr.bf16.mxu1 %v1147_v37  ;;  %v67_v36 = vmul.f32 0.25, %v62_v30  ;;  %v70_v37 = vpack.c.bf16 %v66_v31, %v66_v31  ;;  %v140_v18 = vsub.s32 0, %v139_v17  ;;  %v148_v19 = vsub.s32 2, %v139_v17 }
  0x25   :  { %v152_v22 = vsub.s32 3, %v139_v17 }
  0x27   :  { %512 = vmatpush2.bf16.msra.mxu0 %v1149_v38  ;;  %553 = vmatpush2.bf16.msra.mxu1 %v1150_v39  ;;  %v1189_v38 = vld [vmem:[%s1579_s3 + $0x78] sm:$0xff]   ;;  %v69_v39 = vpack.c.bf16 %v65_v34, %v65_v34 }
  0x28   :  { %513 = vmatprep.subr.bf16.mxu0 %v1151_v40  ;;  %554 = vmatprep.subr.bf16.mxu1 %v1153_v41  ;;  %v162_v40 = vunpack.c.l.b16 %v68_v35  ;;  %v71_v41 = vpack.c.bf16 %v67_v36, %v67_v36 }
  0x2b   :  { %514 = vmatpush2.bf16.msra.mxu0 %v1155_v42  ;;  %555 = vmatpush2.bf16.msra.mxu1 %v1156_v43  ;;  %v164_v42 = vunpack.c.l.b16 %v70_v37  ;;  %v1190_v43 = vld [vmem:[%s1579_s3 + $0xf8] sm:$0xff]  }
  0x2c   :  { %515 = vmatprep.subr.bf16.mxu0 %v1157_v44  ;;  %556 = vmatprep.subr.bf16.mxu1 %v1159_v45  ;;  %v163_v44 = vunpack.c.l.b16 %v69_v39  ;;  %v165_v45 = vunpack.c.l.b16 %v71_v41 }
  0x2f   :  { %516 = vmatpush2.bf16.msra.mxu0 %v1161_v46  ;;  %557 = vmatpush2.bf16.msra.mxu1 %v1162_v47  ;;  %v167_v46 = vsel %vm166_vm1, %v164_v42, %v162_v40  ;;  %v168_v47 = vsel %vm166_vm1, %v165_v45, %v163_v44 }
  0x30   :  { %517 = vmatprep.subr.bf16.mxu0 %v1163_v49  ;;  %558 = vmatprep.subr.bf16.mxu1 %v1165_v53  ;;  %v169_v48 = vpack.c.b16 %v167_v46, %v167_v46  ;;  %v1191_v49 = vld [vmem:[%s1579_s3 + $0x38] sm:$0xff]   ;;  %v170_v50 = vpack.c.b16 %v168_v47, %v168_v47  ;;  %v1194_v53 = vld [vmem:[%s1579_s3 + $0xf0] sm:$0xff]  }
  0x32   :  { %525 = vmatprep.mubr.bf16.mxu0 %v170_v50  ;;  %566 = vmatprep.mubr.bf16.mxu1 %v170_v50 }
  0x33   :  { %518 = vmatpush2.bf16.msra.mxu0 %v1167_v59  ;;  %559 = vmatpush2.bf16.msra.mxu1 %v1168_v60  ;;  %v1200_v59 = vld [vmem:[%s1579_s3 + $0xa8] sm:$0xff]   ;;  %v1201_v60 = vld [vmem:[%s1579_s3 + $0x60] sm:$0xff]  }
  0x34   :  { %519 = vmatprep.subr.bf16.mxu0 %v1169_v0  ;;  %560 = vmatprep.subr.bf16.mxu1 %v1171_v1  ;;  %v1205_v0 = vld [vmem:[%s1579_s3 + $0x58] sm:$0xff]  }
  0x35   :  { %v1206_v1 = vld [vmem:[%s1579_s3 + $0xd8] sm:$0xff]  }
  0x37   :  { %520 = vmatpush2.bf16.msra.mxu0 %v1173_v8  ;;  %561 = vmatpush2.bf16.msra.mxu1 %v1174_v9  ;;  %v1213_v8 = vld [vmem:[%s1579_s3 + $0x48] sm:$0xff]  }
  0x38   :  { %521 = vmatprep.subr.bf16.mxu0 %v1175_v12  ;;  %562 = vmatprep.subr.bf16.mxu1 %v1177_v13  ;;  %v1214_v9 = vld [vmem:[%s1579_s3 + $0xc8] sm:$0xff]   ;;  %v1217_v12 = vld [vmem:[%s1579_s3 + $0x40] sm:$0xff]  }
  0x39   :  { %v1218_v13 = vld [vmem:[%s1579_s3 + $0xc0] sm:$0xff]  }
  0x3b   :  { %522 = vmatpush2.bf16.msra.mxu0 %v1179_v20  ;;  %563 = vmatpush2.bf16.msra.mxu1 %v1180_v21  ;;  %v136_v20 = vld [vmem:[%s1580_s2] sm:$0xf]  ;;  %v144_v21 = vsub.s32 1, %v139_v17 }
  0x3c   :  { %523 = vmatprep.subr.bf16.mxu0 %v1181_v24  ;;  %564 = vmatprep.subr.bf16.mxu1 %v1183_v25  ;;  %v141_v23 = vrot.slane %v136_v20, %v140_v18  ;;  %v149_v24 = vrot.slane %v136_v20, %v148_v19  ;;  %v153_v26 = vrot.slane %v136_v20, %v152_v22 }
  0x3d   :  { %v145_v25 = vrot.slane %v136_v20, %v144_v21 }
  0x3f   :  { %524 = vmatpush2.bf16.msra.mxu0 %v1185_v32  ;;  %565 = vmatpush2.bf16.msra.mxu1 %v1186_v33 }
  0x40   :  { %1046 = vmatprep.subr.bf16.mxu0 %v1189_v38  ;;  %1068 = vmatprep.subr.bf16.mxu1 %v1190_v43 }
  0x42   :  { %526 = vmatmul.mubr.bf16.vlgmr.msra.gmra.mxu0 %v169_v48  ;;  %567 = vmatmul.mubr.bf16.vlgmr.msra.gmra.mxu1 %v169_v48 }
  0x43   :  { %1047 = vmatpush3.bf16.msra.mxu0 %v1191_v49  ;;  %1069 = vmatpush3.bf16.msra.mxu1 %v1192_v51  ;;  %v1011_v49 = vld [vmem:[%s1581_s4] ss:$0 sm:$0xff] }
  0x44   :  { %1048 = vmatprep.subr.bf16.mxu0 %v1193_v52  ;;  %1070 = vmatprep.subr.bf16.mxu1 %v1194_v53  ;;  %v926_v52 = vld [vmem:[%s1582_s5] sm:$0x3] }
  0x45   :  { %vm927_vm2 = vcmp.gt.f32.partialorder %v926_v52, 1.0 }
  0x47   :  { %1049 = vmatpush3.bf16.msra.mxu0 %v1195_v54  ;;  %1071 = vmatpush3.bf16.msra.mxu1 %v1196_v55 }
  0x48   :  { %1050 = vmatprep.subr.bf16.mxu0 %v1197_v56  ;;  %1072 = vmatprep.subr.bf16.mxu1 %v1198_v57 }
  0x4b   :  { %1051 = vmatpush3.bf16.msra.mxu0 %v1199_v58  ;;  %1073 = vmatpush3.bf16.msra.mxu1 %v1200_v59  ;;  %v930_v58 = vmul.f32 0.9, %v926_v52 }
  0x4c   :  { %1052 = vmatprep.subr.bf16.mxu0 %v1201_v60  ;;  %1074 = vmatprep.subr.bf16.mxu1 %v1202_v61 }
  0x4f   :  { %1053 = vmatpush3.bf16.msra.mxu0 %v1203_v62  ;;  %1075 = vmatpush3.bf16.msra.mxu1 %v1204_v63  ;;  %v1221_v62 = vmov 0.0  }
  0x50   :  { %1054 = vmatprep.subr.bf16.mxu0 %v1205_v0  ;;  %1076 = vmatprep.subr.bf16.mxu1 %v1206_v1  ;;  %v1044_v63 = vsel %vm927_vm2, 1.0, %v1221_v62 }
  0x53   :  { %1055 = vmatpush3.bf16.msra.mxu0 %v1207_v2  ;;  %1077 = vmatpush3.bf16.msra.mxu1 %v1208_v3 }
  0x54   :  { %1056 = vmatprep.subr.bf16.mxu0 %v1209_v4  ;;  %1078 = vmatprep.subr.bf16.mxu1 %v1210_v5 }
  0x57   :  { %1057 = vmatpush3.bf16.msra.mxu0 %v1211_v6  ;;  %1079 = vmatpush3.bf16.msra.mxu1 %v1212_v7 }
  0x58   :  { %1058 = vmatprep.subr.bf16.mxu0 %v1213_v8  ;;  %1080 = vmatprep.subr.bf16.mxu1 %v1214_v9 }
  0x5b   :  { %1059 = vmatpush3.bf16.msra.mxu0 %v1215_v10  ;;  %1081 = vmatpush3.bf16.msra.mxu1 %v1216_v11 }
  0x5c   :  { %1060 = vmatprep.subr.bf16.mxu0 %v1217_v12  ;;  %1082 = vmatprep.subr.bf16.mxu1 %v1218_v13 }
  0x5f   :  { %1061 = vmatpush3.bf16.msra.mxu0 %v1219_v14  ;;  %1083 = vmatpush3.bf16.msra.mxu1 %v1220_v15 }
 0x102   :  { %v527_v27 = vpop.f32.mrf.mxu0  ;;  %v568_v28 = vpop.f32.mrf.mxu1 }
 0x103   :  { %v528_v29 = vadd.f32 %v527_v27, %v141_v23  ;;  %v569_v30 = vadd.f32 %v568_v28, %v149_v24 }
 0x104   :  { %v529_v31 = vpop.f32.mrf.mxu0  ;;  %v570_v32 = vpop.f32.mrf.mxu1 }
 0x105   :  { %v577_v33 = vmax.f32 %v569_v30, 0.0  ;;  %v530_v34 = vadd.f32 %v529_v31, %v145_v25  ;;  %v571_v35 = vadd.f32 %v570_v32, %v153_v26  ;;  %v575_v36 = vmax.f32 %v528_v29, 0.0 }
 0x106   :  { %v531_v37 = vpop.f32.mrf.mxu0  ;;  %v572_v38 = vpop.f32.mrf.mxu1 }
 0x107   :  { %v576_v39 = vmax.f32 %v530_v34, 0.0  ;;  %v578_v40 = vmax.f32 %v571_v35, 0.0  ;;  %v581_v41 = vpack.c.bf16 %v577_v33, %v577_v33  ;;  %v579_v46 = vpack.c.bf16 %v575_v36, %v575_v36 }
 0x108   :  { %v532_v42 = vpop.f32.mrf.mxu0  ;;  %v573_v43 = vpop.f32.mrf.mxu1 }
 0x109   :  { %v580_v44 = vpack.c.bf16 %v576_v39, %v576_v39  ;;  %v582_v45 = vpack.c.bf16 %v578_v40, %v578_v40 }
 0x10b   :  { %878 = vmatprep.mubr.bf16.mxu0 %v580_v44  ;;  %918 = vmatprep.mubr.bf16.mxu1 %v582_v45 }
 0x10c   :  { %879 = vmatmul.mubr.bf16.vlgmr.msra.gmra.mxu0 %v579_v46  ;;  %919 = vmatmul.mubr.bf16.vlgmr.msra.gmra.mxu1 %v581_v41 }
 0x1cc   :  { %v1062_v47 = vpop.f32.mrf.mxu0  ;;  %v1084_v48 = vpop.f32.mrf.mxu1 }
 0x1ce   :  { %v1063_v50 = vpop.f32.mrf.mxu0  ;;  %v1085_v51 = vpop.f32.mrf.mxu1 }
 0x1cf   :  { %v1064_v53 = vadd.f32 %v1063_v50, %v1062_v47  ;;  %v1086_v57 = vadd.f32 %v1085_v51, %v1084_v48 }
 0x1d0   :  { %v1065_v54 = vpop.f32.mrf.mxu0  ;;  %v1087_v55 = vpop.f32.mrf.mxu1 }
 0x1d1   :  { %v881_v56 = vadd.f32 %v1064_v53, %v1011_v49 }
 0x1d2   :  { %v1066_v59 = vpop.f32.mrf.mxu0  ;;  %v1088_v60 = vpop.f32.mrf.mxu1 }
 0x1d3   :  { %v921_v61 = vadd.f32 %v1086_v57, %v881_v56 }
 0x1d5   :  { %v931_v0 = vadd.f32 %v930_v58, %v921_v61 }
 0x1d7   :  { %v932_v1 = vsub.f32 %v931_v0, %v1044_v63 }
 0x1d9   :  { %vm933_vm4 = vcmp.gt.f32.partialorder %v932_v1, 1.0  ;;  %937 = vst.msk [vmem:[%s1583_s7] sm:$0x3] %vm936_vm3, %v932_v1 }
 0x1da   :  { %v1045_v2 = vsel %vm933_vm4, 1.0, %v1221_v62 }
 0x1db   :  { %938 = vst.msk [vmem:[%s1584_s6] sm:$0x3] %vm936_vm3, %v1045_v2 }

</bundles_post_ra>
